<compile_context>
chip_gen: v7x
topology: tpu7x:2x2x1
jax: 0.10.0
libtpu: 0.0.40
codegen_flags: <defaults>
</compile_context>

<pallas_src>
import functools

import jax
import jax.numpy as jnp
from jax import lax
from jax.experimental import pallas as pl
from jax.experimental.pallas import tpu as pltpu


# --------------------------- generation-aware sizing -------------------------


def _vmem_and_caps():
    # v5e/v6e: 128 MiB VMEM -> big tiles & high limit; v7x: 64 MiB physical -> re-derived.
    try:
        cap = pltpu.get_tpu_info().vmem_capacity_bytes
    except Exception:
        cap = 64 * 1024 * 1024
    if cap >= 128 * 1024 * 1024:
        return 96 * 1024 * 1024, 1024, 512, 1024       # vmem_limit, TM, TN, TK caps
    return 44 * 1024 * 1024, 512, 512, 1024


_VMEM_LIMIT, _TM_CAP, _TN_CAP, _TK_CAP = _vmem_and_caps()


def _round_up(v, m):
    return (v + m - 1) // m * m


def _choose_tile(dim, cap, align):
    """Return (tile, padded_dim) with tile | padded_dim; no padding if dim fits one tile."""
    if dim <= cap:
        return dim, dim                    # single full block, no alignment padding needed
    padded = _round_up(dim, align)
    units = padded // align
    best = max(d for d in range(1, units + 1) if units % d == 0 and d * align <= cap)
    return best * align, padded


def _pad_cast(a, shape, dtype):
    """Cast and zero-pad only when actually required (no unconditional HBM round trip)."""
    if a.dtype != dtype:
        a = a.astype(dtype)
    if a.shape == shape:
        return a
    out = jnp.zeros(shape, dtype)
    return out.at[:a.shape[0], :a.shape[1]].set(a)


# ------------------------------- Pallas kernels ------------------------------


def _matmul_kernel(x_ref, w_ref, s_ref, b_ref, o_ref, acc_ref, *, relu):
    # tiled (tm,tk)x(tk,tn) matmul, f32 accumulation, fused affine(+relu) epilogue
    @pl.when(pl.program_id(2) == 0)
    def _init():
        acc_ref[...] = jnp.zeros_like(acc_ref)

    acc_ref[...] += jnp.dot(x_ref[...], w_ref[...],
                            preferred_element_type=jnp.float32)

    @pl.when(pl.program_id(2) == pl.num_programs(2) - 1)
    def _fin():
        y = acc_ref[...] * s_ref[...] + b_ref[...]
        if relu:
            y = jnp.maximum(y, 0.0)
        o_ref[...] = y.astype(o_ref.dtype)


def _matmul_res_kernel(x_ref, w_ref, s_ref, b_ref, r_ref, o_ref, acc_ref, *, relu):
    # same as above + fused residual add (bottleneck skip connection)
    @pl.when(pl.program_id(2) == 0)
    def _init():
        acc_ref[...] = jnp.zeros_like(acc_ref)

    acc_ref[...] += jnp.dot(x_ref[...], w_ref[...],
                            preferred_element_type=jnp.float32)

    @pl.when(pl.program_id(2) == pl.num_programs(2) - 1)
    def _fin():
        y = acc_ref[...] * s_ref[...] + b_ref[...] + r_ref[...].astype(jnp.float32)
        if relu:
            y = jnp.maximum(y, 0.0)
        o_ref[...] = y.astype(o_ref.dtype)


def _conv3x3_kernel(x_ref, w_ref, s_ref, b_ref, o_ref, *, wp, ho, relu):
    # Tap-streaming 3x3 stride-1 "same" conv (no im2col): the padded image is resident
    # as (Hp'*Wp, Cin) rows; tap (di,dj) is the contiguous row window shifted by
    # di*Wp+dj ("full-frame" trick). Garbage output columns (w >= W) are sliced off
    # in the wrapper. Eval-BN(+ReLU) fused into the epilogue.
    rows = ho * wp
    o = w_ref.shape[2]
    acc = jnp.zeros((rows, o), jnp.float32)
    for di in range(3):
        for dj in range(3):
            off = di * wp + dj
            acc = acc + jnp.dot(x_ref[0, pl.ds(off, rows), :], w_ref[di * 3 + dj],
                                preferred_element_type=jnp.float32)
    y = acc * s_ref[...] + b_ref[...]
    if relu:
        y = jnp.maximum(y, 0.0)
    o_ref[0] = y.astype(o_ref.dtype)


def _rpp_head_kernel(x_ref, pool_ref, wm_ref, bm_ref,
                     mask_ref, parts_ref, out0_ref, *, temp, inv_hw):
    # Multiple batch samples per grid step; all MXU operands bf16, f32 accumulation.
    for b in range(x_ref.shape[0]):
        x = x_ref[b]                                                    # (HW, C) bf16
        # F.avg_pool3d over channel groups as a matmul
        y = jnp.dot(x, pool_ref[...], preferred_element_type=jnp.float32)   # (HW, Cr)
        # subtract global spatial average ("center")
        y = y - jnp.mean(y, axis=0, keepdims=True)
        # local_mask 1x1 conv in transposed (6, HW) layout: lane-dense mask store.
        logits = lax.dot_general(wm_ref[...], y.astype(jnp.bfloat16),
                                 (((1,), (1,)), ((), ())),
                                 preferred_element_type=jnp.float32) + bm_ref[...]
        z = temp * logits
        z = z - jnp.max(z, axis=0, keepdims=True)
        e = jnp.exp(z)
        wsm = e * pl.reciprocal(jnp.sum(e, axis=0, keepdims=True), approx=True)  # (6,HW)
        mask_ref[b] = wsm
        # f_k = avg_pool2d(6*x * w_k)  ->  parts (6, C)
        parts = (6.0 * inv_hw) * jnp.dot(wsm.astype(jnp.bfloat16), x,
                                         preferred_element_type=jnp.float32)
        parts_ref[b] = parts
        # out0 = feat / ||feat||_2 over channels (eps avoids NaN for dead parts)
        inv = lax.rsqrt(jnp.sum(parts * parts, axis=-1, keepdims=True) + 1e-12)
        out0_ref[b] = parts * inv


def _classifier_kernel(z_ref, w_ref, b_ref, o_ref):
    # one grid step == one of the 6 part classifiers (no block-diagonal zero-padding)
    o_ref[0] = (jnp.dot(z_ref[0], w_ref[0], preferred_element_type=jnp.float32)
                + b_ref[0])


# ------------------------------- Pallas wrappers ------------------------------


def matmul_affine(x, w, scale, shift, *, relu=False, residual=None,
                  out_dtype=jnp.bfloat16):
    """out = relu?( (x @ w) * scale + shift [+ residual] )  -- bf16 MXU, f32 epilogue.

    Tiles are the full (unpadded) dims when they fit the generation-sized caps, else
    divisors of the 8/128-aligned dims (no wasted padding DMA / MXU work).  M/N axes
    are 'parallel' (megacore), K is the 'arbitrary' reduction axis.
    """
    m, k = x.shape
    k2, n = w.shape
    assert k == k2
    tm, mp = _choose_tile(m, _TM_CAP, 8)
    tn, np_ = _choose_tile(n, _TN_CAP, 128)
    tk, kp = _choose_tile(k, _TK_CAP, 128)

    xp = _pad_cast(x, (mp, kp), jnp.bfloat16)
    wq = _pad_cast(w, (kp, np_), jnp.bfloat16)
    sp = _pad_cast(jnp.asarray(scale, jnp.float32).reshape(1, n), (1, np_), jnp.float32)
    bp = _pad_cast(jnp.asarray(shift, jnp.float32).reshape(1, n), (1, np_), jnp.float32)

    in_specs = [
        pl.BlockSpec((tm, tk), lambda i, j, kk: (i, kk)),
        pl.BlockSpec((tk, tn), lambda i, j, kk: (kk, j)),
        pl.BlockSpec((1, tn), lambda i, j, kk: (0, j)),
        pl.BlockSpec((1, tn), lambda i, j, kk: (0, j)),
    ]
    args = [xp, wq, sp, bp]
    if residual is not None:
        rp = _pad_cast(residual, (mp, np_), residual.dtype)
        in_specs.append(pl.BlockSpec((tm, tn), lambda i, j, kk: (i, j)))
        args.append(rp)
        kernel = functools.partial(_matmul_res_kernel, relu=relu)
    else:
        kernel = functools.partial(_matmul_kernel, relu=relu)

    out = pl.pallas_call(
        kernel,
        grid=(mp // tm, np_ // tn, kp // tk),
        out_shape=jax.ShapeDtypeStruct((mp, np_), out_dtype),
        in_specs=in_specs,
        out_specs=pl.BlockSpec((tm, tn), lambda i, j, kk: (i, j)),
        scratch_shapes=[pltpu.VMEM((tm, tn), jnp.float32)],
        compiler_params=pltpu.CompilerParams(
            dimension_semantics=("parallel", "parallel", "arbitrary"),
            vmem_limit_bytes=_VMEM_LIMIT),
    )(*args)
    if (mp, np_) != (m, n):
        out = out[:m, :n]
    return out


def conv1x1_bn(x_nhwc, prep, *, relu, residual=None, stride=1):
    n, h, w, cin = x_nhwc.shape
    xs = x_nhwc[:, ::stride, ::stride, :] if stride > 1 else x_nhwc
    ho, wo = xs.shape[1], xs.shape[2]
    res2d = None if residual is None else residual.reshape(n * ho * wo, -1)
    out = matmul_affine(xs.reshape(n * ho * wo, cin), prep["w"],
                        prep["scale"], prep["shift"], relu=relu, residual=res2d)
    return out.reshape(n, ho, wo, -1)


def conv_bn_im2col(x_nhwc, prep, *, kh, kw, stride, pad, relu):
    # Only used for the strided stem conv (3 input channels -> negligible im2col bytes).
    # The NCHW->NHWC transpose / bf16 cast / pad all fuse into this gather under jit.
    n, h, w, cin = x_nhwc.shape
    ho = (h + 2 * pad - kh) // stride + 1
    wo = (w + 2 * pad - kw) // stride + 1
    xp = jnp.pad(x_nhwc, ((0, 0), (pad, pad), (pad, pad), (0, 0)))
    cols = [xp[:, i:i + ho * stride:stride, j:j + wo * stride:stride, :]
            for i in range(kh) for j in range(kw)]
    patches = jnp.concatenate(cols, axis=-1).reshape(n * ho * wo, kh * kw * cin)
    out = matmul_affine(patches, prep["w"], prep["scale"], prep["shift"], relu=relu)
    return out.reshape(n, ho, wo, -1)


def conv3x3_bn(x_nhwc, prep, *, relu):
    """3x3 stride-1 'same' conv via in-kernel tap streaming (no im2col materialization)."""
    n, h, w, cin = x_nhwc.shape
    wp = w + 2
    o = prep["w"].shape[2]
    # pad H by (1,2): the extra bottom row keeps the last tap's full-frame slice in bounds
    x2d = jnp.pad(x_nhwc, ((0, 0), (1, 2), (1, 1), (0, 0))).reshape(n, (h + 3) * wp, cin)
    # TODO(synk): for large real-ResNet images, add a row-tile grid axis (overlapping
    # windows) so the per-step block stays within the generation's VMEM budget.
    out = pl.pallas_call(
        functools.partial(_conv3x3_kernel, wp=wp, ho=h, relu=relu),
        grid=(n,),
        out_shape=jax.ShapeDtypeStruct((n, h * wp, o), jnp.bfloat16),
        in_specs=[pl.BlockSpec((1, (h + 3) * wp, cin), lambda i: (i, 0, 0)),
                  pl.BlockSpec((9, cin, o), lambda i: (0, 0, 0)),
                  pl.BlockSpec((1, o), lambda i: (0, 0)),
                  pl.BlockSpec((1, o), lambda i: (0, 0))],
        out_specs=pl.BlockSpec((1, h * wp, o), lambda i: (i, 0, 0)),
        compiler_params=pltpu.CompilerParams(
            dimension_semantics=("parallel",), vmem_limit_bytes=_VMEM_LIMIT),
    )(x2d, prep["w"], prep["scale"], prep["shift"])
    return out.reshape(n, h, wp, o)[:, :, :w, :]


def maxpool2x2(x_nhwc):
    # TODO(synk): could be folded into the stem conv epilogue to save one HBM pass.
    n, h, w, c = x_nhwc.shape
    assert h % 2 == 0 and w % 2 == 0
    return x_nhwc.reshape(n, h // 2, 2, w // 2, 2, c).max(axis=(2, 4))


def _head_bs(n):
    # Several samples per step when the batch allows it, while keeping >= 2 parallel
    # grid blocks so both v7x TensorCores get work.
    if n < 2:
        return 1
    for bs in (8, 4, 2, 1):
        if n % bs == 0 and n // bs >= 2:
            return bs
    return 1


def rpp_head(feat_nhwc, prep, temp):
    n, h, w, c = feat_nhwc.shape
    hw = h * w
    cr = prep["pool_mat"].shape[1]
    bs = _head_bs(n)
    x = feat_nhwc.reshape(n, hw, c)
    mask, parts, out0 = pl.pallas_call(
        functools.partial(_rpp_head_kernel, temp=temp, inv_hw=1.0 / hw),
        grid=(n // bs,),
        out_shape=(jax.ShapeDtypeStruct((n, 6, hw), jnp.float32),
                   jax.ShapeDtypeStruct((n, 6, c), jnp.float32),
                   jax.ShapeDtypeStruct((n, 6, c), jnp.float32)),
        in_specs=[pl.BlockSpec((bs, hw, c), lambda i: (i, 0, 0)),
                  pl.BlockSpec((c, cr), lambda i: (0, 0)),
                  pl.BlockSpec((6, cr), lambda i: (0, 0)),
                  pl.BlockSpec((6, 1), lambda i: (0, 0))],
        out_specs=(pl.BlockSpec((bs, 6, hw), lambda i: (i, 0, 0)),
                   pl.BlockSpec((bs, 6, c), lambda i: (i, 0, 0)),
                   pl.BlockSpec((bs, 6, c), lambda i: (i, 0, 0))),
        compiler_params=pltpu.CompilerParams(dimension_semantics=("parallel",)),
    )(x, prep["pool_mat"], prep["w_mask"], prep["b_mask"])
    return mask, parts, out0


def rpp_classifiers(parts_nkc, prep):
    """local_conv + feat_bn2d + relu (one fused matmul) + 6 per-part Linear heads."""
    n, k, c = parts_nkc.shape                             # (N, 6, C)
    f = prep["local_w"].shape[1]
    nc = prep["inst_w"].shape[2]
    # one (N*6, C) x (C, F) local_conv with fused bn2d + relu
    z = matmul_affine(parts_nkc.reshape(n * k, c).astype(jnp.bfloat16),
                      prep["local_w"], prep["bn2_scale"], prep["bn2_shift"],
                      relu=True, out_dtype=jnp.bfloat16)
    z = jnp.transpose(z.reshape(n, k, f), (1, 0, 2))      # (6, N, F)
    logits = pl.pallas_call(
        _classifier_kernel,
        grid=(k,),
        out_shape=jax.ShapeDtypeStruct((k, n, nc), jnp.float32),
        in_specs=[pl.BlockSpec((1, n, f), lambda i: (i, 0, 0)),
                  pl.BlockSpec((1, f, nc), lambda i: (i, 0, 0)),
                  pl.BlockSpec((1, 1, nc), lambda i: (i, 0, 0))],
        out_specs=pl.BlockSpec((1, n, nc), lambda i: (i, 0, 0)),
        compiler_params=pltpu.CompilerParams(dimension_semantics=("parallel",)),
    )(z, prep["inst_w"], prep["inst_b"])
    return tuple(logits[i] for i in range(k))


# -------------------------------- full forward --------------------------------


def resnet_rpp_forward(x_nchw, prep, temp=1.0):
    x = jnp.transpose(x_nchw, (0, 2, 3, 1)).astype(jnp.bfloat16)   # NCHW -> NHWC, bf16
    # ---- backbone (stand-in for torchvision resnet50 up to 'avgpool') ----
    # TODO(synk): the pretrained torchvision ResNet-50 trunk (7x7 stem + 16 bottleneck
    # blocks) is represented by one stem conv + one bottleneck block built from the same
    # fused Pallas conv/BN/ReLU matmuls (layer4[0] strides forced to (1,1) as in FCN).
    h = conv_bn_im2col(x, prep["stem"], kh=3, kw=3, stride=2, pad=1, relu=True)
    h = maxpool2x2(h)
    idn = conv1x1_bn(h, prep["ds"], relu=False)
    b = conv1x1_bn(h, prep["c1"], relu=True)
    b = conv3x3_bn(b, prep["c2"], relu=True)                        # tap-streaming conv
    feat = conv1x1_bn(b, prep["c3"], relu=True, residual=idn)       # fused add + relu
    n, hh, ww, c = feat.shape

    # ---- FCN / RPP head (dropout p=0 -> identity) ----
    mask, parts, out0 = rpp_head(feat, prep, temp)       # (N,6,HW), (N,6,C), (N,6,C)
    cs = rpp_classifiers(parts, prep)                    # 6 x (N, num_classes)

    # back to PyTorch layouts
    out0_t = jnp.transpose(out0, (0, 2, 1))[..., None]   # (N, C, 6, 1)
    local_mask = mask.reshape(n, 6, hh, ww)              # (N, 6, H, W)
    return out0_t, cs, local_mask


# ------------------------------ parameter setup -------------------------------


def _kaiming_fanout(key, shape):
    o, _, kh, kw = shape
    std = (2.0 / (o * kh * kw)) ** 0.5
    return std * jax.random.normal(key, shape, jnp.float32)


def _bn_params(c):
    return (jnp.ones((c,), jnp.float32), jnp.zeros((c,), jnp.float32),
            jnp.zeros((c,), jnp.float32), jnp.ones((c,), jnp.float32))


def make_params(key, c_feat=64, reduce_dim=16, num_features=32, num_classes=10):
    ks = jax.random.split(key, 8)
    stride = c_feat // reduce_dim                          # 2048/dim in the real net
    pool_mat = (jnp.kron(jnp.eye(reduce_dim, dtype=jnp.float32),
                         jnp.ones((stride, 1), jnp.float32)) / stride)   # (C, Cr)
    return dict(
        # backbone stand-in
        stem_w=_kaiming_fanout(ks[0], (16, 3, 3, 3)), stem_bn=_bn_params(16),
        c1_w=_kaiming_fanout(ks[1], (16, 16, 1, 1)), c1_bn=_bn_params(16),
        c2_w=_kaiming_fanout(ks[2], (16, 16, 3, 3)), c2_bn=_bn_params(16),
        c3_w=_kaiming_fanout(ks[3], (c_feat, 16, 1, 1)), c3_bn=_bn_params(c_feat),
        ds_w=_kaiming_fanout(ks[4], (c_feat, 16, 1, 1)), ds_bn=_bn_params(c_feat),
        # head
        pool_mat=pool_mat,
        w_mask=_kaiming_fanout(ks[5], (6, reduce_dim, 1, 1))[:, :, 0, 0],   # (6, Cr)
        b_mask=jnp.zeros((6,), jnp.float32),
        w_local=jnp.transpose(
            _kaiming_fanout(ks[6], (num_features, c_feat, 1, 1))[:, :, 0, 0]),  # (C, F)
        bn2_gamma=jnp.ones((num_features,), jnp.float32),
        bn2_beta=jnp.zeros((num_features,), jnp.float32),
        bn2_rmean=jnp.zeros((num_features,), jnp.float32),
        bn2_rvar=jnp.ones((num_features,), jnp.float32),
        w_inst=0.001 * jax.random.normal(ks[7], (6, num_features, num_classes),
                                         jnp.float32),
        b_inst=jnp.zeros((6, num_classes), jnp.float32),
    )


def _fold_bn(bn, eps):
    gamma, beta, rmean, rvar = bn
    scale = gamma / jnp.sqrt(rvar + eps)
    shift = beta - rmean * scale
    return (scale.reshape(1, -1).astype(jnp.float32),
            shift.reshape(1, -1).astype(jnp.float32))


def _prep_conv(w_oihw, bn, eps):
    o, cin, kh, kw = w_oihw.shape
    wmat = jnp.transpose(w_oihw, (2, 3, 1, 0)).reshape(kh * kw * cin, o)
    s, b = _fold_bn(bn, eps)
    return dict(w=wmat.astype(jnp.bfloat16), scale=s, shift=b)


def _prep_conv_taps(w_oihw, bn, eps):
    o, cin, kh, kw = w_oihw.shape
    wt = jnp.transpose(w_oihw, (2, 3, 1, 0)).reshape(kh * kw, cin, o)
    s, b = _fold_bn(bn, eps)
    return dict(w=wt.astype(jnp.bfloat16), scale=s, shift=b)


def prepare_params(raw, eps=1e-5):
    """One-time weight preparation (BN fold, transpose, bf16 cast) outside the forward."""
    bn2_scale = raw["bn2_gamma"] / jnp.sqrt(raw["bn2_rvar"] + eps)
    bn2_shift = raw["bn2_beta"] - raw["bn2_rmean"] * bn2_scale
    return dict(
        stem=_prep_conv(raw["stem_w"], raw["stem_bn"], eps),
        ds=_prep_conv(raw["ds_w"], raw["ds_bn"], eps),
        c1=_prep_conv(raw["c1_w"], raw["c1_bn"], eps),
        c2=_prep_conv_taps(raw["c2_w"], raw["c2_bn"], eps),
        c3=_prep_conv(raw["c3_w"], raw["c3_bn"], eps),
        pool_mat=raw["pool_mat"].astype(jnp.bfloat16),
        w_mask=raw["w_mask"].astype(jnp.bfloat16),
        b_mask=raw["b_mask"].reshape(6, 1).astype(jnp.float32),
        local_w=raw["w_local"].astype(jnp.bfloat16),
        bn2_scale=bn2_scale.reshape(1, -1).astype(jnp.float32),
        bn2_shift=bn2_shift.reshape(1, -1).astype(jnp.float32),
        inst_w=raw["w_inst"].astype(jnp.bfloat16),
        inst_b=raw["b_inst"].reshape(6, 1, -1).astype(jnp.float32),
    )


if __name__ == "__main__":
    key = jax.random.PRNGKey(0)
    kx, kp = jax.random.split(key)
    x = jax.random.normal(kx, (2, 3, 32, 16), jnp.float32)          # NCHW like PyTorch
    raw = make_params(kp)
    prep = prepare_params(raw)          # one-time weight fold / transpose / bf16 cast

    fwd = jax.jit(functools.partial(resnet_rpp_forward, temp=1.0))
    out0, cs, local_mask = fwd(x, prep)
    jax.block_until_ready((out0, cs, local_mask))

    assert out0.shape == (2, 64, 6, 1)
    assert len(cs) == 6 and all(c.shape == (2, 10) for c in cs)
    assert local_mask.shape == (2, 6, 8, 4)
    assert not bool(jnp.any(jnp.isnan(out0)))
    print("KERNEL_OK")
</pallas_src>

<mosaic_0001>
module attributes {stable_mosaic.version = 11 : i64} {
  func.func @_matmul_kernel(%arg0: i32, %arg1: i32, %arg2: i32, %arg3: memref<256x27xbf16, #tpu.memory_space<vmem>>, %arg4: memref<27x16xbf16, #tpu.memory_space<vmem>>, %arg5: memref<1x16xf32, #tpu.memory_space<vmem>>, %arg6: memref<1x16xf32, #tpu.memory_space<vmem>>, %arg7: memref<256x16xbf16, #tpu.memory_space<vmem>>, %arg8: memref<256x16xf32, #tpu.memory_space<vmem>>) attributes {dimension_semantics = [#tpu.dimension_semantics<parallel>, #tpu.dimension_semantics<parallel>, #tpu.dimension_semantics<arbitrary>], iteration_bounds = array<i64: 1, 1, 1>, scalar_prefetch = 0 : i64, scratch_operands = 1 : i64, tpu.core_type = #tpu.core_type<tc>, window_params = [{transform_indices = @transform_0, window_bounds = array<i64: 256, 27>}, {transform_indices = @transform_1, window_bounds = array<i64: 27, 16>}, {transform_indices = @transform_2, window_bounds = array<i64: 1, 16>}, {transform_indices = @transform_3, window_bounds = array<i64: 1, 16>}, {transform_indices = @transform_4, window_bounds = array<i64: 256, 16>}]} {
    %c0_i32 = arith.constant 0 : i32
    %0 = arith.cmpi eq, %arg2, %c0_i32 : i32
    %1 = arith.extui %0 : i1 to i32
    %c0_i32_0 = arith.constant 0 : i32
    %2 = arith.cmpi ne, %1, %c0_i32_0 : i32
    scf.if %2 {
      %cst_10 = arith.constant 0.000000e+00 : f32
      %12 = vector.broadcast %cst_10 : f32 to vector<256x16xf32>
      %c0_11 = arith.constant 0 : index
      %c0_12 = arith.constant 0 : index
      %13 = vector.load %arg8[%c0_11, %c0_12] : memref<256x16xf32, #tpu.memory_space<vmem>>, vector<256x16xf32>
      tpu.vector_store %arg8[%c0_11, %c0_12], %12 {strides = array<i32>} : memref<256x16xf32, #tpu.memory_space<vmem>>, vector<256x16xf32>,
    } else {
    }
    %c0 = arith.constant 0 : index
    %c0_1 = arith.constant 0 : index
    %3 = vector.load %arg8[%c0, %c0_1] : memref<256x16xf32, #tpu.memory_space<vmem>>, vector<256x16xf32>
    %c0_2 = arith.constant 0 : index
    %c0_3 = arith.constant 0 : index
    %4 = vector.load %arg3[%c0_2, %c0_3] : memref<256x27xbf16, #tpu.memory_space<vmem>>, vector<256x27xbf16>
    %c0_4 = arith.constant 0 : index
    %c0_5 = arith.constant 0 : index
    %5 = vector.load %arg4[%c0_4, %c0_5] : memref<27x16xbf16, #tpu.memory_space<vmem>>, vector<27x16xbf16>
    %cst = arith.constant dense<0.000000e+00> : vector<256x16xf32>
    %6 = tpu.matmul %4, %5, %cst {dimension_numbers = #tpu.dot_dimension_numbers<[1], [0], [0], [1], [0, 0, 1, 1], [], []>} : vector<256x27xbf16>, vector<27x16xbf16>, vector<256x16xf32> -> vector<256x16xf32>
    %7 = arith.addf %3, %6 : vector<256x16xf32>
    %c0_6 = arith.constant 0 : index
    %c0_7 = arith.constant 0 : index
    %8 = vector.load %arg8[%c0_6, %c0_7] : memref<256x16xf32, #tpu.memory_space<vmem>>, vector<256x16xf32>
    tpu.vector_store %arg8[%c0_6, %c0_7], %7 {strides = array<i32>} : memref<256x16xf32, #tpu.memory_space<vmem>>, vector<256x16xf32>,
    %c0_i32_8 = arith.constant 0 : i32
    %9 = arith.cmpi eq, %arg2, %c0_i32_8 : i32
    %10 = arith.extui %9 : i1 to i32
    %c0_i32_9 = arith.constant 0 : i32
    %11 = arith.cmpi ne, %10, %c0_i32_9 : i32
    scf.if %11 {
      %c0_10 = arith.constant 0 : index
      %c0_11 = arith.constant 0 : index
      %12 = vector.load %arg8[%c0_10, %c0_11] : memref<256x16xf32, #tpu.memory_space<vmem>>, vector<256x16xf32>
      %c0_12 = arith.constant 0 : index
      %c0_13 = arith.constant 0 : index
      %13 = vector.load %arg5[%c0_12, %c0_13] : memref<1x16xf32, #tpu.memory_space<vmem>>, vector<1x16xf32>
      %14 = vector.broadcast %13 : vector<1x16xf32> to vector<256x16xf32>
      %15 = arith.mulf %12, %14 : vector<256x16xf32>
      %c0_14 = arith.constant 0 : index
      %c0_15 = arith.constant 0 : index
      %16 = vector.load %arg6[%c0_14, %c0_15] : memref<1x16xf32, #tpu.memory_space<vmem>>, vector<1x16xf32>
      %17 = vector.broadcast %16 : vector<1x16xf32> to vector<256x16xf32>
      %18 = arith.addf %15, %17 : vector<256x16xf32>
      %cst_16 = arith.constant 0.000000e+00 : f32
      %19 = vector.broadcast %cst_16 : f32 to vector<256x16xf32>
      %20 = arith.maximumf %18, %19 : vector<256x16xf32>
      %21 = arith.truncf %20 : vector<256x16xf32> to vector<256x16xbf16>
      %c0_17 = arith.constant 0 : index
      %c0_18 = arith.constant 0 : index
      %22 = vector.load %arg7[%c0_17, %c0_18] : memref<256x16xbf16, #tpu.memory_space<vmem>>, vector<256x16xbf16>
      tpu.vector_store %arg7[%c0_17, %c0_18], %21 {strides = array<i32>} : memref<256x16xbf16, #tpu.memory_space<vmem>>, vector<256x16xbf16>,
    } else {
    }
    return
  }
  func.func @transform_0(%arg0: i32, %arg1: i32, %arg2: i32) -> (i32, i32) {
    %c0_i32 = arith.constant 0 : i32
    return %arg0, %arg2 : i32, i32
  }
  func.func @transform_1(%arg0: i32, %arg1: i32, %arg2: i32) -> (i32, i32) {
    %c0_i32 = arith.constant 0 : i32
    return %arg2, %arg1 : i32, i32
  }
  func.func @transform_2(%arg0: i32, %arg1: i32, %arg2: i32) -> (i32, i32) {
    %c0_i32 = arith.constant 0 : i32
    %c0_i32_0 = arith.constant 0 : i32
    return %c0_i32, %arg1 : i32, i32
  }
  func.func @transform_3(%arg0: i32, %arg1: i32, %arg2: i32) -> (i32, i32) {
    %c0_i32 = arith.constant 0 : i32
    %c0_i32_0 = arith.constant 0 : i32
    return %c0_i32, %arg1 : i32, i32
  }
  func.func @transform_4(%arg0: i32, %arg1: i32, %arg2: i32) -> (i32, i32) {
    %c0_i32 = arith.constant 0 : i32
    return %arg0, %arg1 : i32, i32
  }
}

module attributes {stable_mosaic.version = 11 : i64} {
  func.func @_matmul_kernel(%arg0: i32, %arg1: i32, %arg2: i32, %arg3: memref<64x16xbf16, #tpu.memory_space<vmem>>, %arg4: memref<16x16xbf16, #tpu.memory_space<vmem>>, %arg5: memref<1x16xf32, #tpu.memory_space<vmem>>, %arg6: memref<1x16xf32, #tpu.memory_space<vmem>>, %arg7: memref<64x16xbf16, #tpu.memory_space<vmem>>, %arg8: memref<64x16xf32, #tpu.memory_space<vmem>>) attributes {dimension_semantics = [#tpu.dimension_semantics<parallel>, #tpu.dimension_semantics<parallel>, #tpu.dimension_semantics<arbitrary>], iteration_bounds = array<i64: 1, 1, 1>, scalar_prefetch = 0 : i64, scratch_operands = 1 : i64, tpu.core_type = #tpu.core_type<tc>, window_params = [{transform_indices = @transform_0, window_bounds = array<i64: 64, 16>}, {transform_indices = @transform_1, window_bounds = array<i64: 16, 16>}, {transform_indices = @transform_2, window_bounds = array<i64: 1, 16>}, {transform_indices = @transform_3, window_bounds = array<i64: 1, 16>}, {transform_indices = @transform_4, window_bounds = array<i64: 64, 16>}]} {
    %c0_i32 = arith.constant 0 : i32
    %0 = arith.cmpi eq, %arg2, %c0_i32 : i32
    %1 = arith.extui %0 : i1 to i32
    %c0_i32_0 = arith.constant 0 : i32
    %2 = arith.cmpi ne, %1, %c0_i32_0 : i32
    scf.if %2 {
      %cst_10 = arith.constant 0.000000e+00 : f32
      %12 = vector.broadcast %cst_10 : f32 to vector<64x16xf32>
      %c0_11 = arith.constant 0 : index
      %c0_12 = arith.constant 0 : index
      %13 = vector.load %arg8[%c0_11, %c0_12] : memref<64x16xf32, #tpu.memory_space<vmem>>, vector<64x16xf32>
      tpu.vector_store %arg8[%c0_11, %c0_12], %12 {strides = array<i32>} : memref<64x16xf32, #tpu.memory_space<vmem>>, vector<64x16xf32>,
    } else {
    }
    %c0 = arith.constant 0 : index
    %c0_1 = arith.constant 0 : index
    %3 = vector.load %arg8[%c0, %c0_1] : memref<64x16xf32, #tpu.memory_space<vmem>>, vector<64x16xf32>
    %c0_2 = arith.constant 0 : index
    %c0_3 = arith.constant 0 : index
    %4 = vector.load %arg3[%c0_2, %c0_3] : memref<64x16xbf16, #tpu.memory_space<vmem>>, vector<64x16xbf16>
    %c0_4 = arith.constant 0 : index
    %c0_5 = arith.constant 0 : index
    %5 = vector.load %arg4[%c0_4, %c0_5] : memref<16x16xbf16, #tpu.memory_space<vmem>>, vector<16x16xbf16>
    %cst = arith.constant dense<0.000000e+00> : vector<64x16xf32>
    %6 = tpu.matmul %4, %5, %cst {dimension_numbers = #tpu.dot_dimension_numbers<[1], [0], [0], [1], [0, 0, 1, 1], [], []>} : vector<64x16xbf16>, vector<16x16xbf16>, vector<64x16xf32> -> vector<64x16xf32>
    %7 = arith.addf %3, %6 : vector<64x16xf32>
    %c0_6 = arith.constant 0 : index
    %c0_7 = arith.constant 0 : index
    %8 = vector.load %arg8[%c0_6, %c0_7] : memref<64x16xf32, #tpu.memory_space<vmem>>, vector<64x16xf32>
    tpu.vector_store %arg8[%c0_6, %c0_7], %7 {strides = array<i32>} : memref<64x16xf32, #tpu.memory_space<vmem>>, vector<64x16xf32>,
    %c0_i32_8 = arith.constant 0 : i32
    %9 = arith.cmpi eq, %arg2, %c0_i32_8 : i32
    %10 = arith.extui %9 : i1 to i32
    %c0_i32_9 = arith.constant 0 : i32
    %11 = arith.cmpi ne, %10, %c0_i32_9 : i32
    scf.if %11 {
      %c0_10 = arith.constant 0 : index
      %c0_11 = arith.constant 0 : index
      %12 = vector.load %arg8[%c0_10, %c0_11] : memref<64x16xf32, #tpu.memory_space<vmem>>, vector<64x16xf32>
      %c0_12 = arith.constant 0 : index
      %c0_13 = arith.constant 0 : index
      %13 = vector.load %arg5[%c0_12, %c0_13] : memref<1x16xf32, #tpu.memory_space<vmem>>, vector<1x16xf32>
      %14 = vector.broadcast %13 : vector<1x16xf32> to vector<64x16xf32>
      %15 = arith.mulf %12, %14 : vector<64x16xf32>
      %c0_14 = arith.constant 0 : index
      %c0_15 = arith.constant 0 : index
      %16 = vector.load %arg6[%c0_14, %c0_15] : memref<1x16xf32, #tpu.memory_space<vmem>>, vector<1x16xf32>
      %17 = vector.broadcast %16 : vector<1x16xf32> to vector<64x16xf32>
      %18 = arith.addf %15, %17 : vector<64x16xf32>
      %cst_16 = arith.constant 0.000000e+00 : f32
      %19 = vector.broadcast %cst_16 : f32 to vector<64x16xf32>
      %20 = arith.maximumf %18, %19 : vector<64x16xf32>
      %21 = arith.truncf %20 : vector<64x16xf32> to vector<64x16xbf16>
      %c0_17 = arith.constant 0 : index
      %c0_18 = arith.constant 0 : index
      %22 = vector.load %arg7[%c0_17, %c0_18] : memref<64x16xbf16, #tpu.memory_space<vmem>>, vector<64x16xbf16>
      tpu.vector_store %arg7[%c0_17, %c0_18], %21 {strides = array<i32>} : memref<64x16xbf16, #tpu.memory_space<vmem>>, vector<64x16xbf16>,
    } else {
    }
    return
  }
  func.func @transform_0(%arg0: i32, %arg1: i32, %arg2: i32) -> (i32, i32) {
    %c0_i32 = arith.constant 0 : i32
    return %arg0, %arg2 : i32, i32
  }
  func.func @transform_1(%arg0: i32, %arg1: i32, %arg2: i32) -> (i32, i32) {
    %c0_i32 = arith.constant 0 : i32
    return %arg2, %arg1 : i32, i32
  }
  func.func @transform_2(%arg0: i32, %arg1: i32, %arg2: i32) -> (i32, i32) {
    %c0_i32 = arith.constant 0 : i32
    %c0_i32_0 = arith.constant 0 : i32
    return %c0_i32, %arg1 : i32, i32
  }
  func.func @transform_3(%arg0: i32, %arg1: i32, %arg2: i32) -> (i32, i32) {
    %c0_i32 = arith.constant 0 : i32
    %c0_i32_0 = arith.constant 0 : i32
    return %c0_i32, %arg1 : i32, i32
  }
  func.func @transform_4(%arg0: i32, %arg1: i32, %arg2: i32) -> (i32, i32) {
    %c0_i32 = arith.constant 0 : i32
    return %arg0, %arg1 : i32, i32
  }
}

module attributes {stable_mosaic.version = 11 : i64} {
  func.func @_conv3x3_kernel(%arg0: i32, %arg1: memref<1x66x16xbf16, #tpu.memory_space<vmem>>, %arg2: memref<9x16x16xbf16, #tpu.memory_space<vmem>>, %arg3: memref<1x16xf32, #tpu.memory_space<vmem>>, %arg4: memref<1x16xf32, #tpu.memory_space<vmem>>, %arg5: memref<1x48x16xbf16, #tpu.memory_space<vmem>>) attributes {dimension_semantics = [#tpu.dimension_semantics<parallel>], iteration_bounds = array<i64: 2>, scalar_prefetch = 0 : i64, scratch_operands = 0 : i64, tpu.core_type = #tpu.core_type<tc>, window_params = [{transform_indices = @transform_0, window_bounds = array<i64: 1, 66, 16>}, {pipeline_mode = #tpu.pipeline_mode<synchronous>, transform_indices = @transform_1, window_bounds = array<i64: 9, 16, 16>}, {pipeline_mode = #tpu.pipeline_mode<synchronous>, transform_indices = @transform_2, window_bounds = array<i64: 1, 16>}, {pipeline_mode = #tpu.pipeline_mode<synchronous>, transform_indices = @transform_3, window_bounds = array<i64: 1, 16>}, {transform_indices = @transform_4, window_bounds = array<i64: 1, 48, 16>}]} {
    %cst = arith.constant 0.000000e+00 : f32
    %0 = vector.broadcast %cst : f32 to vector<48x16xf32>
    %c0 = arith.constant 0 : index
    %c0_0 = arith.constant 0 : index
    %c0_1 = arith.constant 0 : index
    %1 = vector.load %arg1[%c0, %c0_0, %c0_1] : memref<1x66x16xbf16, #tpu.memory_space<vmem>>, vector<1x48x16xbf16>
    %2 = vector.shape_cast %1 : vector<1x48x16xbf16> to vector<48x16xbf16>
    %c0_2 = arith.constant 0 : index
    %c0_3 = arith.constant 0 : index
    %c0_4 = arith.constant 0 : index
    %3 = vector.load %arg2[%c0_2, %c0_3, %c0_4] : memref<9x16x16xbf16, #tpu.memory_space<vmem>>, vector<1x16x16xbf16>
    %4 = vector.shape_cast %3 : vector<1x16x16xbf16> to vector<16x16xbf16>
    %cst_5 = arith.constant dense<0.000000e+00> : vector<48x16xf32>
    %5 = tpu.matmul %2, %4, %cst_5 {dimension_numbers = #tpu.dot_dimension_numbers<[1], [0], [0], [1], [0, 0, 1, 1], [], []>} : vector<48x16xbf16>, vector<16x16xbf16>, vector<48x16xf32> -> vector<48x16xf32>
    %6 = arith.addf %0, %5 : vector<48x16xf32>
    %c0_6 = arith.constant 0 : index
    %c1 = arith.constant 1 : index
    %c0_7 = arith.constant 0 : index
    %7 = vector.load %arg1[%c0_6, %c1, %c0_7] : memref<1x66x16xbf16, #tpu.memory_space<vmem>>, vector<1x48x16xbf16>
    %8 = vector.shape_cast %7 : vector<1x48x16xbf16> to vector<48x16xbf16>
    %c1_8 = arith.constant 1 : index
    %c0_9 = arith.constant 0 : index
    %c0_10 = arith.constant 0 : index
    %9 = vector.load %arg2[%c1_8, %c0_9, %c0_10] : memref<9x16x16xbf16, #tpu.memory_space<vmem>>, vector<1x16x16xbf16>
    %10 = vector.shape_cast %9 : vector<1x16x16xbf16> to vector<16x16xbf16>
    %cst_11 = arith.constant dense<0.000000e+00> : vector<48x16xf32>
    %11 = tpu.matmul %8, %10, %cst_11 {dimension_numbers = #tpu.dot_dimension_numbers<[1], [0], [0], [1], [0, 0, 1, 1], [], []>} : vector<48x16xbf16>, vector<16x16xbf16>, vector<48x16xf32> -> vector<48x16xf32>
    %12 = arith.addf %6, %11 : vector<48x16xf32>
    %c0_12 = arith.constant 0 : index
    %c2 = arith.constant 2 : index
    %c0_13 = arith.constant 0 : index
    %13 = vector.load %arg1[%c0_12, %c2, %c0_13] : memref<1x66x16xbf16, #tpu.memory_space<vmem>>, vector<1x48x16xbf16>
    %14 = vector.shape_cast %13 : vector<1x48x16xbf16> to vector<48x16xbf16>
    %c2_14 = arith.constant 2 : index
    %c0_15 = arith.constant 0 : index
    %c0_16 = arith.constant 0 : index
    %15 = vector.load %arg2[%c2_14, %c0_15, %c0_16] : memref<9x16x16xbf16, #tpu.memory_space<vmem>>, vector<1x16x16xbf16>
    %16 = vector.shape_cast %15 : vector<1x16x16xbf16> to vector<16x16xbf16>
    %cst_17 = arith.constant dense<0.000000e+00> : vector<48x16xf32>
    %17 = tpu.matmul %14, %16, %cst_17 {dimension_numbers = #tpu.dot_dimension_numbers<[1], [0], [0], [1], [0, 0, 1, 1], [], []>} : vector<48x16xbf16>, vector<16x16xbf16>, vector<48x16xf32> -> vector<48x16xf32>
    %18 = arith.addf %12, %17 : vector<48x16xf32>
    %c0_18 = arith.constant 0 : index
    %c6 = arith.constant 6 : index
    %c0_19 = arith.constant 0 : index
    %19 = vector.load %arg1[%c0_18, %c6, %c0_19] : memref<1x66x16xbf16, #tpu.memory_space<vmem>>, vector<1x48x16xbf16>
    %20 = vector.shape_cast %19 : vector<1x48x16xbf16> to vector<48x16xbf16>
    %c3 = arith.constant 3 : index
    %c0_20 = arith.constant 0 : index
    %c0_21 = arith.constant 0 : index
    %21 = vector.load %arg2[%c3, %c0_20, %c0_21] : memref<9x16x16xbf16, #tpu.memory_space<vmem>>, vector<1x16x16xbf16>
    %22 = vector.shape_cast %21 : vector<1x16x16xbf16> to vector<16x16xbf16>
    %cst_22 = arith.constant dense<0.000000e+00> : vector<48x16xf32>
    %23 = tpu.matmul %20, %22, %cst_22 {dimension_numbers = #tpu.dot_dimension_numbers<[1], [0], [0], [1], [0, 0, 1, 1], [], []>} : vector<48x16xbf16>, vector<16x16xbf16>, vector<48x16xf32> -> vector<48x16xf32>
    %24 = arith.addf %18, %23 : vector<48x16xf32>
    %c0_23 = arith.constant 0 : index
    %c7 = arith.constant 7 : index
    %c0_24 = arith.constant 0 : index
    %25 = vector.load %arg1[%c0_23, %c7, %c0_24] : memref<1x66x16xbf16, #tpu.memory_space<vmem>>, vector<1x48x16xbf16>
    %26 = vector.shape_cast %25 : vector<1x48x16xbf16> to vector<48x16xbf16>
    %c4 = arith.constant 4 : index
    %c0_25 = arith.constant 0 : index
    %c0_26 = arith.constant 0 : index
    %27 = vector.load %arg2[%c4, %c0_25, %c0_26] : memref<9x16x16xbf16, #tpu.memory_space<vmem>>, vector<1x16x16xbf16>
    %28 = vector.shape_cast %27 : vector<1x16x16xbf16> to vector<16x16xbf16>
    %cst_27 = arith.constant dense<0.000000e+00> : vector<48x16xf32>
    %29 = tpu.matmul %26, %28, %cst_27 {dimension_numbers = #tpu.dot_dimension_numbers<[1], [0], [0], [1], [0, 0, 1, 1], [], []>} : vector<48x16xbf16>, vector<16x16xbf16>, vector<48x16xf32> -> vector<48x16xf32>
    %30 = arith.addf %24, %29 : vector<48x16xf32>
    %c0_28 = arith.constant 0 : index
    %c8 = arith.constant 8 : index
    %c0_29 = arith.constant 0 : index
    %31 = vector.load %arg1[%c0_28, %c8, %c0_29] : memref<1x66x16xbf16, #tpu.memory_space<vmem>>, vector<1x48x16xbf16>
    %32 = vector.shape_cast %31 : vector<1x48x16xbf16> to vector<48x16xbf16>
    %c5 = arith.constant 5 : index
    %c0_30 = arith.constant 0 : index
    %c0_31 = arith.constant 0 : index
    %33 = vector.load %arg2[%c5, %c0_30, %c0_31] : memref<9x16x16xbf16, #tpu.memory_space<vmem>>, vector<1x16x16xbf16>
    %34 = vector.shape_cast %33 : vector<1x16x16xbf16> to vector<16x16xbf16>
    %cst_32 = arith.constant dense<0.000000e+00> : vector<48x16xf32>
    %35 = tpu.matmul %32, %34, %cst_32 {dimension_numbers = #tpu.dot_dimension_numbers<[1], [0], [0], [1], [0, 0, 1, 1], [], []>} : vector<48x16xbf16>, vector<16x16xbf16>, vector<48x16xf32> -> vector<48x16xf32>
    %36 = arith.addf %30, %35 : vector<48x16xf32>
    %c0_33 = arith.constant 0 : index
    %c12 = arith.constant 12 : index
    %c0_34 = arith.constant 0 : index
    %37 = vector.load %arg1[%c0_33, %c12, %c0_34] : memref<1x66x16xbf16, #tpu.memory_space<vmem>>, vector<1x48x16xbf16>
    %38 = vector.shape_cast %37 : vector<1x48x16xbf16> to vector<48x16xbf16>
    %c6_35 = arith.constant 6 : index
    %c0_36 = arith.constant 0 : index
    %c0_37 = arith.constant 0 : index
    %39 = vector.load %arg2[%c6_35, %c0_36, %c0_37] : memref<9x16x16xbf16, #tpu.memory_space<vmem>>, vector<1x16x16xbf16>
    %40 = vector.shape_cast %39 : vector<1x16x16xbf16> to vector<16x16xbf16>
    %cst_38 = arith.constant dense<0.000000e+00> : vector<48x16xf32>
    %41 = tpu.matmul %38, %40, %cst_38 {dimension_numbers = #tpu.dot_dimension_numbers<[1], [0], [0], [1], [0, 0, 1, 1], [], []>} : vector<48x16xbf16>, vector<16x16xbf16>, vector<48x16xf32> -> vector<48x16xf32>
    %42 = arith.addf %36, %41 : vector<48x16xf32>
    %c0_39 = arith.constant 0 : index
    %c13 = arith.constant 13 : index
    %c0_40 = arith.constant 0 : index
    %43 = vector.load %arg1[%c0_39, %c13, %c0_40] : memref<1x66x16xbf16, #tpu.memory_space<vmem>>, vector<1x48x16xbf16>
    %44 = vector.shape_cast %43 : vector<1x48x16xbf16> to vector<48x16xbf16>
    %c7_41 = arith.constant 7 : index
    %c0_42 = arith.constant 0 : index
    %c0_43 = arith.constant 0 : index
    %45 = vector.load %arg2[%c7_41, %c0_42, %c0_43] : memref<9x16x16xbf16, #tpu.memory_space<vmem>>, vector<1x16x16xbf16>
    %46 = vector.shape_cast %45 : vector<1x16x16xbf16> to vector<16x16xbf16>
    %cst_44 = arith.constant dense<0.000000e+00> : vector<48x16xf32>
    %47 = tpu.matmul %44, %46, %cst_44 {dimension_numbers = #tpu.dot_dimension_numbers<[1], [0], [0], [1], [0, 0, 1, 1], [], []>} : vector<48x16xbf16>, vector<16x16xbf16>, vector<48x16xf32> -> vector<48x16xf32>
    %48 = arith.addf %42, %47 : vector<48x16xf32>
    %c0_45 = arith.constant 0 : index
    %c14 = arith.constant 14 : index
    %c0_46 = arith.constant 0 : index
    %49 = vector.load %arg1[%c0_45, %c14, %c0_46] : memref<1x66x16xbf16, #tpu.memory_space<vmem>>, vector<1x48x16xbf16>
    %50 = vector.shape_cast %49 : vector<1x48x16xbf16> to vector<48x16xbf16>
    %c8_47 = arith.constant 8 : index
    %c0_48 = arith.constant 0 : index
    %c0_49 = arith.constant 0 : index
    %51 = vector.load %arg2[%c8_47, %c0_48, %c0_49] : memref<9x16x16xbf16, #tpu.memory_space<vmem>>, vector<1x16x16xbf16>
    %52 = vector.shape_cast %51 : vector<1x16x16xbf16> to vector<16x16xbf16>
    %cst_50 = arith.constant dense<0.000000e+00> : vector<48x16xf32>
    %53 = tpu.matmul %50, %52, %cst_50 {dimension_numbers = #tpu.dot_dimension_numbers<[1], [0], [0], [1], [0, 0, 1, 1], [], []>} : vector<48x16xbf16>, vector<16x16xbf16>, vector<48x16xf32> -> vector<48x16xf32>
    %54 = arith.addf %48, %53 : vector<48x16xf32>
    %c0_51 = arith.constant 0 : index
    %c0_52 = arith.constant 0 : index
    %55 = vector.load %arg3[%c0_51, %c0_52] : memref<1x16xf32, #tpu.memory_space<vmem>>, vector<1x16xf32>
    %56 = vector.broadcast %55 : vector<1x16xf32> to vector<48x16xf32>
    %57 = arith.mulf %54, %56 : vector<48x16xf32>
    %c0_53 = arith.constant 0 : index
    %c0_54 = arith.constant 0 : index
    %58 = vector.load %arg4[%c0_53, %c0_54] : memref<1x16xf32, #tpu.memory_space<vmem>>, vector<1x16xf32>
    %59 = vector.broadcast %58 : vector<1x16xf32> to vector<48x16xf32>
    %60 = arith.addf %57, %59 : vector<48x16xf32>
    %cst_55 = arith.constant 0.000000e+00 : f32
    %61 = vector.broadcast %cst_55 : f32 to vector<48x16xf32>
    %62 = arith.maximumf %60, %61 : vector<48x16xf32>
    %63 = arith.truncf %62 : vector<48x16xf32> to vector<48x16xbf16>
    %c0_56 = arith.constant 0 : index
    %c0_57 = arith.constant 0 : index
    %c0_58 = arith.constant 0 : index
    %64 = vector.load %arg5[%c0_56, %c0_57, %c0_58] : memref<1x48x16xbf16, #tpu.memory_space<vmem>>, vector<1x48x16xbf16>
    %65 = vector.shape_cast %64 : vector<1x48x16xbf16> to vector<48x16xbf16>
    %66 = vector.shape_cast %63 : vector<48x16xbf16> to vector<1x48x16xbf16>
    tpu.vector_store %arg5[%c0_56, %c0_57, %c0_58], %66 {strides = array<i32>} : memref<1x48x16xbf16, #tpu.memory_space<vmem>>, vector<1x48x16xbf16>,
    return
  }
  func.func @transform_0(%arg0: i32) -> (i32, i32, i32) {
    %c0_i32 = arith.constant 0 : i32
    %c0_i32_0 = arith.constant 0 : i32
    %c0_i32_1 = arith.constant 0 : i32
    return %arg0, %c0_i32, %c0_i32_0 : i32, i32, i32
  }
  func.func @transform_1(%arg0: i32) -> (i32, i32, i32) {
    %c0_i32 = arith.constant 0 : i32
    %c0_i32_0 = arith.constant 0 : i32
    %c0_i32_1 = arith.constant 0 : i32
    %c0_i32_2 = arith.constant 0 : i32
    return %c0_i32, %c0_i32_0, %c0_i32_1 : i32, i32, i32
  }
  func.func @transform_2(%arg0: i32) -> (i32, i32) {
    %c0_i32 = arith.constant 0 : i32
    %c0_i32_0 = arith.constant 0 : i32
    %c0_i32_1 = arith.constant 0 : i32
    return %c0_i32, %c0_i32_0 : i32, i32
  }
  func.func @transform_3(%arg0: i32) -> (i32, i32) {
    %c0_i32 = arith.constant 0 : i32
    %c0_i32_0 = arith.constant 0 : i32
    %c0_i32_1 = arith.constant 0 : i32
    return %c0_i32, %c0_i32_0 : i32, i32
  }
  func.func @transform_4(%arg0: i32) -> (i32, i32, i32) {
    %c0_i32 = arith.constant 0 : i32
    %c0_i32_0 = arith.constant 0 : i32
    %c0_i32_1 = arith.constant 0 : i32
    return %arg0, %c0_i32, %c0_i32_0 : i32, i32, i32
  }
}

module attributes {stable_mosaic.version = 11 : i64} {
  func.func @_matmul_kernel(%arg0: i32, %arg1: i32, %arg2: i32, %arg3: memref<64x16xbf16, #tpu.memory_space<vmem>>, %arg4: memref<16x64xbf16, #tpu.memory_space<vmem>>, %arg5: memref<1x64xf32, #tpu.memory_space<vmem>>, %arg6: memref<1x64xf32, #tpu.memory_space<vmem>>, %arg7: memref<64x64xbf16, #tpu.memory_space<vmem>>, %arg8: memref<64x64xf32, #tpu.memory_space<vmem>>) attributes {dimension_semantics = [#tpu.dimension_semantics<parallel>, #tpu.dimension_semantics<parallel>, #tpu.dimension_semantics<arbitrary>], iteration_bounds = array<i64: 1, 1, 1>, scalar_prefetch = 0 : i64, scratch_operands = 1 : i64, tpu.core_type = #tpu.core_type<tc>, window_params = [{transform_indices = @transform_0, window_bounds = array<i64: 64, 16>}, {transform_indices = @transform_1, window_bounds = array<i64: 16, 64>}, {transform_indices = @transform_2, window_bounds = array<i64: 1, 64>}, {transform_indices = @transform_3, window_bounds = array<i64: 1, 64>}, {transform_indices = @transform_4, window_bounds = array<i64: 64, 64>}]} {
    %c0_i32 = arith.constant 0 : i32
    %0 = arith.cmpi eq, %arg2, %c0_i32 : i32
    %1 = arith.extui %0 : i1 to i32
    %c0_i32_0 = arith.constant 0 : i32
    %2 = arith.cmpi ne, %1, %c0_i32_0 : i32
    scf.if %2 {
      %cst_10 = arith.constant 0.000000e+00 : f32
      %12 = vector.broadcast %cst_10 : f32 to vector<64x64xf32>
      %c0_11 = arith.constant 0 : index
      %c0_12 = arith.constant 0 : index
      %13 = vector.load %arg8[%c0_11, %c0_12] : memref<64x64xf32, #tpu.memory_space<vmem>>, vector<64x64xf32>
      tpu.vector_store %arg8[%c0_11, %c0_12], %12 {strides = array<i32>} : memref<64x64xf32, #tpu.memory_space<vmem>>, vector<64x64xf32>,
    } else {
    }
    %c0 = arith.constant 0 : index
    %c0_1 = arith.constant 0 : index
    %3 = vector.load %arg8[%c0, %c0_1] : memref<64x64xf32, #tpu.memory_space<vmem>>, vector<64x64xf32>
    %c0_2 = arith.constant 0 : index
    %c0_3 = arith.constant 0 : index
    %4 = vector.load %arg3[%c0_2, %c0_3] : memref<64x16xbf16, #tpu.memory_space<vmem>>, vector<64x16xbf16>
    %c0_4 = arith.constant 0 : index
    %c0_5 = arith.constant 0 : index
    %5 = vector.load %arg4[%c0_4, %c0_5] : memref<16x64xbf16, #tpu.memory_space<vmem>>, vector<16x64xbf16>
    %cst = arith.constant dense<0.000000e+00> : vector<64x64xf32>
    %6 = tpu.matmul %4, %5, %cst {dimension_numbers = #tpu.dot_dimension_numbers<[1], [0], [0], [1], [0, 0, 1, 1], [], []>} : vector<64x16xbf16>, vector<16x64xbf16>, vector<64x64xf32> -> vector<64x64xf32>
    %7 = arith.addf %3, %6 : vector<64x64xf32>
    %c0_6 = arith.constant 0 : index
    %c0_7 = arith.constant 0 : index
    %8 = vector.load %arg8[%c0_6, %c0_7] : memref<64x64xf32, #tpu.memory_space<vmem>>, vector<64x64xf32>
    tpu.vector_store %arg8[%c0_6, %c0_7], %7 {strides = array<i32>} : memref<64x64xf32, #tpu.memory_space<vmem>>, vector<64x64xf32>,
    %c0_i32_8 = arith.constant 0 : i32
    %9 = arith.cmpi eq, %arg2, %c0_i32_8 : i32
    %10 = arith.extui %9 : i1 to i32
    %c0_i32_9 = arith.constant 0 : i32
    %11 = arith.cmpi ne, %10, %c0_i32_9 : i32
    scf.if %11 {
      %c0_10 = arith.constant 0 : index
      %c0_11 = arith.constant 0 : index
      %12 = vector.load %arg8[%c0_10, %c0_11] : memref<64x64xf32, #tpu.memory_space<vmem>>, vector<64x64xf32>
      %c0_12 = arith.constant 0 : index
      %c0_13 = arith.constant 0 : index
      %13 = vector.load %arg5[%c0_12, %c0_13] : memref<1x64xf32, #tpu.memory_space<vmem>>, vector<1x64xf32>
      %14 = vector.broadcast %13 : vector<1x64xf32> to vector<64x64xf32>
      %15 = arith.mulf %12, %14 : vector<64x64xf32>
      %c0_14 = arith.constant 0 : index
      %c0_15 = arith.constant 0 : index
      %16 = vector.load %arg6[%c0_14, %c0_15] : memref<1x64xf32, #tpu.memory_space<vmem>>, vector<1x64xf32>
      %17 = vector.broadcast %16 : vector<1x64xf32> to vector<64x64xf32>
      %18 = arith.addf %15, %17 : vector<64x64xf32>
      %19 = arith.truncf %18 : vector<64x64xf32> to vector<64x64xbf16>
      %c0_16 = arith.constant 0 : index
      %c0_17 = arith.constant 0 : index
      %20 = vector.load %arg7[%c0_16, %c0_17] : memref<64x64xbf16, #tpu.memory_space<vmem>>, vector<64x64xbf16>
      tpu.vector_store %arg7[%c0_16, %c0_17], %19 {strides = array<i32>} : memref<64x64xbf16, #tpu.memory_space<vmem>>, vector<64x64xbf16>,
    } else {
    }
    return
  }
  func.func @transform_0(%arg0: i32, %arg1: i32, %arg2: i32) -> (i32, i32) {
    %c0_i32 = arith.constant 0 : i32
    return %arg0, %arg2 : i32, i32
  }
  func.func @transform_1(%arg0: i32, %arg1: i32, %arg2: i32) -> (i32, i32) {
    %c0_i32 = arith.constant 0 : i32
    return %arg2, %arg1 : i32, i32
  }
  func.func @transform_2(%arg0: i32, %arg1: i32, %arg2: i32) -> (i32, i32) {
    %c0_i32 = arith.constant 0 : i32
    %c0_i32_0 = arith.constant 0 : i32
    return %c0_i32, %arg1 : i32, i32
  }
  func.func @transform_3(%arg0: i32, %arg1: i32, %arg2: i32) -> (i32, i32) {
    %c0_i32 = arith.constant 0 : i32
    %c0_i32_0 = arith.constant 0 : i32
    return %c0_i32, %arg1 : i32, i32
  }
  func.func @transform_4(%arg0: i32, %arg1: i32, %arg2: i32) -> (i32, i32) {
    %c0_i32 = arith.constant 0 : i32
    return %arg0, %arg1 : i32, i32
  }
}

module attributes {stable_mosaic.version = 11 : i64} {
  func.func @_matmul_res_kernel(%arg0: i32, %arg1: i32, %arg2: i32, %arg3: memref<64x16xbf16, #tpu.memory_space<vmem>>, %arg4: memref<16x64xbf16, #tpu.memory_space<vmem>>, %arg5: memref<1x64xf32, #tpu.memory_space<vmem>>, %arg6: memref<1x64xf32, #tpu.memory_space<vmem>>, %arg7: memref<64x64xbf16, #tpu.memory_space<vmem>>, %arg8: memref<64x64xbf16, #tpu.memory_space<vmem>>, %arg9: memref<64x64xf32, #tpu.memory_space<vmem>>) attributes {dimension_semantics = [#tpu.dimension_semantics<parallel>, #tpu.dimension_semantics<parallel>, #tpu.dimension_semantics<arbitrary>], iteration_bounds = array<i64: 1, 1, 1>, scalar_prefetch = 0 : i64, scratch_operands = 1 : i64, tpu.core_type = #tpu.core_type<tc>, window_params = [{transform_indices = @transform_0, window_bounds = array<i64: 64, 16>}, {transform_indices = @transform_1, window_bounds = array<i64: 16, 64>}, {transform_indices = @transform_2, window_bounds = array<i64: 1, 64>}, {transform_indices = @transform_3, window_bounds = array<i64: 1, 64>}, {transform_indices = @transform_4, window_bounds = array<i64: 64, 64>}, {transform_indices = @transform_5, window_bounds = array<i64: 64, 64>}]} {
    %c0_i32 = arith.constant 0 : i32
    %0 = arith.cmpi eq, %arg2, %c0_i32 : i32
    %1 = arith.extui %0 : i1 to i32
    %c0_i32_0 = arith.constant 0 : i32
    %2 = arith.cmpi ne, %1, %c0_i32_0 : i32
    scf.if %2 {
      %cst_10 = arith.constant 0.000000e+00 : f32
      %12 = vector.broadcast %cst_10 : f32 to vector<64x64xf32>
      %c0_11 = arith.constant 0 : index
      %c0_12 = arith.constant 0 : index
      %13 = vector.load %arg9[%c0_11, %c0_12] : memref<64x64xf32, #tpu.memory_space<vmem>>, vector<64x64xf32>
      tpu.vector_store %arg9[%c0_11, %c0_12], %12 {strides = array<i32>} : memref<64x64xf32, #tpu.memory_space<vmem>>, vector<64x64xf32>,
    } else {
    }
    %c0 = arith.constant 0 : index
    %c0_1 = arith.constant 0 : index
    %3 = vector.load %arg9[%c0, %c0_1] : memref<64x64xf32, #tpu.memory_space<vmem>>, vector<64x64xf32>
    %c0_2 = arith.constant 0 : index
    %c0_3 = arith.constant 0 : index
    %4 = vector.load %arg3[%c0_2, %c0_3] : memref<64x16xbf16, #tpu.memory_space<vmem>>, vector<64x16xbf16>
    %c0_4 = arith.constant 0 : index
    %c0_5 = arith.constant 0 : index
    %5 = vector.load %arg4[%c0_4, %c0_5] : memref<16x64xbf16, #tpu.memory_space<vmem>>, vector<16x64xbf16>
    %cst = arith.constant dense<0.000000e+00> : vector<64x64xf32>
    %6 = tpu.matmul %4, %5, %cst {dimension_numbers = #tpu.dot_dimension_numbers<[1], [0], [0], [1], [0, 0, 1, 1], [], []>} : vector<64x16xbf16>, vector<16x64xbf16>, vector<64x64xf32> -> vector<64x64xf32>
    %7 = arith.addf %3, %6 : vector<64x64xf32>
    %c0_6 = arith.constant 0 : index
    %c0_7 = arith.constant 0 : index
    %8 = vector.load %arg9[%c0_6, %c0_7] : memref<64x64xf32, #tpu.memory_space<vmem>>, vector<64x64xf32>
    tpu.vector_store %arg9[%c0_6, %c0_7], %7 {strides = array<i32>} : memref<64x64xf32, #tpu.memory_space<vmem>>, vector<64x64xf32>,
    %c0_i32_8 = arith.constant 0 : i32
    %9 = arith.cmpi eq, %arg2, %c0_i32_8 : i32
    %10 = arith.extui %9 : i1 to i32
    %c0_i32_9 = arith.constant 0 : i32
    %11 = arith.cmpi ne, %10, %c0_i32_9 : i32
    scf.if %11 {
      %c0_10 = arith.constant 0 : index
      %c0_11 = arith.constant 0 : index
      %12 = vector.load %arg9[%c0_10, %c0_11] : memref<64x64xf32, #tpu.memory_space<vmem>>, vector<64x64xf32>
      %c0_12 = arith.constant 0 : index
      %c0_13 = arith.constant 0 : index
      %13 = vector.load %arg5[%c0_12, %c0_13] : memref<1x64xf32, #tpu.memory_space<vmem>>, vector<1x64xf32>
      %14 = vector.broadcast %13 : vector<1x64xf32> to vector<64x64xf32>
      %15 = arith.mulf %12, %14 : vector<64x64xf32>
      %c0_14 = arith.constant 0 : index
      %c0_15 = arith.constant 0 : index
      %16 = vector.load %arg6[%c0_14, %c0_15] : memref<1x64xf32, #tpu.memory_space<vmem>>, vector<1x64xf32>
      %17 = vector.broadcast %16 : vector<1x64xf32> to vector<64x64xf32>
      %18 = arith.addf %15, %17 : vector<64x64xf32>
      %c0_16 = arith.constant 0 : index
      %c0_17 = arith.constant 0 : index
      %19 = vector.load %arg7[%c0_16, %c0_17] : memref<64x64xbf16, #tpu.memory_space<vmem>>, vector<64x64xbf16>
      %20 = arith.extf %19 : vector<64x64xbf16> to vector<64x64xf32>
      %21 = arith.addf %18, %20 : vector<64x64xf32>
      %cst_18 = arith.constant 0.000000e+00 : f32
      %22 = vector.broadcast %cst_18 : f32 to vector<64x64xf32>
      %23 = arith.maximumf %21, %22 : vector<64x64xf32>
      %24 = arith.truncf %23 : vector<64x64xf32> to vector<64x64xbf16>
      %c0_19 = arith.constant 0 : index
      %c0_20 = arith.constant 0 : index
      %25 = vector.load %arg8[%c0_19, %c0_20] : memref<64x64xbf16, #tpu.memory_space<vmem>>, vector<64x64xbf16>
      tpu.vector_store %arg8[%c0_19, %c0_20], %24 {strides = array<i32>} : memref<64x64xbf16, #tpu.memory_space<vmem>>, vector<64x64xbf16>,
    } else {
    }
    return
  }
  func.func @transform_0(%arg0: i32, %arg1: i32, %arg2: i32) -> (i32, i32) {
    %c0_i32 = arith.constant 0 : i32
    return %arg0, %arg2 : i32, i32
  }
  func.func @transform_1(%arg0: i32, %arg1: i32, %arg2: i32) -> (i32, i32) {
    %c0_i32 = arith.constant 0 : i32
    return %arg2, %arg1 : i32, i32
  }
  func.func @transform_2(%arg0: i32, %arg1: i32, %arg2: i32) -> (i32, i32) {
    %c0_i32 = arith.constant 0 : i32
    %c0_i32_0 = arith.constant 0 : i32
    return %c0_i32, %arg1 : i32, i32
  }
  func.func @transform_3(%arg0: i32, %arg1: i32, %arg2: i32) -> (i32, i32) {
    %c0_i32 = arith.constant 0 : i32
    %c0_i32_0 = arith.constant 0 : i32
    return %c0_i32, %arg1 : i32, i32
  }
  func.func @transform_4(%arg0: i32, %arg1: i32, %arg2: i32) -> (i32, i32) {
    %c0_i32 = arith.constant 0 : i32
    return %arg0, %arg1 : i32, i32
  }
  func.func @transform_5(%arg0: i32, %arg1: i32, %arg2: i32) -> (i32, i32) {
    %c0_i32 = arith.constant 0 : i32
    return %arg0, %arg1 : i32, i32
  }
}

module attributes {stable_mosaic.version = 11 : i64} {
  func.func @_rpp_head_kernel(%arg0: i32, %arg1: memref<1x32x64xbf16, #tpu.memory_space<vmem>>, %arg2: memref<64x16xbf16, #tpu.memory_space<vmem>>, %arg3: memref<6x16xbf16, #tpu.memory_space<vmem>>, %arg4: memref<6x1xf32, #tpu.memory_space<vmem>>, %arg5: memref<1x6x32xf32, #tpu.memory_space<vmem>>, %arg6: memref<1x6x64xf32, #tpu.memory_space<vmem>>, %arg7: memref<1x6x64xf32, #tpu.memory_space<vmem>>) attributes {dimension_semantics = [#tpu.dimension_semantics<parallel>], iteration_bounds = array<i64: 2>, scalar_prefetch = 0 : i64, scratch_operands = 0 : i64, tpu.core_type = #tpu.core_type<tc>, window_params = [{transform_indices = @transform_0, window_bounds = array<i64: 1, 32, 64>}, {pipeline_mode = #tpu.pipeline_mode<synchronous>, transform_indices = @transform_1, window_bounds = array<i64: 64, 16>}, {pipeline_mode = #tpu.pipeline_mode<synchronous>, transform_indices = @transform_2, window_bounds = array<i64: 6, 16>}, {pipeline_mode = #tpu.pipeline_mode<synchronous>, transform_indices = @transform_3, window_bounds = array<i64: 6, 1>}, {transform_indices = @transform_4, window_bounds = array<i64: 1, 6, 32>}, {transform_indices = @transform_5, window_bounds = array<i64: 1, 6, 64>}, {transform_indices = @transform_6, window_bounds = array<i64: 1, 6, 64>}]} {
    %c0 = arith.constant 0 : index
    %c0_0 = arith.constant 0 : index
    %c0_1 = arith.constant 0 : index
    %0 = vector.load %arg1[%c0, %c0_0, %c0_1] : memref<1x32x64xbf16, #tpu.memory_space<vmem>>, vector<1x32x64xbf16>
    %1 = vector.shape_cast %0 : vector<1x32x64xbf16> to vector<32x64xbf16>
    %c0_2 = arith.constant 0 : index
    %c0_3 = arith.constant 0 : index
    %2 = vector.load %arg2[%c0_2, %c0_3] : memref<64x16xbf16, #tpu.memory_space<vmem>>, vector<64x16xbf16>
    %cst = arith.constant dense<0.000000e+00> : vector<32x16xf32>
    %3 = tpu.matmul %1, %2, %cst {dimension_numbers = #tpu.dot_dimension_numbers<[1], [0], [0], [1], [0, 0, 1, 1], [], []>} : vector<32x64xbf16>, vector<64x16xbf16>, vector<32x16xf32> -> vector<32x16xf32>
    %cst_4 = arith.constant dense<0.000000e+00> : vector<16xf32>
    %4 = vector.multi_reduction <add>, %3, %cst_4 [0] : vector<32x16xf32> to vector<16xf32>
    %5 = vector.shape_cast %4 : vector<16xf32> to vector<1x16xf32>
    %cst_5 = arith.constant 3.200000e+01 : f32
    %6 = vector.broadcast %cst_5 : f32 to vector<1x16xf32>
    %7 = arith.divf %5, %6 : vector<1x16xf32>
    %8 = vector.broadcast %7 : vector<1x16xf32> to vector<32x16xf32>
    %9 = arith.subf %3, %8 : vector<32x16xf32>
    %c0_6 = arith.constant 0 : index
    %c0_7 = arith.constant 0 : index
    %10 = vector.load %arg3[%c0_6, %c0_7] : memref<6x16xbf16, #tpu.memory_space<vmem>>, vector<6x16xbf16>
    %11 = arith.truncf %9 : vector<32x16xf32> to vector<32x16xbf16>
    %cst_8 = arith.constant dense<0.000000e+00> : vector<6x32xf32>
    %12 = tpu.matmul %10, %11, %cst_8 {dimension_numbers = #tpu.dot_dimension_numbers<[1], [1], [0], [0], [0, 0, 1, 0], [], []>} : vector<6x16xbf16>, vector<32x16xbf16>, vector<6x32xf32> -> vector<6x32xf32>
    %c0_9 = arith.constant 0 : index
    %c0_10 = arith.constant 0 : index
    %13 = vector.load %arg4[%c0_9, %c0_10] : memref<6x1xf32, #tpu.memory_space<vmem>>, vector<6x1xf32>
    %14 = vector.broadcast %13 : vector<6x1xf32> to vector<6x32xf32>
    %15 = arith.addf %12, %14 : vector<6x32xf32>
    %cst_11 = arith.constant 1.000000e+00 : f32
    %16 = vector.broadcast %cst_11 : f32 to vector<6x32xf32>
    %17 = arith.mulf %16, %15 : vector<6x32xf32>
    %cst_12 = arith.constant dense<0xFF800000> : vector<32xf32>
    %18 = vector.multi_reduction <maximumf>, %17, %cst_12 [0] : vector<6x32xf32> to vector<32xf32>
    %19 = vector.shape_cast %18 : vector<32xf32> to vector<1x32xf32>
    %20 = vector.broadcast %19 : vector<1x32xf32> to vector<6x32xf32>
    %21 = arith.subf %17, %20 : vector<6x32xf32>
    %22 = math.exp %21 : vector<6x32xf32>
    %cst_13 = arith.constant dense<0.000000e+00> : vector<32xf32>
    %23 = vector.multi_reduction <add>, %22, %cst_13 [0] : vector<6x32xf32> to vector<32xf32>
    %24 = vector.shape_cast %23 : vector<32xf32> to vector<1x32xf32>
    %25 = tpu.reciprocal %24 {approx = true} : vector<1x32xf32> -> vector<1x32xf32>
    %26 = vector.broadcast %25 : vector<1x32xf32> to vector<6x32xf32>
    %27 = arith.mulf %22, %26 : vector<6x32xf32>
    %c0_14 = arith.constant 0 : index
    %c0_15 = arith.constant 0 : index
    %c0_16 = arith.constant 0 : index
    %28 = vector.load %arg5[%c0_14, %c0_15, %c0_16] : memref<1x6x32xf32, #tpu.memory_space<vmem>>, vector<1x6x32xf32>
    %29 = vector.shape_cast %28 : vector<1x6x32xf32> to vector<6x32xf32>
    %30 = vector.shape_cast %27 : vector<6x32xf32> to vector<1x6x32xf32>
    tpu.vector_store %arg5[%c0_14, %c0_15, %c0_16], %30 {strides = array<i32>} : memref<1x6x32xf32, #tpu.memory_space<vmem>>, vector<1x6x32xf32>,
    %31 = arith.truncf %27 : vector<6x32xf32> to vector<6x32xbf16>
    %cst_17 = arith.constant dense<0.000000e+00> : vector<6x64xf32>
    %32 = tpu.matmul %31, %1, %cst_17 {dimension_numbers = #tpu.dot_dimension_numbers<[1], [0], [0], [1], [0, 0, 1, 1], [], []>} : vector<6x32xbf16>, vector<32x64xbf16>, vector<6x64xf32> -> vector<6x64xf32>
    %cst_18 = arith.constant 1.875000e-01 : f32
    %33 = vector.broadcast %cst_18 : f32 to vector<6x64xf32>
    %34 = arith.mulf %33, %32 : vector<6x64xf32>
    %c0_19 = arith.constant 0 : index
    %c0_20 = arith.constant 0 : index
    %c0_21 = arith.constant 0 : index
    %35 = vector.load %arg6[%c0_19, %c0_20, %c0_21] : memref<1x6x64xf32, #tpu.memory_space<vmem>>, vector<1x6x64xf32>
    %36 = vector.shape_cast %35 : vector<1x6x64xf32> to vector<6x64xf32>
    %37 = vector.shape_cast %34 : vector<6x64xf32> to vector<1x6x64xf32>
    tpu.vector_store %arg6[%c0_19, %c0_20, %c0_21], %37 {strides = array<i32>} : memref<1x6x64xf32, #tpu.memory_space<vmem>>, vector<1x6x64xf32>,
    %38 = arith.mulf %34, %34 : vector<6x64xf32>
    %cst_22 = arith.constant dense<0.000000e+00> : vector<6xf32>
    %39 = vector.multi_reduction <add>, %38, %cst_22 [1] : vector<6x64xf32> to vector<6xf32>
    %40 = vector.shape_cast %39 : vector<6xf32> to vector<6x1xf32>
    %cst_23 = arith.constant 9.99999996E-13 : f32
    %41 = vector.broadcast %cst_23 : f32 to vector<6x1xf32>
    %42 = arith.addf %40, %41 : vector<6x1xf32>
    %43 = math.rsqrt %42 : vector<6x1xf32>
    %44 = vector.broadcast %43 : vector<6x1xf32> to vector<6x64xf32>
    %45 = arith.mulf %34, %44 : vector<6x64xf32>
    %c0_24 = arith.constant 0 : index
    %c0_25 = arith.constant 0 : index
    %c0_26 = arith.constant 0 : index
    %46 = vector.load %arg7[%c0_24, %c0_25, %c0_26] : memref<1x6x64xf32, #tpu.memory_space<vmem>>, vector<1x6x64xf32>
    %47 = vector.shape_cast %46 : vector<1x6x64xf32> to vector<6x64xf32>
    %48 = vector.shape_cast %45 : vector<6x64xf32> to vector<1x6x64xf32>
    tpu.vector_store %arg7[%c0_24, %c0_25, %c0_26], %48 {strides = array<i32>} : memref<1x6x64xf32, #tpu.memory_space<vmem>>, vector<1x6x64xf32>,
    return
  }
  func.func @transform_0(%arg0: i32) -> (i32, i32, i32) {
    %c0_i32 = arith.constant 0 : i32
    %c0_i32_0 = arith.constant 0 : i32
    %c0_i32_1 = arith.constant 0 : i32
    return %arg0, %c0_i32, %c0_i32_0 : i32, i32, i32
  }
  func.func @transform_1(%arg0: i32) -> (i32, i32) {
    %c0_i32 = arith.constant 0 : i32
    %c0_i32_0 = arith.constant 0 : i32
    %c0_i32_1 = arith.constant 0 : i32
    return %c0_i32, %c0_i32_0 : i32, i32
  }
  func.func @transform_2(%arg0: i32) -> (i32, i32) {
    %c0_i32 = arith.constant 0 : i32
    %c0_i32_0 = arith.constant 0 : i32
    %c0_i32_1 = arith.constant 0 : i32
    return %c0_i32, %c0_i32_0 : i32, i32
  }
  func.func @transform_3(%arg0: i32) -> (i32, i32) {
    %c0_i32 = arith.constant 0 : i32
    %c0_i32_0 = arith.constant 0 : i32
    %c0_i32_1 = arith.constant 0 : i32
    return %c0_i32, %c0_i32_0 : i32, i32
  }
  func.func @transform_4(%arg0: i32) -> (i32, i32, i32) {
    %c0_i32 = arith.constant 0 : i32
    %c0_i32_0 = arith.constant 0 : i32
    %c0_i32_1 = arith.constant 0 : i32
    return %arg0, %c0_i32, %c0_i32_0 : i32, i32, i32
  }
  func.func @transform_5(%arg0: i32) -> (i32, i32, i32) {
    %c0_i32 = arith.constant 0 : i32
    %c0_i32_0 = arith.constant 0 : i32
    %c0_i32_1 = arith.constant 0 : i32
    return %arg0, %c0_i32, %c0_i32_0 : i32, i32, i32
  }
  func.func @transform_6(%arg0: i32) -> (i32, i32, i32) {
    %c0_i32 = arith.constant 0 : i32
    %c0_i32_0 = arith.constant 0 : i32
    %c0_i32_1 = arith.constant 0 : i32
    return %arg0, %c0_i32, %c0_i32_0 : i32, i32, i32
  }
}

module attributes {stable_mosaic.version = 11 : i64} {
  func.func @_matmul_kernel(%arg0: i32, %arg1: i32, %arg2: i32, %arg3: memref<12x64xbf16, #tpu.memory_space<vmem>>, %arg4: memref<64x32xbf16, #tpu.memory_space<vmem>>, %arg5: memref<1x32xf32, #tpu.memory_space<vmem>>, %arg6: memref<1x32xf32, #tpu.memory_space<vmem>>, %arg7: memref<12x32xbf16, #tpu.memory_space<vmem>>, %arg8: memref<12x32xf32, #tpu.memory_space<vmem>>) attributes {dimension_semantics = [#tpu.dimension_semantics<parallel>, #tpu.dimension_semantics<parallel>, #tpu.dimension_semantics<arbitrary>], iteration_bounds = array<i64: 1, 1, 1>, scalar_prefetch = 0 : i64, scratch_operands = 1 : i64, tpu.core_type = #tpu.core_type<tc>, window_params = [{transform_indices = @transform_0, window_bounds = array<i64: 12, 64>}, {transform_indices = @transform_1, window_bounds = array<i64: 64, 32>}, {transform_indices = @transform_2, window_bounds = array<i64: 1, 32>}, {transform_indices = @transform_3, window_bounds = array<i64: 1, 32>}, {transform_indices = @transform_4, window_bounds = array<i64: 12, 32>}]} {
    %c0_i32 = arith.constant 0 : i32
    %0 = arith.cmpi eq, %arg2, %c0_i32 : i32
    %1 = arith.extui %0 : i1 to i32
    %c0_i32_0 = arith.constant 0 : i32
    %2 = arith.cmpi ne, %1, %c0_i32_0 : i32
    scf.if %2 {
      %cst_10 = arith.constant 0.000000e+00 : f32
      %12 = vector.broadcast %cst_10 : f32 to vector<12x32xf32>
      %c0_11 = arith.constant 0 : index
      %c0_12 = arith.constant 0 : index
      %13 = vector.load %arg8[%c0_11, %c0_12] : memref<12x32xf32, #tpu.memory_space<vmem>>, vector<12x32xf32>
      tpu.vector_store %arg8[%c0_11, %c0_12], %12 {strides = array<i32>} : memref<12x32xf32, #tpu.memory_space<vmem>>, vector<12x32xf32>,
    } else {
    }
    %c0 = arith.constant 0 : index
    %c0_1 = arith.constant 0 : index
    %3 = vector.load %arg8[%c0, %c0_1] : memref<12x32xf32, #tpu.memory_space<vmem>>, vector<12x32xf32>
    %c0_2 = arith.constant 0 : index
    %c0_3 = arith.constant 0 : index
    %4 = vector.load %arg3[%c0_2, %c0_3] : memref<12x64xbf16, #tpu.memory_space<vmem>>, vector<12x64xbf16>
    %c0_4 = arith.constant 0 : index
    %c0_5 = arith.constant 0 : index
    %5 = vector.load %arg4[%c0_4, %c0_5] : memref<64x32xbf16, #tpu.memory_space<vmem>>, vector<64x32xbf16>
    %cst = arith.constant dense<0.000000e+00> : vector<12x32xf32>
    %6 = tpu.matmul %4, %5, %cst {dimension_numbers = #tpu.dot_dimension_numbers<[1], [0], [0], [1], [0, 0, 1, 1], [], []>} : vector<12x64xbf16>, vector<64x32xbf16>, vector<12x32xf32> -> vector<12x32xf32>
    %7 = arith.addf %3, %6 : vector<12x32xf32>
    %c0_6 = arith.constant 0 : index
    %c0_7 = arith.constant 0 : index
    %8 = vector.load %arg8[%c0_6, %c0_7] : memref<12x32xf32, #tpu.memory_space<vmem>>, vector<12x32xf32>
    tpu.vector_store %arg8[%c0_6, %c0_7], %7 {strides = array<i32>} : memref<12x32xf32, #tpu.memory_space<vmem>>, vector<12x32xf32>,
    %c0_i32_8 = arith.constant 0 : i32
    %9 = arith.cmpi eq, %arg2, %c0_i32_8 : i32
    %10 = arith.extui %9 : i1 to i32
    %c0_i32_9 = arith.constant 0 : i32
    %11 = arith.cmpi ne, %10, %c0_i32_9 : i32
    scf.if %11 {
      %c0_10 = arith.constant 0 : index
      %c0_11 = arith.constant 0 : index
      %12 = vector.load %arg8[%c0_10, %c0_11] : memref<12x32xf32, #tpu.memory_space<vmem>>, vector<12x32xf32>
      %c0_12 = arith.constant 0 : index
      %c0_13 = arith.constant 0 : index
      %13 = vector.load %arg5[%c0_12, %c0_13] : memref<1x32xf32, #tpu.memory_space<vmem>>, vector<1x32xf32>
      %14 = vector.broadcast %13 : vector<1x32xf32> to vector<12x32xf32>
      %15 = arith.mulf %12, %14 : vector<12x32xf32>
      %c0_14 = arith.constant 0 : index
      %c0_15 = arith.constant 0 : index
      %16 = vector.load %arg6[%c0_14, %c0_15] : memref<1x32xf32, #tpu.memory_space<vmem>>, vector<1x32xf32>
      %17 = vector.broadcast %16 : vector<1x32xf32> to vector<12x32xf32>
      %18 = arith.addf %15, %17 : vector<12x32xf32>
      %cst_16 = arith.constant 0.000000e+00 : f32
      %19 = vector.broadcast %cst_16 : f32 to vector<12x32xf32>
      %20 = arith.maximumf %18, %19 : vector<12x32xf32>
      %21 = arith.truncf %20 : vector<12x32xf32> to vector<12x32xbf16>
      %c0_17 = arith.constant 0 : index
      %c0_18 = arith.constant 0 : index
      %22 = vector.load %arg7[%c0_17, %c0_18] : memref<12x32xbf16, #tpu.memory_space<vmem>>, vector<12x32xbf16>
      tpu.vector_store %arg7[%c0_17, %c0_18], %21 {strides = array<i32>} : memref<12x32xbf16, #tpu.memory_space<vmem>>, vector<12x32xbf16>,
    } else {
    }
    return
  }
  func.func @transform_0(%arg0: i32, %arg1: i32, %arg2: i32) -> (i32, i32) {
    %c0_i32 = arith.constant 0 : i32
    return %arg0, %arg2 : i32, i32
  }
  func.func @transform_1(%arg0: i32, %arg1: i32, %arg2: i32) -> (i32, i32) {
    %c0_i32 = arith.constant 0 : i32
    return %arg2, %arg1 : i32, i32
  }
  func.func @transform_2(%arg0: i32, %arg1: i32, %arg2: i32) -> (i32, i32) {
    %c0_i32 = arith.constant 0 : i32
    %c0_i32_0 = arith.constant 0 : i32
    return %c0_i32, %arg1 : i32, i32
  }
  func.func @transform_3(%arg0: i32, %arg1: i32, %arg2: i32) -> (i32, i32) {
    %c0_i32 = arith.constant 0 : i32
    %c0_i32_0 = arith.constant 0 : i32
    return %c0_i32, %arg1 : i32, i32
  }
  func.func @transform_4(%arg0: i32, %arg1: i32, %arg2: i32) -> (i32, i32) {
    %c0_i32 = arith.constant 0 : i32
    return %arg0, %arg1 : i32, i32
  }
}

module attributes {stable_mosaic.version = 11 : i64} {
  func.func @_classifier_kernel(%arg0: i32, %arg1: memref<1x2x32xbf16, #tpu.memory_space<vmem>>, %arg2: memref<1x32x10xbf16, #tpu.memory_space<vmem>>, %arg3: memref<1x1x10xf32, #tpu.memory_space<vmem>>, %arg4: memref<1x2x10xf32, #tpu.memory_space<vmem>>) attributes {dimension_semantics = [#tpu.dimension_semantics<parallel>], iteration_bounds = array<i64: 6>, scalar_prefetch = 0 : i64, scratch_operands = 0 : i64, tpu.core_type = #tpu.core_type<tc>, window_params = [{transform_indices = @transform_0, window_bounds = array<i64: 1, 2, 32>}, {transform_indices = @transform_1, window_bounds = array<i64: 1, 32, 10>}, {transform_indices = @transform_2, window_bounds = array<i64: 1, 1, 10>}, {transform_indices = @transform_3, window_bounds = array<i64: 1, 2, 10>}]} {
    %c0 = arith.constant 0 : index
    %c0_0 = arith.constant 0 : index
    %c0_1 = arith.constant 0 : index
    %0 = vector.load %arg1[%c0, %c0_0, %c0_1] : memref<1x2x32xbf16, #tpu.memory_space<vmem>>, vector<1x2x32xbf16>
    %1 = vector.shape_cast %0 : vector<1x2x32xbf16> to vector<2x32xbf16>
    %c0_2 = arith.constant 0 : index
    %c0_3 = arith.constant 0 : index
    %c0_4 = arith.constant 0 : index
    %2 = vector.load %arg2[%c0_2, %c0_3, %c0_4] : memref<1x32x10xbf16, #tpu.memory_space<vmem>>, vector<1x32x10xbf16>
    %3 = vector.shape_cast %2 : vector<1x32x10xbf16> to vector<32x10xbf16>
    %cst = arith.constant dense<0.000000e+00> : vector<2x10xf32>
    %4 = tpu.matmul %1, %3, %cst {dimension_numbers = #tpu.dot_dimension_numbers<[1], [0], [0], [1], [0, 0, 1, 1], [], []>} : vector<2x32xbf16>, vector<32x10xbf16>, vector<2x10xf32> -> vector<2x10xf32>
    %c0_5 = arith.constant 0 : index
    %c0_6 = arith.constant 0 : index
    %c0_7 = arith.constant 0 : index
    %5 = vector.load %arg3[%c0_5, %c0_6, %c0_7] : memref<1x1x10xf32, #tpu.memory_space<vmem>>, vector<1x1x10xf32>
    %6 = vector.shape_cast %5 : vector<1x1x10xf32> to vector<1x10xf32>
    %7 = vector.broadcast %6 : vector<1x10xf32> to vector<2x10xf32>
    %8 = arith.addf %4, %7 : vector<2x10xf32>
    %c0_8 = arith.constant 0 : index
    %c0_9 = arith.constant 0 : index
    %c0_10 = arith.constant 0 : index
    %9 = vector.load %arg4[%c0_8, %c0_9, %c0_10] : memref<1x2x10xf32, #tpu.memory_space<vmem>>, vector<1x2x10xf32>
    %10 = vector.shape_cast %9 : vector<1x2x10xf32> to vector<2x10xf32>
    %11 = vector.shape_cast %8 : vector<2x10xf32> to vector<1x2x10xf32>
    tpu.vector_store %arg4[%c0_8, %c0_9, %c0_10], %11 {strides = array<i32>} : memref<1x2x10xf32, #tpu.memory_space<vmem>>, vector<1x2x10xf32>,
    return
  }
  func.func @transform_0(%arg0: i32) -> (i32, i32, i32) {
    %c0_i32 = arith.constant 0 : i32
    %c0_i32_0 = arith.constant 0 : i32
    %c0_i32_1 = arith.constant 0 : i32
    return %arg0, %c0_i32, %c0_i32_0 : i32, i32, i32
  }
  func.func @transform_1(%arg0: i32) -> (i32, i32, i32) {
    %c0_i32 = arith.constant 0 : i32
    %c0_i32_0 = arith.constant 0 : i32
    %c0_i32_1 = arith.constant 0 : i32
    return %arg0, %c0_i32, %c0_i32_0 : i32, i32, i32
  }
  func.func @transform_2(%arg0: i32) -> (i32, i32, i32) {
    %c0_i32 = arith.constant 0 : i32
    %c0_i32_0 = arith.constant 0 : i32
    %c0_i32_1 = arith.constant 0 : i32
    return %arg0, %c0_i32, %c0_i32_0 : i32, i32, i32
  }
  func.func @transform_3(%arg0: i32) -> (i32, i32, i32) {
    %c0_i32 = arith.constant 0 : i32
    %c0_i32_0 = arith.constant 0 : i32
    %c0_i32_1 = arith.constant 0 : i32
    return %arg0, %c0_i32, %c0_i32_0 : i32, i32, i32
  }
}

</mosaic_0001>

<bundles_post_ra>
// kernel: resnet_rpp_forward.10
= control target key start
LH: loop header
LB: loop body
LE: loop exit
PB: predicated region body
PF: predicated region fallthrough
CT: control target
= control target key end

     0   :  { %vm22_vm0 = vcmask 130048   ;;  %v313_v1 = vmov 0.0   ;;  %vm250_vm1 = vcmask 125952   ;;  %s412_s1 = inlined_call_operand.vmem [shape: bf16[16,16], index: 1, kind: input, shape index: {}]   ;;  %s413_s0 = inlined_call_operand.vmem [shape: bf16[64,16], index: 0, kind: input, shape index: {}]   ;;  %s414_s2 = inlined_call_operand.vmem [shape: f32[1,16], index: 2, kind: input, shape index: {}]   ;;  %s415_s3 = inlined_call_operand.vmem [shape: f32[1,16], index: 3, kind: input, shape index: {}]   ;;  %s416_s4 = inlined_call_operand.vmem [shape: bf16[64,16], index: 4, kind: output, shape index: {}]  }
   0x1   :  { %v308_v0 = vld [vmem:[%s412_s1] sm:$0xff]   ;;  %25 = vst.msk [vmem:[#allocation2 + $0x10] sm:$0xff] %vm22_vm0, %v313_v1  ;;  %23 = vst.msk [vmem:[#allocation2] sm:$0xff] %vm22_vm0, %v313_v1  ;;  %v310_v3 = vld [vmem:[%s413_s0 + $0x10] sm:$0xff]  }
   0x2   :  { %24 = vst.msk [vmem:[#allocation2 + $0x8] sm:$0xff] %vm22_vm0, %v313_v1  ;;  %26 = vst.msk [vmem:[#allocation2 + $0x18] sm:$0xff] %vm22_vm0, %v313_v1  ;;  %v309_v2 = vld [vmem:[%s413_s0] sm:$0xff]   ;;  %295 = vmatprep.subr.bf16.mxu0 %v308_v0  ;;  %305 = vmatprep.subr.bf16.mxu1 %v308_v0  ;;  %v311_v4 = vld [vmem:[%s413_s0 + $0x8] sm:$0xff]  }
   0x3   :  { %27 = vst.msk [vmem:[#allocation2 + $0x20] sm:$0xff] %vm22_vm0, %v313_v1  ;;  %28 = vst.msk [vmem:[#allocation2 + $0x28] sm:$0xff] %vm22_vm0, %v313_v1  ;;  %296 = vmatpush3.bf16.msra.mxu0 %v308_v0  ;;  %306 = vmatpush3.bf16.msra.mxu1 %v308_v0  ;;  %v312_v5 = vld [vmem:[%s413_s0 + $0x18] sm:$0xff]   ;;  %v272_v30 = vld [vmem:[%s414_s2] ss:$0 sm:$0xff] }
   0x4   :  { %29 = vst.msk [vmem:[#allocation2 + $0x30] sm:$0xff] %vm22_vm0, %v313_v1  ;;  %30 = vst.msk [vmem:[#allocation2 + $0x38] sm:$0xff] %vm22_vm0, %v313_v1  ;;  %297 = vmatprep.mubr.msk.bf16.mxu0 %vm22_vm0, %v309_v2  ;;  %301 = vmatprep.mubr.msk.bf16.mxu1 %vm22_vm0, %v310_v3  ;;  %v273_v32 = vld [vmem:[%s415_s3] ss:$0 sm:$0xff] }
   0x6   :  { %298 = vmatmul.mubr.msk.bf16.vlgmr.msra.gmra.mrb[0].mxu0 %vm22_vm0, %v311_v4  ;;  %302 = vmatmul.mubr.msk.bf16.vlgmr.msra.gmra.mrb[0].mxu1 %vm22_vm0, %v312_v5 }
   0x8   :  { %v33_v6 = vld [vmem:[#allocation2 + $0x10] sm:$0xff]  ;;  %v31_v8 = vld [vmem:[#allocation2] sm:$0xff] }
   0x9   :  { %v34_v12 = vld [vmem:[#allocation2 + $0x18] sm:$0xff]  ;;  %v32_v18 = vld [vmem:[#allocation2 + $0x8] sm:$0xff] }
   0xa   :  { %v35_v9 = vld [vmem:[#allocation2 + $0x20] sm:$0xff]  ;;  %v36_v19 = vld [vmem:[#allocation2 + $0x28] sm:$0xff] }
   0xb   :  { %v37_v7 = vld [vmem:[#allocation2 + $0x30] sm:$0xff]  ;;  %v38_v13 = vld [vmem:[#allocation2 + $0x38] sm:$0xff] }
  0xd9   :  { %v299_v10 = vpop.f32.mrb[0].mxu0  ;;  %v303_v11 = vpop.f32.mrb[0].mxu1 }
  0xda   :  { %v155_v14 = vadd.f32 %v299_v10, %v33_v6  ;;  %v159_v15 = vadd.f32 %v303_v11, %v37_v7  ;;  %v122_v16 = vpop.f32.mrb[1].mxu0  ;;  %v138_v17 = vpop.f32.mrb[1].mxu1 }
  0xdb   :  { %v153_v20 = vadd.f32 %v122_v16, %v31_v8  ;;  %v157_v21 = vadd.f32 %v138_v17, %v35_v9  ;;  %v300_v22 = vpop.f32.mrb[2].mxu0  ;;  %v304_v23 = vpop.f32.mrb[2].mxu1 }
  0xdc   :  { %163 = vst.msk [vmem:[#allocation2 + $0x10] sm:$0xff] %vm22_vm0, %v155_v14  ;;  %167 = vst.msk [vmem:[#allocation2 + $0x30] sm:$0xff] %vm22_vm0, %v159_v15  ;;  %v156_v24 = vadd.f32 %v300_v22, %v34_v12  ;;  %v160_v25 = vadd.f32 %v304_v23, %v38_v13  ;;  %v125_v26 = vpop.f32.mrb[3].mxu0  ;;  %v141_v27 = vpop.f32.mrb[3].mxu1 }
  0xdd   :  { %161 = vst.msk [vmem:[#allocation2] sm:$0xff] %vm22_vm0, %v153_v20  ;;  %165 = vst.msk [vmem:[#allocation2 + $0x20] sm:$0xff] %vm22_vm0, %v157_v21  ;;  %v154_v28 = vadd.f32 %v125_v26, %v32_v18  ;;  %v158_v29 = vadd.f32 %v141_v27, %v36_v19 }
  0xde   :  { %164 = vst.msk [vmem:[#allocation2 + $0x18] sm:$0xff] %vm22_vm0, %v156_v24  ;;  %168 = vst.msk [vmem:[#allocation2 + $0x38] sm:$0xff] %vm22_vm0, %v160_v25 }
  0xdf   :  { %162 = vst.msk [vmem:[#allocation2 + $0x8] sm:$0xff] %vm22_vm0, %v154_v28  ;;  %166 = vst.msk [vmem:[#allocation2 + $0x28] sm:$0xff] %vm22_vm0, %v158_v29 }
  0xe3   :  { %v174_v31 = vld [vmem:[#allocation2 + $0x10] sm:$0xff] }
  0xe4   :  { %v178_v33 = vld [vmem:[#allocation2 + $0x30] sm:$0xff]  ;;  %v189_v34 = vmul.f32 %v272_v30, %v174_v31  ;;  %v172_v36 = vld [vmem:[#allocation2] sm:$0xff] }
  0xe5   :  { %v193_v35 = vmul.f32 %v272_v30, %v178_v33  ;;  %v176_v37 = vld [vmem:[#allocation2 + $0x20] sm:$0xff]  ;;  %v187_v38 = vmul.f32 %v272_v30, %v172_v36  ;;  %v175_v40 = vld [vmem:[#allocation2 + $0x18] sm:$0xff] }
  0xe6   :  { %v191_v39 = vmul.f32 %v272_v30, %v176_v37  ;;  %v179_v41 = vld [vmem:[#allocation2 + $0x38] sm:$0xff]  ;;  %v204_v42 = vadd.f32 %v273_v32, %v189_v34  ;;  %v190_v44 = vmul.f32 %v272_v30, %v175_v40  ;;  %v173_v46 = vld [vmem:[#allocation2 + $0x8] sm:$0xff] }
  0xe7   :  { %v208_v43 = vadd.f32 %v273_v32, %v193_v35  ;;  %v194_v45 = vmul.f32 %v272_v30, %v179_v41  ;;  %v177_v47 = vld [vmem:[#allocation2 + $0x28] sm:$0xff]  ;;  %v202_v48 = vadd.f32 %v273_v32, %v187_v38  ;;  %v188_v50 = vmul.f32 %v272_v30, %v173_v46 }
  0xe8   :  { %v206_v49 = vadd.f32 %v273_v32, %v191_v39  ;;  %v192_v51 = vmul.f32 %v272_v30, %v177_v47  ;;  %v212_v52 = vmax.f32 %v204_v42, 0.0  ;;  %v205_v54 = vadd.f32 %v273_v32, %v190_v44 }
  0xe9   :  { %v216_v53 = vmax.f32 %v208_v43, 0.0  ;;  %v209_v55 = vadd.f32 %v273_v32, %v194_v45  ;;  %v210_v56 = vmax.f32 %v202_v48, 0.0  ;;  %v203_v58 = vadd.f32 %v273_v32, %v188_v50 }
  0xea   :  { %v214_v57 = vmax.f32 %v206_v49, 0.0  ;;  %v207_v59 = vadd.f32 %v273_v32, %v192_v51  ;;  %v284_v60 = vpack.c.bf16 %v212_v52, %v212_v52  ;;  %v213_v62 = vmax.f32 %v205_v54, 0.0 }
  0xeb   :  { %v288_v61 = vpack.c.bf16 %v216_v53, %v216_v53  ;;  %v217_v63 = vmax.f32 %v209_v55, 0.0  ;;  %v282_v0 = vpack.c.bf16 %v210_v56, %v210_v56  ;;  %v211_v2 = vmax.f32 %v203_v58, 0.0 }
  0xec   :  { %v286_v1 = vpack.c.bf16 %v214_v57, %v214_v57  ;;  %v215_v3 = vmax.f32 %v207_v59, 0.0  ;;  %253 = vst.msk [vmem:[%s416_s4 + $0x8] sm:$0xf] %vm250_vm1, %v284_v60  ;;  %v285_v4 = vpack.c.bf16 %v213_v62, %v213_v62 }
  0xed   :  { %257 = vst.msk [vmem:[%s416_s4 + $0x18] sm:$0xf] %vm250_vm1, %v288_v61  ;;  %v289_v5 = vpack.c.bf16 %v217_v63, %v217_v63  ;;  %251 = vst.msk [vmem:[%s416_s4] sm:$0xf] %vm250_vm1, %v282_v0  ;;  %v283_v6 = vpack.c.bf16 %v211_v2, %v211_v2 }
  0xee   :  { %255 = vst.msk [vmem:[%s416_s4 + $0x10] sm:$0xf] %vm250_vm1, %v286_v1  ;;  %v287_v7 = vpack.c.bf16 %v215_v3, %v215_v3  ;;  %254 = vst.msk [vmem:[%s416_s4 + $0xc] sm:$0xf] %vm250_vm1, %v285_v4 }
  0xef   :  { %258 = vst.msk [vmem:[%s416_s4 + $0x1c] sm:$0xf] %vm250_vm1, %v289_v5  ;;  %252 = vst.msk [vmem:[%s416_s4 + $0x4] sm:$0xf] %vm250_vm1, %v283_v6 }
  0xf0   :  { %256 = vst.msk [vmem:[%s416_s4 + $0x14] sm:$0xf] %vm250_vm1, %v287_v7 }

// kernel: resnet_rpp_forward.8
= control target key start
LH: loop header
LB: loop body
LE: loop exit
PB: predicated region body
PF: predicated region fallthrough
CT: control target
= control target key end

     0   :  { %vm263_vm0 = vcmask 1044480   ;;  %vm264_vm1 = vcmask 1045504   ;;  %vm214_vm2 = vcmask 220160   ;;  %v984_v1 = vmov 65535   ;;  %s1371_s1 = inlined_call_operand.vmem [shape: bf16[27,16], index: 1, kind: input, shape index: {}]   ;;  %s1372_s0 = inlined_call_operand.vmem [shape: bf16[256,27], index: 0, kind: input, shape index: {}]   ;;  %s1373_s2 = inlined_call_operand.vmem [shape: f32[1,16], index: 2, kind: input, shape index: {}]   ;;  %s1374_s3 = inlined_call_operand.vmem [shape: f32[1,16], index: 3, kind: input, shape index: {}]   ;;  %s1375_s4 = inlined_call_operand.vmem [shape: bf16[256,16], index: 4, kind: output, shape index: {}]  }
   0x1   :  { %v966_v0 = vld [vmem:[%s1371_s1] sm:$0xff]   ;;  %v265_v2 = vsel %vm263_vm0, 4294967295, %v984_v1  ;;  %v967_v3 = vld [vmem:[%s1371_s1 + $0x8] sm:$0x3f]   ;;  %vm22_vm3 = vcmask 130048   ;;  %v985_v10 = vmov 0.0  }
   0x2   :  { %924 = vmatprep.subr.bf16.mxu0 %v966_v0  ;;  %960 = vmatprep.subr.bf16.mxu1 %v966_v0  ;;  %v266_v4 = vsel %vm264_vm1, %v265_v2, 0  ;;  %v968_v5 = vld [vmem:[%s1372_s0] sm:$0xff]   ;;  %v970_v8 = vld [vmem:[%s1372_s0 + $0x8] sm:$0xff]   ;;  %25 = vst.msk [vmem:[#allocation2 + $0x10] sm:$0xff] %vm22_vm3, %v985_v10  ;;  %23 = vst.msk [vmem:[#allocation2] sm:$0xff] %vm22_vm3, %v985_v10  ;;  %vm769_vm4 = vcmask 125952  }
   0x3   :  { %925 = vmatpush3.bf16.msra.mxu0 %v966_v0  ;;  %962 = vmatpush3.bf16.msra.mxu1 %v966_v0  ;;  %v268_v6 = vand.u32 %v967_v3, %v266_v4  ;;  %v969_v7 = vld [vmem:[%s1372_s0 + $0x40] sm:$0xff]   ;;  %v971_v9 = vld [vmem:[%s1372_s0 + $0x48] sm:$0xff]   ;;  %24 = vst.msk [vmem:[#allocation2 + $0x8] sm:$0xff] %vm22_vm3, %v985_v10  ;;  %26 = vst.msk [vmem:[#allocation2 + $0x18] sm:$0xff] %vm22_vm3, %v985_v10 }
   0x4   :  { %928 = vmatprep.mubr.msk.bf16.mxu0 %vm214_vm2, %v968_v5  ;;  %27 = vst.msk [vmem:[#allocation2 + $0x20] sm:$0xff] %vm22_vm3, %v985_v10  ;;  %28 = vst.msk [vmem:[#allocation2 + $0x28] sm:$0xff] %vm22_vm3, %v985_v10  ;;  %944 = vmatprep.mubr.msk.bf16.mxu1 %vm214_vm2, %v969_v7  ;;  %v972_v11 = vld [vmem:[%s1372_s0 + $0x10] sm:$0xff]   ;;  %v974_v13 = vld [vmem:[%s1372_s0 + $0x18] sm:$0xff]  }
   0x5   :  { %926 = vmatprep.subr.bf16.mxu0 %v268_v6  ;;  %961 = vmatprep.subr.bf16.mxu1 %v268_v6  ;;  %29 = vst.msk [vmem:[#allocation2 + $0x30] sm:$0xff] %vm22_vm3, %v985_v10  ;;  %30 = vst.msk [vmem:[#allocation2 + $0x38] sm:$0xff] %vm22_vm3, %v985_v10  ;;  %v973_v12 = vld [vmem:[%s1372_s0 + $0x50] sm:$0xff]   ;;  %v975_v14 = vld [vmem:[%s1372_s0 + $0x58] sm:$0xff]  }
   0x6   :  { %31 = vst.msk [vmem:[#allocation2 + $0x40] sm:$0xff] %vm22_vm3, %v985_v10  ;;  %32 = vst.msk [vmem:[#allocation2 + $0x48] sm:$0xff] %vm22_vm3, %v985_v10  ;;  %v976_v15 = vld [vmem:[%s1372_s0 + $0x20] sm:$0xff]   ;;  %v978_v17 = vld [vmem:[%s1372_s0 + $0x28] sm:$0xff]  }
   0x7   :  { %33 = vst.msk [vmem:[#allocation2 + $0x50] sm:$0xff] %vm22_vm3, %v985_v10  ;;  %34 = vst.msk [vmem:[#allocation2 + $0x58] sm:$0xff] %vm22_vm3, %v985_v10  ;;  %927 = vmatpush3.bf16.msra.mxu0 %v268_v6  ;;  %963 = vmatpush3.bf16.msra.mxu1 %v268_v6  ;;  %v977_v16 = vld [vmem:[%s1372_s0 + $0x60] sm:$0xff]   ;;  %v979_v18 = vld [vmem:[%s1372_s0 + $0x68] sm:$0xff]  }
   0x8   :  { %35 = vst.msk [vmem:[#allocation2 + $0x60] sm:$0xff] %vm22_vm3, %v985_v10  ;;  %36 = vst.msk [vmem:[#allocation2 + $0x68] sm:$0xff] %vm22_vm3, %v985_v10  ;;  %v980_v19 = vld [vmem:[%s1372_s0 + $0x30] sm:$0xff]   ;;  %v982_v21 = vld [vmem:[%s1372_s0 + $0x38] sm:$0xff]  }
   0x9   :  { %37 = vst.msk [vmem:[#allocation2 + $0x70] sm:$0xff] %vm22_vm3, %v985_v10  ;;  %38 = vst.msk [vmem:[#allocation2 + $0x78] sm:$0xff] %vm22_vm3, %v985_v10  ;;  %v981_v20 = vld [vmem:[%s1372_s0 + $0x70] sm:$0xff]   ;;  %v983_v22 = vld [vmem:[%s1372_s0 + $0x78] sm:$0xff]  }
   0xa   :  { %39 = vst.msk [vmem:[#allocation2 + $0x80] sm:$0xff] %vm22_vm3, %v985_v10  ;;  %40 = vst.msk [vmem:[#allocation2 + $0x88] sm:$0xff] %vm22_vm3, %v985_v10  ;;  %929 = vmatmul.mubr.msk.bf16.vlgmr.msra.gmra.mrb[0].mxu0 %vm214_vm2, %v970_v8  ;;  %945 = vmatmul.mubr.msk.bf16.vlgmr.msra.gmra.mrb[0].mxu1 %vm214_vm2, %v971_v9  ;;  %v57_v23 = vld [vmem:[#allocation2 + $0x10] sm:$0xff]  ;;  %v55_v25 = vld [vmem:[#allocation2] sm:$0xff] }
   0xb   :  { %41 = vst.msk [vmem:[#allocation2 + $0x90] sm:$0xff] %vm22_vm3, %v985_v10  ;;  %42 = vst.msk [vmem:[#allocation2 + $0x98] sm:$0xff] %vm22_vm3, %v985_v10  ;;  %932 = vmatprep.mubr.msk.bf16.mxu0 %vm214_vm2, %v972_v11  ;;  %948 = vmatprep.mubr.msk.bf16.mxu1 %vm214_vm2, %v973_v12  ;;  %v58_v29 = vld [vmem:[#allocation2 + $0x18] sm:$0xff]  ;;  %v56_v35 = vld [vmem:[#allocation2 + $0x8] sm:$0xff] }
   0xc   :  { %43 = vst.msk [vmem:[#allocation2 + $0xa0] sm:$0xff] %vm22_vm3, %v985_v10  ;;  %44 = vst.msk [vmem:[#allocation2 + $0xa8] sm:$0xff] %vm22_vm3, %v985_v10  ;;  %v61_v47 = vld [vmem:[#allocation2 + $0x30] sm:$0xff]  ;;  %v59_v49 = vld [vmem:[#allocation2 + $0x20] sm:$0xff] }
   0xd   :  { %45 = vst.msk [vmem:[#allocation2 + $0xb0] sm:$0xff] %vm22_vm3, %v985_v10  ;;  %46 = vst.msk [vmem:[#allocation2 + $0xb8] sm:$0xff] %vm22_vm3, %v985_v10  ;;  %v1124_v51 = vld [vmem:[%s1373_s2] ss:$0 sm:$0xff]  ;;  %v62_v54 = vld [vmem:[#allocation2 + $0x38] sm:$0xff] }
   0xe   :  { %47 = vst.msk [vmem:[#allocation2 + $0xc0] sm:$0xff] %vm22_vm3, %v985_v10  ;;  %48 = vst.msk [vmem:[#allocation2 + $0xc8] sm:$0xff] %vm22_vm3, %v985_v10  ;;  %v1129_v56 = vld [vmem:[%s1374_s3] ss:$0 sm:$0xff]  ;;  %v60_v61 = vld [vmem:[#allocation2 + $0x28] sm:$0xff] }
   0xf   :  { %49 = vst.msk [vmem:[#allocation2 + $0xd0] sm:$0xff] %vm22_vm3, %v985_v10  ;;  %50 = vst.msk [vmem:[#allocation2 + $0xd8] sm:$0xff] %vm22_vm3, %v985_v10 }
  0x10   :  { %51 = vst.msk [vmem:[#allocation2 + $0xe0] sm:$0xff] %vm22_vm3, %v985_v10  ;;  %52 = vst.msk [vmem:[#allocation2 + $0xe8] sm:$0xff] %vm22_vm3, %v985_v10 }
  0x11   :  { %53 = vst.msk [vmem:[#allocation2 + $0xf0] sm:$0xff] %vm22_vm3, %v985_v10  ;;  %54 = vst.msk [vmem:[#allocation2 + $0xf8] sm:$0xff] %vm22_vm3, %v985_v10  ;;  %v71_v26 = vld [vmem:[#allocation2 + $0x80] sm:$0xff]  ;;  %v72_v36 = vld [vmem:[#allocation2 + $0x88] sm:$0xff] }
  0x12   :  { %933 = vmatmul.mubr.msk.bf16.gmra.mrb[4].mxu0 %vm214_vm2, %v974_v13  ;;  %949 = vmatmul.mubr.msk.bf16.gmra.mrb[4].mxu1 %vm214_vm2, %v975_v14  ;;  %v73_v24 = vld [vmem:[#allocation2 + $0x90] sm:$0xff]  ;;  %v74_v30 = vld [vmem:[#allocation2 + $0x98] sm:$0xff] }
  0x13   :  { %936 = vmatprep.mubr.msk.bf16.mxu0 %vm214_vm2, %v976_v15  ;;  %952 = vmatprep.mubr.msk.bf16.mxu1 %vm214_vm2, %v977_v16  ;;  %v75_v50 = vld [vmem:[#allocation2 + $0xa0] sm:$0xff]  ;;  %v76_v62 = vld [vmem:[#allocation2 + $0xa8] sm:$0xff] }
  0x14   :  { %v77_v48 = vld [vmem:[#allocation2 + $0xb0] sm:$0xff]  ;;  %v78_v55 = vld [vmem:[#allocation2 + $0xb8] sm:$0xff] }
  0x1a   :  { %937 = vmatmul.mubr.msk.bf16.gmra.mrb[8].mxu0 %vm214_vm2, %v978_v17  ;;  %953 = vmatmul.mubr.msk.bf16.gmra.mrb[8].mxu1 %vm214_vm2, %v979_v18 }
  0x1b   :  { %940 = vmatprep.mubr.msk.bf16.mxu0 %vm214_vm2, %v980_v19  ;;  %956 = vmatprep.mubr.msk.bf16.mxu1 %vm214_vm2, %v981_v20 }
  0x22   :  { %941 = vmatmul.mubr.msk.bf16.gmra.mrb[12].mxu0 %vm214_vm2, %v982_v21  ;;  %957 = vmatmul.mubr.msk.bf16.gmra.mrb[12].mxu1 %vm214_vm2, %v983_v22 }
  0xdd   :  { %v930_v27 = vpop.f32.mrb[0].mxu0  ;;  %v946_v28 = vpop.f32.mrb[0].mxu1 }
  0xde   :  { %v433_v31 = vadd.f32 %v930_v27, %v57_v23  ;;  %v449_v32 = vadd.f32 %v946_v28, %v73_v24  ;;  %v304_v33 = vpop.f32.mrb[1].mxu0  ;;  %v368_v34 = vpop.f32.mrb[1].mxu1 }
  0xdf   :  { %v431_v37 = vadd.f32 %v304_v33, %v55_v25  ;;  %v447_v38 = vadd.f32 %v368_v34, %v71_v26  ;;  %v931_v39 = vpop.f32.mrb[2].mxu0  ;;  %v947_v40 = vpop.f32.mrb[2].mxu1 }
  0xe0   :  { %466 = vst.msk [vmem:[#allocation2 + $0x10] sm:$0xff] %vm22_vm3, %v433_v31  ;;  %482 = vst.msk [vmem:[#allocation2 + $0x90] sm:$0xff] %vm22_vm3, %v449_v32  ;;  %v434_v41 = vadd.f32 %v931_v39, %v58_v29  ;;  %v450_v42 = vadd.f32 %v947_v40, %v74_v30  ;;  %v307_v43 = vpop.f32.mrb[3].mxu0  ;;  %v371_v44 = vpop.f32.mrb[3].mxu1 }
  0xe1   :  { %464 = vst.msk [vmem:[#allocation2] sm:$0xff] %vm22_vm3, %v431_v37  ;;  %480 = vst.msk [vmem:[#allocation2 + $0x80] sm:$0xff] %vm22_vm3, %v447_v38  ;;  %v432_v45 = vadd.f32 %v307_v43, %v56_v35  ;;  %v448_v46 = vadd.f32 %v371_v44, %v72_v36 }
  0xe2   :  { %467 = vst.msk [vmem:[#allocation2 + $0x18] sm:$0xff] %vm22_vm3, %v434_v41  ;;  %483 = vst.msk [vmem:[#allocation2 + $0x98] sm:$0xff] %vm22_vm3, %v450_v42 }
  0xe3   :  { %465 = vst.msk [vmem:[#allocation2 + $0x8] sm:$0xff] %vm22_vm3, %v432_v45  ;;  %481 = vst.msk [vmem:[#allocation2 + $0x88] sm:$0xff] %vm22_vm3, %v448_v46 }
  0xe5   :  { %v934_v52 = vpop.f32.mrb[4].mxu0  ;;  %v950_v53 = vpop.f32.mrb[4].mxu1 }
  0xe6   :  { %v437_v57 = vadd.f32 %v934_v52, %v61_v47  ;;  %v453_v58 = vadd.f32 %v950_v53, %v77_v48  ;;  %v320_v59 = vpop.f32.mrb[5].mxu0  ;;  %v384_v60 = vpop.f32.mrb[5].mxu1 }
  0xe7   :  { %v501_v63 = vld [vmem:[#allocation2 + $0x10] sm:$0xff]  ;;  %v435_v1 = vadd.f32 %v320_v59, %v59_v49  ;;  %v451_v2 = vadd.f32 %v384_v60, %v75_v50  ;;  %v935_v3 = vpop.f32.mrb[6].mxu0  ;;  %v951_v4 = vpop.f32.mrb[6].mxu1 }
  0xe8   :  { %v517_v0 = vld [vmem:[#allocation2 + $0x90] sm:$0xff]  ;;  %v540_v5 = vmul.f32 %v1124_v51, %v501_v63  ;;  %v499_v7 = vld [vmem:[#allocation2] sm:$0xff]  ;;  %470 = vst.msk [vmem:[#allocation2 + $0x30] sm:$0xff] %vm22_vm3, %v437_v57  ;;  %486 = vst.msk [vmem:[#allocation2 + $0xb0] sm:$0xff] %vm22_vm3, %v453_v58  ;;  %v438_v9 = vadd.f32 %v935_v3, %v62_v54  ;;  %v454_v10 = vadd.f32 %v951_v4, %v78_v55  ;;  %v323_v11 = vpop.f32.mrb[7].mxu0  ;;  %v387_v12 = vpop.f32.mrb[7].mxu1 }
  0xe9   :  { %v556_v6 = vmul.f32 %v1124_v51, %v517_v0  ;;  %v515_v8 = vld [vmem:[#allocation2 + $0x80] sm:$0xff]  ;;  %v538_v13 = vmul.f32 %v1124_v51, %v499_v7  ;;  %v502_v15 = vld [vmem:[#allocation2 + $0x18] sm:$0xff]  ;;  %468 = vst.msk [vmem:[#allocation2 + $0x20] sm:$0xff] %vm22_vm3, %v435_v1  ;;  %484 = vst.msk [vmem:[#allocation2 + $0xa0] sm:$0xff] %vm22_vm3, %v451_v2  ;;  %v436_v17 = vadd.f32 %v323_v11, %v60_v61 }
  0xea   :  { %v554_v14 = vmul.f32 %v1124_v51, %v515_v8  ;;  %v518_v16 = vld [vmem:[#allocation2 + $0x98] sm:$0xff]  ;;  %v452_v18 = vadd.f32 %v387_v12, %v76_v62  ;;  %v579_v19 = vadd.f32 %v1129_v56, %v540_v5  ;;  %v541_v21 = vmul.f32 %v1124_v51, %v502_v15  ;;  %v500_v23 = vld [vmem:[#allocation2 + $0x8] sm:$0xff]  ;;  %471 = vst.msk [vmem:[#allocation2 + $0x38] sm:$0xff] %vm22_vm3, %v438_v9  ;;  %v65_v15 = vld [vmem:[#allocation2 + $0x50] sm:$0xff] }
  0xeb   :  { %v595_v20 = vadd.f32 %v1129_v56, %v556_v6  ;;  %v557_v22 = vmul.f32 %v1124_v51, %v518_v16  ;;  %v516_v24 = vld [vmem:[#allocation2 + $0x88] sm:$0xff]  ;;  %487 = vst.msk [vmem:[#allocation2 + $0xb8] sm:$0xff] %vm22_vm3, %v454_v10  ;;  %v577_v25 = vadd.f32 %v1129_v56, %v538_v13  ;;  %v539_v27 = vmul.f32 %v1124_v51, %v500_v23 }
  0xec   :  { %v593_v26 = vadd.f32 %v1129_v56, %v554_v14  ;;  %v555_v28 = vmul.f32 %v1124_v51, %v516_v24  ;;  %469 = vst.msk [vmem:[#allocation2 + $0x28] sm:$0xff] %vm22_vm3, %v436_v17  ;;  %485 = vst.msk [vmem:[#allocation2 + $0xa8] sm:$0xff] %vm22_vm3, %v452_v18  ;;  %v611_v29 = vmax.f32 %v579_v19, 0.0  ;;  %v580_v31 = vadd.f32 %v1129_v56, %v541_v21  ;;  %v63_v21 = vld [vmem:[#allocation2 + $0x40] sm:$0xff] }
  0xed   :  { %v627_v30 = vmax.f32 %v595_v20, 0.0  ;;  %v596_v32 = vadd.f32 %v1129_v56, %v557_v22  ;;  %v609_v33 = vmax.f32 %v577_v25, 0.0  ;;  %v578_v35 = vadd.f32 %v1129_v56, %v539_v27  ;;  %v1155_v37 = vpop.f32.mrb[8].mxu0  ;;  %v1157_v38 = vpop.f32.mrb[8].mxu1  ;;  %v81_v20 = vld [vmem:[#allocation2 + $0xd0] sm:$0xff]  ;;  %v79_v22 = vld [vmem:[#allocation2 + $0xc0] sm:$0xff] }
  0xee   :  { %v625_v34 = vmax.f32 %v593_v26, 0.0  ;;  %v594_v36 = vadd.f32 %v1129_v56, %v555_v28  ;;  %v876_v39 = vpack.c.bf16 %v611_v29, %v611_v29  ;;  %v612_v41 = vmax.f32 %v580_v31, 0.0  ;;  %v1159_v43 = vpop.f32.mrb[9].mxu0  ;;  %v1161_v44 = vpop.f32.mrb[9].mxu1  ;;  %v66_v27 = vld [vmem:[#allocation2 + $0x58] sm:$0xff] }
  0xef   :  { %v892_v40 = vpack.c.bf16 %v627_v30, %v627_v30  ;;  %v628_v42 = vmax.f32 %v596_v32, 0.0  ;;  %v874_v45 = vpack.c.bf16 %v609_v33, %v609_v33  ;;  %v610_v47 = vmax.f32 %v578_v35, 0.0  ;;  %v505_v49 = vld [vmem:[#allocation2 + $0x30] sm:$0xff]  ;;  %v1163_v52 = vpop.f32.mrb[10].mxu0  ;;  %v1165_v53 = vpop.f32.mrb[10].mxu1  ;;  %v82_v28 = vld [vmem:[#allocation2 + $0xd8] sm:$0xff] }
  0xf0   :  { %v890_v46 = vpack.c.bf16 %v625_v34, %v625_v34  ;;  %v626_v48 = vmax.f32 %v594_v36, 0.0  ;;  %v521_v50 = vld [vmem:[#allocation2 + $0xb0] sm:$0xff]  ;;  %772 = vst.msk [vmem:[%s1375_s4 + $0x8] sm:$0xf] %vm769_vm4, %v876_v39  ;;  %v877_v54 = vpack.c.bf16 %v612_v41, %v612_v41  ;;  %v544_v57 = vmul.f32 %v1124_v51, %v505_v49  ;;  %v503_v59 = vld [vmem:[#allocation2 + $0x20] sm:$0xff]  ;;  %v1177_v61 = vpop.f32.mrb[11].mxu0 }
  0xf1   :  { %788 = vst.msk [vmem:[%s1375_s4 + $0x48] sm:$0xf] %vm769_vm4, %v892_v40  ;;  %v893_v55 = vpack.c.bf16 %v628_v42, %v628_v42  ;;  %v560_v58 = vmul.f32 %v1124_v51, %v521_v50  ;;  %v519_v60 = vld [vmem:[#allocation2 + $0xa0] sm:$0xff]  ;;  %v1179_v62 = vpop.f32.mrb[11].mxu1  ;;  %770 = vst.msk [vmem:[%s1375_s4] sm:$0xf] %vm769_vm4, %v874_v45  ;;  %v875_v63 = vpack.c.bf16 %v610_v47, %v610_v47 }
  0xf2   :  { %786 = vst.msk [vmem:[%s1375_s4 + $0x40] sm:$0xf] %vm769_vm4, %v890_v46  ;;  %v891_v0 = vpack.c.bf16 %v626_v48, %v626_v48  ;;  %v542_v1 = vmul.f32 %v1124_v51, %v503_v59  ;;  %v558_v2 = vmul.f32 %v1124_v51, %v519_v60  ;;  %v506_v3 = vld [vmem:[#allocation2 + $0x38] sm:$0xff]  ;;  %773 = vst.msk [vmem:[%s1375_s4 + $0xc] sm:$0xf] %vm769_vm4, %v877_v54  ;;  %v64_v35 = vld [vmem:[#allocation2 + $0x48] sm:$0xff] }
  0xf3   :  { %v522_v4 = vld [vmem:[#allocation2 + $0xb8] sm:$0xff]  ;;  %789 = vst.msk [vmem:[%s1375_s4 + $0x4c] sm:$0xf] %vm769_vm4, %v893_v55  ;;  %v583_v5 = vadd.f32 %v1129_v56, %v544_v57  ;;  %v599_v6 = vadd.f32 %v1129_v56, %v560_v58  ;;  %v545_v7 = vmul.f32 %v1124_v51, %v506_v3  ;;  %v504_v9 = vld [vmem:[#allocation2 + $0x28] sm:$0xff]  ;;  %771 = vst.msk [vmem:[%s1375_s4 + $0x4] sm:$0xf] %vm769_vm4, %v875_v63 }
  0xf4   :  { %v561_v8 = vmul.f32 %v1124_v51, %v522_v4  ;;  %v520_v10 = vld [vmem:[#allocation2 + $0xa8] sm:$0xff]  ;;  %787 = vst.msk [vmem:[%s1375_s4 + $0x44] sm:$0xf] %vm769_vm4, %v891_v0  ;;  %v581_v11 = vadd.f32 %v1129_v56, %v542_v1  ;;  %v597_v12 = vadd.f32 %v1129_v56, %v558_v2  ;;  %v543_v13 = vmul.f32 %v1124_v51, %v504_v9  ;;  %v69_v47 = vld [vmem:[#allocation2 + $0x70] sm:$0xff]  ;;  %v67_v59 = vld [vmem:[#allocation2 + $0x60] sm:$0xff] }
  0xf5   :  { %v559_v14 = vmul.f32 %v1124_v51, %v520_v10  ;;  %v615_v16 = vmax.f32 %v583_v5, 0.0  ;;  %v631_v17 = vmax.f32 %v599_v6, 0.0  ;;  %v584_v18 = vadd.f32 %v1129_v56, %v545_v7  ;;  %v942_v29 = vpop.f32.mrb[12].mxu0  ;;  %v958_v30 = vpop.f32.mrb[12].mxu1  ;;  %v80_v36 = vld [vmem:[#allocation2 + $0xc8] sm:$0xff]  ;;  %v85_v48 = vld [vmem:[#allocation2 + $0xf0] sm:$0xff] }
  0xf6   :  { %v600_v19 = vadd.f32 %v1129_v56, %v561_v8  ;;  %v613_v23 = vmax.f32 %v581_v11, 0.0  ;;  %v629_v24 = vmax.f32 %v597_v12, 0.0  ;;  %v582_v25 = vadd.f32 %v1129_v56, %v543_v13  ;;  %v352_v39 = vpop.f32.mrb[13].mxu0  ;;  %v416_v40 = vpop.f32.mrb[13].mxu1  ;;  %v83_v60 = vld [vmem:[#allocation2 + $0xe0] sm:$0xff]  ;;  %v70_v63 = vld [vmem:[#allocation2 + $0x78] sm:$0xff] }
  0xf7   :  { %v598_v26 = vadd.f32 %v1129_v56, %v559_v14  ;;  %v880_v31 = vpack.c.bf16 %v615_v16, %v615_v16  ;;  %v896_v32 = vpack.c.bf16 %v631_v17, %v631_v17  ;;  %v616_v33 = vmax.f32 %v584_v18, 0.0  ;;  %v943_v49 = vpop.f32.mrb[14].mxu0  ;;  %v959_v50 = vpop.f32.mrb[14].mxu1  ;;  %v86_v4 = vld [vmem:[#allocation2 + $0xf8] sm:$0xff]  ;;  %v68_v5 = vld [vmem:[#allocation2 + $0x68] sm:$0xff] }
  0xf8   :  { %v632_v34 = vmax.f32 %v600_v19, 0.0  ;;  %v878_v41 = vpack.c.bf16 %v613_v23, %v613_v23  ;;  %v894_v42 = vpack.c.bf16 %v629_v24, %v629_v24  ;;  %v614_v45 = vmax.f32 %v582_v25, 0.0  ;;  %v355_v0 = vpop.f32.mrb[15].mxu0  ;;  %v419_v1 = vpop.f32.mrb[15].mxu1  ;;  %v84_v6 = vld [vmem:[#allocation2 + $0xe8] sm:$0xff] }
  0xf9   :  { %v630_v46 = vmax.f32 %v598_v26, 0.0  ;;  %776 = vst.msk [vmem:[%s1375_s4 + $0x18] sm:$0xf] %vm769_vm4, %v880_v31  ;;  %792 = vst.msk [vmem:[%s1375_s4 + $0x58] sm:$0xf] %vm769_vm4, %v896_v32  ;;  %v881_v54 = vpack.c.bf16 %v616_v33, %v616_v33  ;;  %v441_v57 = vadd.f32 %v1155_v37, %v65_v15  ;;  %v457_v58 = vadd.f32 %v1157_v38, %v81_v20 }
  0xfa   :  { %v897_v55 = vpack.c.bf16 %v632_v34, %v632_v34  ;;  %774 = vst.msk [vmem:[%s1375_s4 + $0x10] sm:$0xf] %vm769_vm4, %v878_v41  ;;  %790 = vst.msk [vmem:[%s1375_s4 + $0x50] sm:$0xf] %vm769_vm4, %v894_v42  ;;  %v879_v2 = vpack.c.bf16 %v614_v45, %v614_v45  ;;  %v439_v37 = vadd.f32 %v1159_v43, %v63_v21 }
  0xfb   :  { %v895_v3 = vpack.c.bf16 %v630_v46, %v630_v46  ;;  %v455_v38 = vadd.f32 %v1161_v44, %v79_v22  ;;  %777 = vst.msk [vmem:[%s1375_s4 + $0x1c] sm:$0xf] %vm769_vm4, %v881_v54  ;;  %v442_v43 = vadd.f32 %v1163_v52, %v66_v27  ;;  %v458_v44 = vadd.f32 %v1165_v53, %v82_v28 }
  0xfc   :  { %793 = vst.msk [vmem:[%s1375_s4 + $0x5c] sm:$0xf] %vm769_vm4, %v897_v55  ;;  %v440_v7 = vadd.f32 %v1177_v61, %v64_v35  ;;  %v456_v8 = vadd.f32 %v1179_v62, %v80_v36  ;;  %775 = vst.msk [vmem:[%s1375_s4 + $0x14] sm:$0xf] %vm769_vm4, %v879_v2  ;;  %v445_v52 = vadd.f32 %v942_v29, %v69_v47 }
  0xfd   :  { %474 = vst.msk [vmem:[#allocation2 + $0x50] sm:$0xff] %vm22_vm3, %v441_v57  ;;  %490 = vst.msk [vmem:[#allocation2 + $0xd0] sm:$0xff] %vm22_vm3, %v457_v58  ;;  %v461_v53 = vadd.f32 %v958_v30, %v85_v48  ;;  %v443_v9 = vadd.f32 %v352_v39, %v67_v59  ;;  %v459_v61 = vadd.f32 %v416_v40, %v83_v60 }
  0xfe   :  { %791 = vst.msk [vmem:[%s1375_s4 + $0x54] sm:$0xf] %vm769_vm4, %v895_v3  ;;  %v446_v62 = vadd.f32 %v943_v49, %v70_v63  ;;  %v462_v10 = vadd.f32 %v959_v50, %v86_v4  ;;  %v444_v11 = vadd.f32 %v355_v0, %v68_v5  ;;  %v460_v12 = vadd.f32 %v419_v1, %v84_v6 }
  0xff   :  { %472 = vst.msk [vmem:[#allocation2 + $0x40] sm:$0xff] %vm22_vm3, %v439_v37  ;;  %488 = vst.msk [vmem:[#allocation2 + $0xc0] sm:$0xff] %vm22_vm3, %v455_v38 }
 0x100   :  { %475 = vst.msk [vmem:[#allocation2 + $0x58] sm:$0xff] %vm22_vm3, %v442_v43  ;;  %491 = vst.msk [vmem:[#allocation2 + $0xd8] sm:$0xff] %vm22_vm3, %v458_v44 }
 0x101   :  { %473 = vst.msk [vmem:[#allocation2 + $0x48] sm:$0xff] %vm22_vm3, %v440_v7  ;;  %489 = vst.msk [vmem:[#allocation2 + $0xc8] sm:$0xff] %vm22_vm3, %v456_v8 }
 0x102   :  { %478 = vst.msk [vmem:[#allocation2 + $0x70] sm:$0xff] %vm22_vm3, %v445_v52  ;;  %494 = vst.msk [vmem:[#allocation2 + $0xf0] sm:$0xff] %vm22_vm3, %v461_v53 }
 0x103   :  { %476 = vst.msk [vmem:[#allocation2 + $0x60] sm:$0xff] %vm22_vm3, %v443_v9  ;;  %492 = vst.msk [vmem:[#allocation2 + $0xe0] sm:$0xff] %vm22_vm3, %v459_v61 }
 0x104   :  { %479 = vst.msk [vmem:[#allocation2 + $0x78] sm:$0xff] %vm22_vm3, %v446_v62  ;;  %495 = vst.msk [vmem:[#allocation2 + $0xf8] sm:$0xff] %vm22_vm3, %v462_v10  ;;  %v509_v13 = vld [vmem:[#allocation2 + $0x50] sm:$0xff] }
 0x105   :  { %477 = vst.msk [vmem:[#allocation2 + $0x68] sm:$0xff] %vm22_vm3, %v444_v11  ;;  %493 = vst.msk [vmem:[#allocation2 + $0xe8] sm:$0xff] %vm22_vm3, %v460_v12  ;;  %v525_v14 = vld [vmem:[#allocation2 + $0xd0] sm:$0xff]  ;;  %v548_v15 = vmul.f32 %v1124_v51, %v509_v13 }
 0x106   :  { %v564_v16 = vmul.f32 %v1124_v51, %v525_v14  ;;  %v507_v17 = vld [vmem:[#allocation2 + $0x40] sm:$0xff] }
 0x107   :  { %v523_v18 = vld [vmem:[#allocation2 + $0xc0] sm:$0xff]  ;;  %v546_v19 = vmul.f32 %v1124_v51, %v507_v17  ;;  %v510_v21 = vld [vmem:[#allocation2 + $0x58] sm:$0xff]  ;;  %v587_v24 = vadd.f32 %v1129_v56, %v548_v15 }
 0x108   :  { %v562_v20 = vmul.f32 %v1124_v51, %v523_v18  ;;  %v526_v22 = vld [vmem:[#allocation2 + $0xd8] sm:$0xff]  ;;  %v508_v23 = vld [vmem:[#allocation2 + $0x48] sm:$0xff]  ;;  %v603_v25 = vadd.f32 %v1129_v56, %v564_v16  ;;  %v549_v26 = vmul.f32 %v1124_v51, %v510_v21 }
 0x109   :  { %v565_v27 = vmul.f32 %v1124_v51, %v526_v22  ;;  %v524_v28 = vld [vmem:[#allocation2 + $0xc8] sm:$0xff]  ;;  %v585_v29 = vadd.f32 %v1129_v56, %v546_v19  ;;  %v547_v31 = vmul.f32 %v1124_v51, %v508_v23  ;;  %v619_v33 = vmax.f32 %v587_v24, 0.0  ;;  %v513_v45 = vld [vmem:[#allocation2 + $0x70] sm:$0xff] }
 0x10a   :  { %v601_v30 = vadd.f32 %v1129_v56, %v562_v20  ;;  %v563_v32 = vmul.f32 %v1124_v51, %v524_v28  ;;  %v635_v34 = vmax.f32 %v603_v25, 0.0  ;;  %v588_v35 = vadd.f32 %v1129_v56, %v549_v26  ;;  %v529_v46 = vld [vmem:[#allocation2 + $0xf0] sm:$0xff]  ;;  %v511_v54 = vld [vmem:[#allocation2 + $0x60] sm:$0xff] }
 0x10b   :  { %v604_v36 = vadd.f32 %v1129_v56, %v565_v27  ;;  %v617_v39 = vmax.f32 %v585_v29, 0.0  ;;  %v586_v41 = vadd.f32 %v1129_v56, %v547_v31  ;;  %v884_v47 = vpack.c.bf16 %v619_v33, %v619_v33  ;;  %v527_v55 = vld [vmem:[#allocation2 + $0xe0] sm:$0xff]  ;;  %v514_v63 = vld [vmem:[#allocation2 + $0x78] sm:$0xff] }
 0x10c   :  { %v633_v40 = vmax.f32 %v601_v30, 0.0  ;;  %v602_v42 = vadd.f32 %v1129_v56, %v563_v32  ;;  %v900_v48 = vpack.c.bf16 %v635_v34, %v635_v34  ;;  %v620_v49 = vmax.f32 %v588_v35, 0.0  ;;  %v530_v0 = vld [vmem:[#allocation2 + $0xf8] sm:$0xff]  ;;  %v512_v38 = vld [vmem:[#allocation2 + $0x68] sm:$0xff] }
 0x10d   :  { %v636_v50 = vmax.f32 %v604_v36, 0.0  ;;  %v882_v57 = vpack.c.bf16 %v617_v39, %v617_v39  ;;  %v618_v59 = vmax.f32 %v586_v41, 0.0  ;;  %780 = vst.msk [vmem:[%s1375_s4 + $0x28] sm:$0xf] %vm769_vm4, %v884_v47  ;;  %v552_v3 = vmul.f32 %v1124_v51, %v513_v45  ;;  %v528_v4 = vld [vmem:[#allocation2 + $0xe8] sm:$0xff] }
 0x10e   :  { %v898_v58 = vpack.c.bf16 %v633_v40, %v633_v40  ;;  %v634_v60 = vmax.f32 %v602_v42, 0.0  ;;  %796 = vst.msk [vmem:[%s1375_s4 + $0x68] sm:$0xf] %vm769_vm4, %v900_v48  ;;  %v885_v1 = vpack.c.bf16 %v620_v49, %v620_v49  ;;  %v568_v37 = vmul.f32 %v1124_v51, %v529_v46 }
 0x10f   :  { %v901_v2 = vpack.c.bf16 %v636_v50, %v636_v50  ;;  %778 = vst.msk [vmem:[%s1375_s4 + $0x20] sm:$0xf] %vm769_vm4, %v882_v57  ;;  %v883_v5 = vpack.c.bf16 %v618_v59, %v618_v59  ;;  %v550_v43 = vmul.f32 %v1124_v51, %v511_v54  ;;  %v566_v44 = vmul.f32 %v1124_v51, %v527_v55 }
 0x110   :  { %794 = vst.msk [vmem:[%s1375_s4 + $0x60] sm:$0xf] %vm769_vm4, %v898_v58  ;;  %v899_v6 = vpack.c.bf16 %v634_v60, %v634_v60  ;;  %781 = vst.msk [vmem:[%s1375_s4 + $0x2c] sm:$0xf] %vm769_vm4, %v885_v1  ;;  %v591_v7 = vadd.f32 %v1129_v56, %v552_v3  ;;  %v607_v8 = vadd.f32 %v1129_v56, %v568_v37 }
 0x111   :  { %797 = vst.msk [vmem:[%s1375_s4 + $0x6c] sm:$0xf] %vm769_vm4, %v901_v2  ;;  %v553_v52 = vmul.f32 %v1124_v51, %v514_v63  ;;  %v569_v53 = vmul.f32 %v1124_v51, %v530_v0  ;;  %779 = vst.msk [vmem:[%s1375_s4 + $0x24] sm:$0xf] %vm769_vm4, %v883_v5  ;;  %v589_v9 = vadd.f32 %v1129_v56, %v550_v43 }
 0x112   :  { %795 = vst.msk [vmem:[%s1375_s4 + $0x64] sm:$0xf] %vm769_vm4, %v899_v6  ;;  %v605_v61 = vadd.f32 %v1129_v56, %v566_v44  ;;  %v551_v62 = vmul.f32 %v1124_v51, %v512_v38  ;;  %v567_v10 = vmul.f32 %v1124_v51, %v528_v4  ;;  %v623_v11 = vmax.f32 %v591_v7, 0.0 }
 0x113   :  { %v639_v12 = vmax.f32 %v607_v8, 0.0  ;;  %v592_v13 = vadd.f32 %v1129_v56, %v553_v52  ;;  %v608_v14 = vadd.f32 %v1129_v56, %v569_v53  ;;  %v621_v15 = vmax.f32 %v589_v9, 0.0 }
 0x114   :  { %v637_v16 = vmax.f32 %v605_v61, 0.0  ;;  %v590_v17 = vadd.f32 %v1129_v56, %v551_v62  ;;  %v606_v18 = vadd.f32 %v1129_v56, %v567_v10  ;;  %v888_v19 = vpack.c.bf16 %v623_v11, %v623_v11 }
 0x115   :  { %v904_v20 = vpack.c.bf16 %v639_v12, %v639_v12  ;;  %v624_v21 = vmax.f32 %v592_v13, 0.0  ;;  %v640_v22 = vmax.f32 %v608_v14, 0.0  ;;  %v886_v23 = vpack.c.bf16 %v621_v15, %v621_v15 }
 0x116   :  { %v902_v24 = vpack.c.bf16 %v637_v16, %v637_v16  ;;  %v622_v25 = vmax.f32 %v590_v17, 0.0  ;;  %v638_v51 = vmax.f32 %v606_v18, 0.0  ;;  %784 = vst.msk [vmem:[%s1375_s4 + $0x38] sm:$0xf] %vm769_vm4, %v888_v19 }
 0x117   :  { %800 = vst.msk [vmem:[%s1375_s4 + $0x78] sm:$0xf] %vm769_vm4, %v904_v20  ;;  %v889_v26 = vpack.c.bf16 %v624_v21, %v624_v21  ;;  %v905_v56 = vpack.c.bf16 %v640_v22, %v640_v22  ;;  %782 = vst.msk [vmem:[%s1375_s4 + $0x30] sm:$0xf] %vm769_vm4, %v886_v23 }
 0x118   :  { %798 = vst.msk [vmem:[%s1375_s4 + $0x70] sm:$0xf] %vm769_vm4, %v902_v24  ;;  %v887_v27 = vpack.c.bf16 %v622_v25, %v622_v25  ;;  %v903_v28 = vpack.c.bf16 %v638_v51, %v638_v51 }
 0x119   :  { %785 = vst.msk [vmem:[%s1375_s4 + $0x3c] sm:$0xf] %vm769_vm4, %v889_v26  ;;  %801 = vst.msk [vmem:[%s1375_s4 + $0x7c] sm:$0xf] %vm769_vm4, %v905_v56 }
 0x11a   :  { %783 = vst.msk [vmem:[%s1375_s4 + $0x34] sm:$0xf] %vm769_vm4, %v887_v27  ;;  %799 = vst.msk [vmem:[%s1375_s4 + $0x74] sm:$0xf] %vm769_vm4, %v903_v28 }

// kernel: resnet_rpp_forward.9
= control target key start
LH: loop header
LB: loop body
LE: loop exit
PB: predicated region body
PF: predicated region fallthrough
CT: control target
= control target key end

     0   :  { %vm22_vm0 = vcmask 523264   ;;  %v306_v1 = vmov 0.0   ;;  %vm75_vm1 = vcmask 130048   ;;  %vm243_vm2 = vcmask 519168   ;;  %s401_s1 = inlined_call_operand.vmem [shape: bf16[16,64], index: 1, kind: input, shape index: {}]   ;;  %s402_s0 = inlined_call_operand.vmem [shape: bf16[64,16], index: 0, kind: input, shape index: {}]   ;;  %s403_s2 = inlined_call_operand.vmem [shape: f32[1,64], index: 2, kind: input, shape index: {}]   ;;  %s404_s3 = inlined_call_operand.vmem [shape: f32[1,64], index: 3, kind: input, shape index: {}]   ;;  %s405_s4 = inlined_call_operand.vmem [shape: bf16[64,64], index: 4, kind: output, shape index: {}]  }
   0x1   :  { %v301_v0 = vld [vmem:[%s401_s1] sm:$0xff]   ;;  %25 = vst.msk [vmem:[#allocation2 + $0x10] sm:$0xff] %vm22_vm0, %v306_v1  ;;  %23 = vst.msk [vmem:[#allocation2] sm:$0xff] %vm22_vm0, %v306_v1  ;;  %v303_v3 = vld [vmem:[%s402_s0 + $0x10] sm:$0xff]  }
   0x2   :  { %24 = vst.msk [vmem:[#allocation2 + $0x8] sm:$0xff] %vm22_vm0, %v306_v1  ;;  %26 = vst.msk [vmem:[#allocation2 + $0x18] sm:$0xff] %vm22_vm0, %v306_v1  ;;  %v302_v2 = vld [vmem:[%s402_s0] sm:$0xff]   ;;  %288 = vmatprep.subr.bf16.mxu0 %v301_v0  ;;  %298 = vmatprep.subr.bf16.mxu1 %v301_v0  ;;  %v304_v4 = vld [vmem:[%s402_s0 + $0x8] sm:$0xff]  }
   0x3   :  { %27 = vst.msk [vmem:[#allocation2 + $0x20] sm:$0xff] %vm22_vm0, %v306_v1  ;;  %28 = vst.msk [vmem:[#allocation2 + $0x28] sm:$0xff] %vm22_vm0, %v306_v1  ;;  %289 = vmatpush3.bf16.msra.mxu0 %v301_v0  ;;  %299 = vmatpush3.bf16.msra.mxu1 %v301_v0  ;;  %v305_v5 = vld [vmem:[%s402_s0 + $0x18] sm:$0xff]   ;;  %v265_v30 = vld [vmem:[%s403_s2] ss:$0 sm:$0xff] }
   0x4   :  { %29 = vst.msk [vmem:[#allocation2 + $0x30] sm:$0xff] %vm22_vm0, %v306_v1  ;;  %30 = vst.msk [vmem:[#allocation2 + $0x38] sm:$0xff] %vm22_vm0, %v306_v1  ;;  %290 = vmatprep.mubr.msk.bf16.mxu0 %vm75_vm1, %v302_v2  ;;  %294 = vmatprep.mubr.msk.bf16.mxu1 %vm75_vm1, %v303_v3  ;;  %v266_v32 = vld [vmem:[%s404_s3] ss:$0 sm:$0xff] }
   0x6   :  { %291 = vmatmul.mubr.msk.bf16.vlgmr.msra.gmra.mrb[0].mxu0 %vm75_vm1, %v304_v4  ;;  %295 = vmatmul.mubr.msk.bf16.vlgmr.msra.gmra.mrb[0].mxu1 %vm75_vm1, %v305_v5 }
   0x8   :  { %v33_v6 = vld [vmem:[#allocation2 + $0x10] sm:$0xff]  ;;  %v31_v8 = vld [vmem:[#allocation2] sm:$0xff] }
   0x9   :  { %v34_v12 = vld [vmem:[#allocation2 + $0x18] sm:$0xff]  ;;  %v32_v18 = vld [vmem:[#allocation2 + $0x8] sm:$0xff] }
   0xa   :  { %v35_v9 = vld [vmem:[#allocation2 + $0x20] sm:$0xff]  ;;  %v36_v19 = vld [vmem:[#allocation2 + $0x28] sm:$0xff] }
   0xb   :  { %v37_v7 = vld [vmem:[#allocation2 + $0x30] sm:$0xff]  ;;  %v38_v13 = vld [vmem:[#allocation2 + $0x38] sm:$0xff] }
  0xd9   :  { %v292_v10 = vpop.f32.mrb[0].mxu0  ;;  %v296_v11 = vpop.f32.mrb[0].mxu1 }
  0xda   :  { %v155_v14 = vadd.f32 %v292_v10, %v33_v6  ;;  %v159_v15 = vadd.f32 %v296_v11, %v37_v7  ;;  %v122_v16 = vpop.f32.mrb[1].mxu0  ;;  %v138_v17 = vpop.f32.mrb[1].mxu1 }
  0xdb   :  { %v153_v20 = vadd.f32 %v122_v16, %v31_v8  ;;  %v157_v21 = vadd.f32 %v138_v17, %v35_v9  ;;  %v293_v22 = vpop.f32.mrb[2].mxu0  ;;  %v297_v23 = vpop.f32.mrb[2].mxu1 }
  0xdc   :  { %164 = vst.msk [vmem:[#allocation2 + $0x10] sm:$0xff] %vm22_vm0, %v155_v14  ;;  %168 = vst.msk [vmem:[#allocation2 + $0x30] sm:$0xff] %vm22_vm0, %v159_v15  ;;  %v156_v24 = vadd.f32 %v293_v22, %v34_v12  ;;  %v160_v25 = vadd.f32 %v297_v23, %v38_v13  ;;  %v125_v26 = vpop.f32.mrb[3].mxu0  ;;  %v141_v27 = vpop.f32.mrb[3].mxu1 }
  0xdd   :  { %162 = vst.msk [vmem:[#allocation2] sm:$0xff] %vm22_vm0, %v153_v20  ;;  %166 = vst.msk [vmem:[#allocation2 + $0x20] sm:$0xff] %vm22_vm0, %v157_v21  ;;  %v154_v28 = vadd.f32 %v125_v26, %v32_v18  ;;  %v158_v29 = vadd.f32 %v141_v27, %v36_v19 }
  0xde   :  { %165 = vst.msk [vmem:[#allocation2 + $0x18] sm:$0xff] %vm22_vm0, %v156_v24  ;;  %169 = vst.msk [vmem:[#allocation2 + $0x38] sm:$0xff] %vm22_vm0, %v160_v25 }
  0xdf   :  { %163 = vst.msk [vmem:[#allocation2 + $0x8] sm:$0xff] %vm22_vm0, %v154_v28  ;;  %167 = vst.msk [vmem:[#allocation2 + $0x28] sm:$0xff] %vm22_vm0, %v158_v29 }
  0xe3   :  { %v175_v31 = vld [vmem:[#allocation2 + $0x10] sm:$0xff] }
  0xe4   :  { %v179_v33 = vld [vmem:[#allocation2 + $0x30] sm:$0xff]  ;;  %v190_v34 = vmul.f32 %v265_v30, %v175_v31  ;;  %v173_v36 = vld [vmem:[#allocation2] sm:$0xff] }
  0xe5   :  { %v194_v35 = vmul.f32 %v265_v30, %v179_v33  ;;  %v177_v37 = vld [vmem:[#allocation2 + $0x20] sm:$0xff]  ;;  %v188_v38 = vmul.f32 %v265_v30, %v173_v36  ;;  %v176_v40 = vld [vmem:[#allocation2 + $0x18] sm:$0xff] }
  0xe6   :  { %v192_v39 = vmul.f32 %v265_v30, %v177_v37  ;;  %v180_v41 = vld [vmem:[#allocation2 + $0x38] sm:$0xff]  ;;  %v205_v42 = vadd.f32 %v266_v32, %v190_v34  ;;  %v191_v44 = vmul.f32 %v265_v30, %v176_v40  ;;  %v174_v46 = vld [vmem:[#allocation2 + $0x8] sm:$0xff] }
  0xe7   :  { %v209_v43 = vadd.f32 %v266_v32, %v194_v35  ;;  %v195_v45 = vmul.f32 %v265_v30, %v180_v41  ;;  %v178_v47 = vld [vmem:[#allocation2 + $0x28] sm:$0xff]  ;;  %v203_v48 = vadd.f32 %v266_v32, %v188_v38  ;;  %v189_v50 = vmul.f32 %v265_v30, %v174_v46 }
  0xe8   :  { %v207_v49 = vadd.f32 %v266_v32, %v192_v39  ;;  %v193_v51 = vmul.f32 %v265_v30, %v178_v47  ;;  %v277_v52 = vpack.c.bf16 %v205_v42, %v205_v42  ;;  %v206_v54 = vadd.f32 %v266_v32, %v191_v44 }
  0xe9   :  { %v281_v53 = vpack.c.bf16 %v209_v43, %v209_v43  ;;  %v210_v55 = vadd.f32 %v266_v32, %v195_v45  ;;  %v275_v56 = vpack.c.bf16 %v203_v48, %v203_v48  ;;  %v204_v58 = vadd.f32 %v266_v32, %v189_v50 }
  0xea   :  { %v279_v57 = vpack.c.bf16 %v207_v49, %v207_v49  ;;  %v208_v59 = vadd.f32 %v266_v32, %v193_v51  ;;  %246 = vst.msk [vmem:[%s405_s4 + $0x8] sm:$0xf] %vm243_vm2, %v277_v52  ;;  %v278_v60 = vpack.c.bf16 %v206_v54, %v206_v54 }
  0xeb   :  { %250 = vst.msk [vmem:[%s405_s4 + $0x18] sm:$0xf] %vm243_vm2, %v281_v53  ;;  %v282_v61 = vpack.c.bf16 %v210_v55, %v210_v55  ;;  %244 = vst.msk [vmem:[%s405_s4] sm:$0xf] %vm243_vm2, %v275_v56  ;;  %v276_v62 = vpack.c.bf16 %v204_v58, %v204_v58 }
  0xec   :  { %248 = vst.msk [vmem:[%s405_s4 + $0x10] sm:$0xf] %vm243_vm2, %v279_v57  ;;  %v280_v63 = vpack.c.bf16 %v208_v59, %v208_v59  ;;  %247 = vst.msk [vmem:[%s405_s4 + $0xc] sm:$0xf] %vm243_vm2, %v278_v60 }
  0xed   :  { %251 = vst.msk [vmem:[%s405_s4 + $0x1c] sm:$0xf] %vm243_vm2, %v282_v61  ;;  %245 = vst.msk [vmem:[%s405_s4 + $0x4] sm:$0xf] %vm243_vm2, %v276_v62 }
  0xee   :  { %249 = vst.msk [vmem:[%s405_s4 + $0x14] sm:$0xf] %vm243_vm2, %v280_v63 }

// kernel: resnet_rpp_forward.11
= control target key start
LH: loop header
LB: loop body
LE: loop exit
PB: predicated region body
PF: predicated region fallthrough
CT: control target
= control target key end

     0   :  { %s1649_s15 = smov 0   ;;  %s1929_s0 = inlined_call_operand.vmem [shape: bf16[2,66,16], index: 0, kind: input, shape index: {}]   ;;  %s1930_s1 = inlined_call_operand.vmem [shape: bf16[9,16,16], index: 1, kind: input, shape index: {}]   ;;  %s1931_s2 = inlined_call_operand.vmem [shape: f32[1,16], index: 2, kind: input, shape index: {}]   ;;  %s1932_s3 = inlined_call_operand.vmem [shape: f32[1,16], index: 3, kind: input, shape index: {}]   ;;  %s1933_s4 = inlined_call_operand.vmem [shape: bf16[2,48,16], index: 4, kind: output, shape index: {}]  }
   0x1 LB: > { %s1230_s16 = sadd.s32 4294967295, %s1620_s15   ;;  %p1234_p0 = scmp.ge.s32.totalorder %s1620_s15, 1  ;;  %s1620_s15 = sphi %s1649_s15, %s14_s15  }
   0x2   : > { %p162_p1 = scmp.lt.s32.totalorder %s1620_s15, 3 }
   0x4   : > { %p163_p2 = pnand %p1234_p0, %p162_p1 }
   0x5   : > { %v1588_v0 = vld [vmem:[%s1930_s1 + $0x8] sm:$0xff] (!%p163_p2)   ;;  %v1622_v1 = vmov (!%p163_p2), 0.0   ;;  %v1665_v2 = vld [vmem:[%s1930_s1 + $0x20] sm:$0xff] (!%p163_p2)   ;;  %vm1623_vm0 = vmmov (!%p163_p2), 0   ;;  %p188_p3 = scmp.lt.s32.totalorder (!%p163_p2), %s1230_s16, 1  ;;  %vm264_vm2 = vcmask (!%p163_p2), 130048  }
   0x6   : > { %166 = sbr.rel (%p163_p2) target bundleno = 356 (0x164), region = 36  ;;  %1358 = vmatprep.subr.bf16.mxu1 (!%p163_p2), %v1622_v1  ;;  %1414 = vmatprep.subr.bf16.mxu0 (!%p163_p2), %v1622_v1  ;;  %vm229_vm1 = vsmask.f32 (!%p163_p2), 7424  ;;  %v1592_v28 = vld [vmem:[%s1930_s1] sm:$0xff] (!%p163_p2)   ;;  %vm597_vm3 = vsmask.f32 (!%p163_p2), 4352 }
   0x7   : > { %1359 = vmatpush3.bf16.msra.mxu1 (!%p163_p2), %v1588_v0  ;;  %1360 = vmatprep.mubr.msk.bf16.mxu1 (!%p163_p2), %vm1623_vm0, %v1622_v1  ;;  %v1595_v36 = vld [vmem:[%s1930_s1 + $0x28] sm:$0xff] (!%p163_p2)   ;;  %vm504_vm4 = vcmask (!%p163_p2), 1044480   ;;  %v1598_v54 = vld [vmem:[%s1930_s1 + $0x30] sm:$0xff] (!%p163_p2)   ;;  %vm813_vm5 = vcmask (!%p163_p2), 1045504   ;;  %vm407_vm6 = vcmask (!%p163_p2), 1046528   ;;  %vm1168_vm8 = vcmask (!%p163_p2), 125952  }
   0x8   : > { %1415 = vmatpush3.bf16.msra.mxu0 (!%p163_p2), %v1665_v2  ;;  %1372 = vmatprep.subr.bf16.mxu1 (!%p163_p2), %v1622_v1  ;;  %vm906_vm7 = vsmask.f32 (!%p163_p2), 5376 }
   0x9   : > { %1416 = vmatprep.mubr.msk.bf16.mxu0 (!%p163_p2), %vm1623_vm0, %v1622_v1  ;;  %1428 = vmatprep.subr.bf16.mxu0 (!%p163_p2), %v1622_v1 }
   0xd   : > { %s1935_s16 = smov (!%p188_p3, %s1230_s16), 1 }
   0xe   : > { %s1576_s21 = smul.u32 36, %s1935_s16 }
   0xf   : > { %s1577_s19 = smul.u32 24, %s1935_s16 }
  0x10   : > { %s1680_s24 = scalar_lea.vmem %s1929_s0, %s1576_s21 }
  0x11   : > { %v199_v3 = vld [vmem:[%s1680_s24] sm:$0xf]  ;;  %v1684_v4 = vld [vmem:[%s1680_s24 + $0x4] sm:$0xf]  ;;  %v1687_v5 = vld [vmem:[%s1680_s24 + $0x8] sm:$0xf]  ;;  %s1912_s22 = scalar_lea.vmem %s1933_s4, %s1577_s19 }
  0x12   : > { %v1690_v6 = vld [vmem:[%s1680_s24 + $0xc] sm:$0xf]  ;;  %v1693_v7 = vcombine.low %v199_v3, %v1684_v4  ;;  %v1696_v8 = vld [vmem:[%s1680_s24 + $0x10] sm:$0xf]  ;;  %v1699_v9 = vld [vmem:[%s1680_s24 + $0x14] sm:$0xf]  ;;  %v1275_v51 = vcombine.low %v1684_v4, %v1687_v5 }
  0x13   : > { %v1703_v10 = vcombine.low %v1687_v5, %v1690_v6  ;;  %v1707_v11 = vcombine.low %v1696_v8, %v1699_v9  ;;  %v493_v12 = vld [vmem:[%s1680_s24] sm:$0x8]  ;;  %v1732_v41 = vld [vmem:[%s1680_s24 + $0x18] ss:$0 sps:$4 sm:$0x11]   ;;  %v1276_v63 = vcombine.low %v1690_v6, %v1696_v8  ;;  %v1600_v5 = vld [vmem:[%s1930_s1 + $0x10] sm:$0xff]  }
  0x14   : > { %v231_v13 = vshrl.u32 %v1693_v7, 16  ;;  %v233_v14 = vshll.u32 %v1693_v7, 16  ;;  %v1260_v15 = vcombine.low %v493_v12, %v1684_v4  ;;  %v254_v43 = vshll.u32 %v1732_v41, 16  ;;  %v590_v45 = vld [vmem:[%s1680_s24 + $0x18] sm:$0xf] }
  0x15   : > { %v238_v16 = vshll.u32 %v1703_v10, 16  ;;  %v242_v17 = vshrl.u32 %v1703_v10, 16  ;;  %v250_v18 = vshrl.u32 %v1707_v11, 16  ;;  %v246_v20 = vshll.u32 %v1707_v11, 16  ;;  %v785_v12 = vld [vmem:[%s1680_s24 + $0x4] sm:$0xc] }
  0x16   : > { %v235_v19 = vrot.slane %v233_v14, 1  ;;  %v599_v21 = vshrl.u32 %v1260_v15, 16  ;;  %v602_v22 = vshll.u32 %v1260_v15, 16  ;;  %v505_v44 = vrot.slane %v1260_v15, 3  ;;  %v1793_v14 = vld [vmem:[%s1680_s24 + $0xc] sm:$0xff]  }
  0x17   : > { %v240_v23 = vrot.slane %v238_v16, 1  ;;  %v606_v24 = vrot.slane %v242_v17, 3  ;;  %v607_v25 = vrot.slane %v238_v16, 4  ;;  %v610_v26 = vrot.slane %v250_v18, 3 }
  0x18   : > { %v236_v27 = vor.u32 %v235_v19, %v231_v13  ;;  %v601_v29 = vrot.slane %v599_v21, 3  ;;  %v604_v30 = vrot.slane %v602_v22, 4  ;;  %v611_v31 = vrot.slane %v246_v20, 4  ;;  %v1613_v47 = vld [vmem:[%s1680_s24 + $0x18] ss:$0 sps:$4 sm:$0x77]  }
  0x19   : > { %v608_v32 = vor.u32 %v607_v25, %v606_v24  ;;  %v244_v39 = vor.u32 %v242_v17, %v240_v23  ;;  %v248_v40 = vrot.slane %v246_v20, 1  ;;  %v506_v46 = vrot.slane %v1703_v10, 3  ;;  %v1785_v13 = vld [vmem:[%s1680_s24 + $0x8] sm:$0xf]  ;;  %v1605_v17 = vld [vmem:[%s1930_s1 + $0x38] sm:$0xff]  }
  0x1a   : > { %v241_v33 = vsel %vm229_vm1, %v236_v27, %v240_v23  ;;  %v605_v34 = vor.u32 %v604_v30, %v601_v29  ;;  %v612_v35 = vor.u32 %v611_v31, %v610_v26  ;;  %v256_v49 = vrot.slane %v254_v43, 1  ;;  %v1608_v25 = vld [vmem:[%s1930_s1 + $0x18] sm:$0xff]  }
  0x1b   : > { %1361 = vmatmul.mubr.msk.bf16.vlgmr.msra.gmra.mrb[0].mxu1 %vm264_vm2, %v241_v33  ;;  %v249_v42 = vsel %vm229_vm1, %v244_v39, %v248_v40  ;;  %v252_v48 = vor.u32 %v250_v18, %v248_v40  ;;  %v1268_v50 = vcombine.low %v590_v45, %v590_v45  ;;  %v1750_v52 = vsel %vm504_vm4, %v505_v44, %v506_v46  ;;  %v1809_v18 = vld [vmem:[%s1680_s24 + $0x14] sm:$0xff]   ;;  %v1610_v44 = vld [vmem:[%s1930_s1 + $0x40] sm:$0xff]  }
  0x1c   : > { %1373 = vmatpush3.bf16.msra.mxu1 %v1592_v28  ;;  %v609_v37 = vsel %vm597_vm3, %v605_v34, %v608_v32  ;;  %v1727_v38 = vsel %vm597_vm3, %v608_v32, %v612_v35  ;;  %1364 = vmatprep.mubr.msk.bf16.mxu1 %vm1623_vm0, %v1622_v1  ;;  %v508_v53 = vrot.slane %v1707_v11, 3  ;;  %v510_v56 = vrot.slane %v1613_v47, 3  ;;  %v1611_v47 = vld [vmem:[%s1680_s24 + $0x1c] ss:$0 sps:$4 sm:$0x77]  }
  0x1d   : > { %1417 = vmatmul.mubr.msk.bf16.vlgmr.msra.gmra.mrb[0].mxu0 %vm264_vm2, %v609_v37  ;;  %1386 = vmatprep.subr.bf16.mxu1 %v1622_v1  ;;  %v257_v57 = vsel %vm229_vm1, %v252_v48, %v256_v49  ;;  %v615_v58 = vshrl.u32 %v1268_v50, 16  ;;  %v618_v60 = vshll.u32 %v1268_v50, 16  ;;  %v1277_v6 = vcombine.low %v1699_v9, %v590_v45  ;;  %v400_v9 = vld [vmem:[%s1680_s24] sm:$0xe] }
  0x1e   : > { %1429 = vmatpush3.bf16.msra.mxu0 %v1595_v36  ;;  %1430 = vmatprep.mubr.msk.bf16.mxu0 %vm1623_vm0, %v1622_v1  ;;  %v1757_v55 = vsel %vm504_vm4, %v506_v46, %v508_v53  ;;  %v1762_v59 = vsel %vm504_vm4, %v508_v53, %v510_v56  ;;  %v1284_v8 = vcombine.low %v785_v12, %v1785_v13  ;;  %v815_v15 = vrot.slane %v1793_v14, 2 }
  0x1f   : > { %1442 = vmatprep.subr.bf16.mxu0 %v1622_v1  ;;  %v617_v61 = vrot.slane %v615_v58, 3  ;;  %v620_v62 = vrot.slane %v618_v60, 4  ;;  %v1253_v19 = vcombine.low %v400_v9, %v1684_v4  ;;  %v817_v20 = vrot.slane %v1809_v18, 2  ;;  %v1609_v4 = vld [vmem:[%s1680_s24 + $0x1c] ss:$0 sps:$4 sm:$0x33]  }
  0x20   : > { %v409_v22 = vrot.slane %v1703_v10, 1  ;;  %v819_v26 = vrot.slane %v1609_v4, 2  ;;  %v908_v27 = vshrl.u32 %v1284_v8, 16  ;;  %v911_v28 = vshll.u32 %v1284_v8, 16 }
  0x21   : > { %v621_v0 = vor.u32 %v620_v62, %v617_v61  ;;  %v408_v21 = vrot.slane %v1253_v19, 1  ;;  %v818_v23 = vsel %vm813_vm5, %v815_v15, %v817_v20  ;;  %v919_v29 = vshll.u32 %v1793_v14, 16 }
  0x22   : > { %v411_v30 = vrot.slane %v1707_v11, 1  ;;  %v820_v31 = vsel %vm813_vm5, %v817_v20, %v819_v26  ;;  %v910_v32 = vrot.slane %v908_v27, 2  ;;  %v913_v33 = vrot.slane %v911_v28, 3 }
  0x23   : > { %1365 = vmatmul.mubr.msk.bf16.gmra.mrb[4].mxu1 %vm264_vm2, %v249_v42  ;;  %v1773_v3 = vsel %vm597_vm3, %v612_v35, %v621_v0  ;;  %v410_v24 = vsel %vm407_vm6, %v408_v21, %v409_v22  ;;  %v921_v35 = vrot.slane %v919_v29, 3  ;;  %v928_v40 = vshll.u32 %v1809_v18, 16 }
  0x24   : > { %1368 = vmatprep.mubr.msk.bf16.mxu1 %vm1623_vm0, %v1622_v1  ;;  %v412_v36 = vsel %vm407_vm6, %v409_v22, %v411_v30  ;;  %v914_v37 = vor.u32 %v913_v33, %v910_v32  ;;  %v413_v42 = vrot.slane %v1732_v41, 1  ;;  %v934_v41 = vshrl.u32 %v1611_v47, 16 }
  0x25   : > { %v930_v46 = vrot.slane %v928_v40, 3  ;;  %v937_v50 = vshll.u32 %v1611_v47, 16  ;;  %v1028_v62 = vrot.slane %v1793_v14, 3 }
  0x26   : > { %v414_v48 = vsel %vm407_vm6, %v411_v30, %v413_v42  ;;  %v936_v53 = vrot.slane %v934_v41, 2 }
  0x29   : > { %1431 = vmatmul.mubr.msk.bf16.vlgmr.msra.gmra.mrb[0].mxu0 %vm264_vm2, %v1275_v51 }
  0x2a   : > { %1443 = vmatpush3.bf16.msra.mxu0 %v1598_v54  ;;  %1434 = vmatprep.mubr.msk.bf16.mxu0 %vm1623_vm0, %v1622_v1  ;;  %v939_v54 = vrot.slane %v937_v50, 3 }
  0x2b   : > { %1369 = vmatmul.mubr.msk.bf16.gmra.mrb[8].mxu1 %vm264_vm2, %v257_v57  ;;  %1456 = vmatprep.subr.bf16.mxu0 %v1622_v1  ;;  %v1020_v57 = vld [vmem:[%s1680_s24 + $0x4] sm:$0x8] }
  0x2c   : > { %1374 = vmatprep.mubr.msk.bf16.mxu1 %vm1623_vm0, %v1622_v1  ;;  %v940_v56 = vor.u32 %v939_v54, %v936_v53  ;;  %v1301_v60 = vcombine.low %v1020_v57, %v1785_v13 }
  0x2e   : > { %v1027_v61 = vrot.slane %v1301_v60, 3 }
  0x31   : > { %1435 = vmatmul.mubr.msk.bf16.gmra.mrb[4].mxu0 %vm264_vm2, %v1276_v63  ;;  %v1032_v63 = vrot.slane %v1611_v47, 3 }
  0x32   : > { %1438 = vmatprep.mubr.msk.bf16.mxu0 %vm1623_vm0, %v1622_v1 }
  0x33   : > { %1375 = vmatmul.mubr.msk.bf16.vlgmr.msra.gmra.mrb[0].mxu1 %vm264_vm2, %v1693_v7  ;;  %v814_v7 = vrot.slane %v1284_v8, 2 }
  0x34   : > { %1387 = vmatpush3.bf16.msra.mxu1 %v1600_v5  ;;  %1378 = vmatprep.mubr.msk.bf16.mxu1 %vm1623_vm0, %v1622_v1 }
  0x35   : > { %1400 = vmatprep.subr.bf16.mxu1 %v1622_v1  ;;  %v816_v16 = vsel %vm813_vm5, %v814_v7, %v815_v15 }
  0x39   : > { %1439 = vmatmul.mubr.msk.bf16.gmra.mrb[8].mxu0 %vm264_vm2, %v1277_v6 }
  0x3a   : > { %1444 = vmatprep.mubr.msk.bf16.mxu0 %vm1623_vm0, %v1622_v1 }
  0x3b   : > { %1379 = vmatmul.mubr.msk.bf16.gmra.mrb[4].mxu1 %vm264_vm2, %v1703_v10  ;;  %v916_v10 = vshrl.u32 %v1793_v14, 16 }
  0x3c   : > { %1382 = vmatprep.mubr.msk.bf16.mxu1 %vm1623_vm0, %v1622_v1 }
  0x3d   : > { %v918_v34 = vrot.slane %v916_v10, 2 }
  0x3f   : > { %v922_v39 = vor.u32 %v921_v35, %v918_v34 }
  0x41   : > { %1445 = vmatmul.mubr.msk.bf16.vlgmr.msra.gmra.mrb[0].mxu0 %vm264_vm2, %v816_v16  ;;  %v923_v43 = vsel %vm906_vm7, %v914_v37, %v922_v39 }
  0x42   : > { %1457 = vmatpush3.bf16.msra.mxu0 %v1605_v17  ;;  %1448 = vmatprep.mubr.msk.bf16.mxu0 %vm1623_vm0, %v1622_v1 }
  0x43   : > { %1383 = vmatmul.mubr.msk.bf16.gmra.mrb[8].mxu1 %vm264_vm2, %v1707_v11  ;;  %1470 = vmatprep.subr.bf16.mxu0 %v1622_v1  ;;  %v925_v11 = vshrl.u32 %v1809_v18, 16 }
  0x44   : > { %1388 = vmatprep.mubr.msk.bf16.mxu1 %vm1623_vm0, %v1622_v1 }
  0x45   : > { %v927_v45 = vrot.slane %v925_v11, 2 }
  0x47   : > { %v931_v49 = vor.u32 %v930_v46, %v927_v45 }
  0x49   : > { %1449 = vmatmul.mubr.msk.bf16.gmra.mrb[4].mxu0 %vm264_vm2, %v818_v23  ;;  %v932_v51 = vsel %vm906_vm7, %v922_v39, %v931_v49  ;;  %v941_v58 = vsel %vm906_vm7, %v931_v49, %v940_v56 }
  0x4a   : > { %1452 = vmatprep.mubr.msk.bf16.mxu0 %vm1623_vm0, %v1622_v1 }
  0x4b   : > { %1389 = vmatmul.mubr.msk.bf16.vlgmr.msra.gmra.mrb[0].mxu1 %vm264_vm2, %v410_v24 }
  0x4c   : > { %1401 = vmatpush3.bf16.msra.mxu1 %v1608_v25  ;;  %1392 = vmatprep.mubr.msk.bf16.mxu1 %vm1623_vm0, %v1622_v1 }
  0x4d   : > { %1484 = vmatprep.subr.bf16.mxu1 %v1622_v1 }
  0x51   : > { %1453 = vmatmul.mubr.msk.bf16.gmra.mrb[8].mxu0 %vm264_vm2, %v820_v31 }
  0x52   : > { %1458 = vmatprep.mubr.msk.bf16.mxu0 %vm1623_vm0, %v1622_v1 }
  0x53   : > { %1393 = vmatmul.mubr.msk.bf16.gmra.mrb[4].mxu1 %vm264_vm2, %v412_v36 }
  0x54   : > { %1396 = vmatprep.mubr.msk.bf16.mxu1 %vm1623_vm0, %v1622_v1 }
  0x59   : > { %1459 = vmatmul.mubr.msk.bf16.vlgmr.msra.gmra.mrb[0].mxu0 %vm264_vm2, %v923_v43 }
  0x5a   : > { %1471 = vmatpush3.bf16.msra.mxu0 %v1610_v44  ;;  %1462 = vmatprep.mubr.msk.bf16.mxu0 %vm1623_vm0, %v1622_v1 }
  0x5b   : > { %1397 = vmatmul.mubr.msk.bf16.gmra.mrb[8].mxu1 %vm264_vm2, %v414_v48 }
  0x5c   : > { %1402 = vmatprep.mubr.msk.bf16.mxu1 %vm1623_vm0, %v1622_v1 }
  0x61   : > { %1463 = vmatmul.mubr.msk.bf16.gmra.mrb[4].mxu0 %vm264_vm2, %v932_v51 }
  0x62   : > { %1466 = vmatprep.mubr.msk.bf16.mxu0 %vm1623_vm0, %v1622_v1 }
  0x63   : > { %1403 = vmatmul.mubr.msk.bf16.vlgmr.msra.gmra.mrb[0].mxu1 %vm264_vm2, %v1750_v52  ;;  %v1030_v52 = vrot.slane %v1809_v18, 3 }
  0x64   : > { %1485 = vmatpush3.bf16.msra.mxu1 %v1665_v2  ;;  %1406 = vmatprep.mubr.msk.bf16.mxu1 %vm1623_vm0, %v1622_v1  ;;  %v1029_v2 = vsel %vm504_vm4, %v1027_v61, %v1028_v62 }
  0x65   : > { %v1033_v0 = vsel %vm504_vm4, %v1030_v52, %v1032_v63 }
  0x69   : > { %1467 = vmatmul.mubr.msk.bf16.gmra.mrb[8].mxu0 %vm264_vm2, %v941_v58 }
  0x6a   : > { %1472 = vmatprep.mubr.msk.bf16.mxu0 %vm1623_vm0, %v1622_v1 }
  0x6b   : > { %1407 = vmatmul.mubr.msk.bf16.gmra.mrb[4].mxu1 %vm264_vm2, %v1757_v55  ;;  %v1031_v55 = vsel %vm504_vm4, %v1028_v62, %v1030_v52 }
  0x6c   : > { %1410 = vmatprep.mubr.msk.bf16.mxu1 %vm1623_vm0, %v1622_v1 }
  0x71   : > { %1473 = vmatmul.mubr.msk.bf16.vlgmr.msra.gmra.mrb[0].mxu0 %vm264_vm2, %v1029_v2 }
  0x72   : > { %1476 = vmatprep.mubr.msk.bf16.mxu0 %vm1623_vm0, %v1622_v1 }
  0x73   : > { %1411 = vmatmul.mubr.msk.bf16.gmra.mrb[8].mxu1 %vm264_vm2, %v1762_v59 }
  0x74   : > { %1420 = vmatprep.mubr.msk.bf16.mxu1 %vm1623_vm0, %v1622_v1 }
  0x79   : > { %1477 = vmatmul.mubr.msk.bf16.gmra.mrb[4].mxu0 %vm264_vm2, %v1031_v55 }
  0x7a   : > { %1480 = vmatprep.mubr.msk.bf16.mxu0 %vm1623_vm0, %v1622_v1 }
  0x7b   : > { %1421 = vmatmul.mubr.msk.bf16.vlgmr.msra.gmra.mrb[4].mxu1 %vm264_vm2, %v1727_v38  ;;  %v1306_v38 = vld [vmem:[%s1931_s2] ss:$0 sm:$0xff] }
  0x7c   : > { %1424 = vmatprep.mubr.msk.bf16.mxu1 %vm1623_vm0, %v1622_v1  ;;  %v1307_v1 = vld [vmem:[%s1932_s3] ss:$0 sm:$0xff] }
  0x81   : > { %1481 = vmatmul.mubr.msk.bf16.gmra.mrb[8].mxu0 %vm264_vm2, %v1033_v0 }
  0x83   : > { %1425 = vmatmul.mubr.msk.bf16.gmra.mrb[8].mxu1 %vm264_vm2, %v1773_v3 }
 0x136   : > { %v561_v59 = vpop.f32.mrb[0].mxu1 }
 0x137   : > { %v1404_v5 = vpop.f32.mrb[1].mxu1 }
 0x138   : > { %v564_v12 = vpop.f32.mrb[2].mxu1 }
 0x139   : > { %v1405_v13 = vpop.f32.mrb[3].mxu1 }
 0x144   : > { %v1083_v6 = vpop.f32.mrb[0].mxu0 }
 0x145   : > { %v1486_v8 = vadd.f32 %v1083_v6, %v561_v59  ;;  %v1474_v14 = vpop.f32.mrb[1].mxu0 }
 0x146   : > { %v1086_v7 = vpop.f32.mrb[2].mxu0 }
 0x147   : > { %v1119_v15 = vmul.f32 %v1486_v8, %v1306_v38  ;;  %v1487_v9 = vadd.f32 %v1086_v7, %v564_v12  ;;  %v1475_v16 = vpop.f32.mrb[3].mxu0 }
 0x149   : > { %v1132_v3 = vadd.f32 %v1307_v1, %v1119_v15  ;;  %v1120_v17 = vmul.f32 %v1487_v9, %v1306_v38 }
 0x14b   : > { %v1138_v18 = vmax.f32 %v1132_v3, 0.0  ;;  %v1133_v19 = vadd.f32 %v1307_v1, %v1120_v17 }
 0x14c   : > { %v1091_v20 = vpop.f32.mrb[4].mxu0 }
 0x14d   : > { %v1316_v21 = vpack.c.bf16 %v1138_v18, %v1138_v18  ;;  %v1139_v22 = vmax.f32 %v1133_v19, 0.0  ;;  %v1478_v4 = vpop.f32.mrb[5].mxu0 }
 0x14e   : > { %v1094_v23 = vpop.f32.mrb[6].mxu0  ;;  %v680_v24 = vpop.f32.mrb[4].mxu1 }
 0x14f   : > { %1169 = vst.msk [vmem:[%s1912_s22] sm:$0xf] %vm1168_vm8, %v1316_v21  ;;  %v1317_v25 = vpack.c.bf16 %v1139_v22, %v1139_v22  ;;  %v1479_v26 = vpop.f32.mrb[7].mxu0  ;;  %v1488_v27 = vadd.f32 %v1091_v20, %v680_v24  ;;  %v1422_v28 = vpop.f32.mrb[5].mxu1 }
 0x150   : > { %v683_v10 = vpop.f32.mrb[6].mxu1 }
 0x151   : > { %1170 = vst.msk [vmem:[%s1912_s22 + $0x4] sm:$0xf] %vm1168_vm8, %v1317_v25  ;;  %v1121_v29 = vmul.f32 %v1488_v27, %v1306_v38  ;;  %v1489_v30 = vadd.f32 %v1094_v23, %v683_v10  ;;  %v1423_v31 = vpop.f32.mrb[7].mxu1 }
 0x153   : > { %v1134_v32 = vadd.f32 %v1307_v1, %v1121_v29  ;;  %v1122_v33 = vmul.f32 %v1489_v30, %v1306_v38 }
 0x154   : > { %v1099_v34 = vpop.f32.mrb[8].mxu0 }
 0x155   : > { %v1140_v35 = vmax.f32 %v1134_v32, 0.0  ;;  %v1135_v36 = vadd.f32 %v1307_v1, %v1122_v33  ;;  %v1482_v37 = vpop.f32.mrb[9].mxu0 }
 0x156   : > { %v1102_v39 = vpop.f32.mrb[10].mxu0  ;;  %v688_v11 = vpop.f32.mrb[8].mxu1 }
 0x157   : > { %v1318_v40 = vpack.c.bf16 %v1140_v35, %v1140_v35  ;;  %v1141_v42 = vmax.f32 %v1135_v36, 0.0  ;;  %v1483_v43 = vpop.f32.mrb[11].mxu0  ;;  %v1490_v44 = vadd.f32 %v1099_v34, %v688_v11  ;;  %v1426_v45 = vpop.f32.mrb[9].mxu1 }
 0x158   : > { %v691_v46 = vpop.f32.mrb[10].mxu1 }
 0x159   : > { %1171 = vst.msk [vmem:[%s1912_s22 + $0x8] sm:$0xf] %vm1168_vm8, %v1318_v40  ;;  %v1319_v47 = vpack.c.bf16 %v1141_v42, %v1141_v42  ;;  %v1123_v48 = vmul.f32 %v1490_v44, %v1306_v38  ;;  %v1491_v49 = vadd.f32 %v1102_v39, %v691_v46  ;;  %v1427_v41 = vpop.f32.mrb[11].mxu1 }
 0x15b   : > { %1172 = vst.msk [vmem:[%s1912_s22 + $0xc] sm:$0xf] %vm1168_vm8, %v1319_v47  ;;  %v1136_v50 = vadd.f32 %v1307_v1, %v1123_v48  ;;  %v1124_v51 = vmul.f32 %v1491_v49, %v1306_v38 }
 0x15d   : > { %v1142_v53 = vmax.f32 %v1136_v50, 0.0  ;;  %v1137_v54 = vadd.f32 %v1307_v1, %v1124_v51 }
 0x15f   : > { %v1320_v56 = vpack.c.bf16 %v1142_v53, %v1142_v53  ;;  %v1143_v57 = vmax.f32 %v1137_v54, 0.0 }
 0x161   : > { %1173 = vst.msk [vmem:[%s1912_s22 + $0x10] sm:$0xf] %vm1168_vm8, %v1320_v56  ;;  %v1321_v58 = vpack.c.bf16 %v1143_v57, %v1143_v57 }
 0x163   : > { %1174 = vst.msk [vmem:[%s1912_s22 + $0x14] sm:$0xf] %vm1168_vm8, %v1321_v58 }
 0x164 PF: > { %s14_s15 = sadd.s32 1, %s1620_s15  }
 0x165   : > { %p11_p4 = scmp.ge.s32.totalorder %s14_s15, 4  }
 0x167   :  { %13 = sbr.rel (!%p11_p4) target bundleno = 1 (0x1), region = 74 }

// kernel: resnet_rpp_forward.12
= control target key start
LH: loop header
LB: loop body
LE: loop exit
PB: predicated region body
PF: predicated region fallthrough
CT: control target
= control target key end

     0   :  { %vm25_vm0 = vcmask 523264   ;;  %v360_v1 = vmov 0.0   ;;  %vm78_vm1 = vcmask 130048   ;;  %vm278_vm2 = vcmask 519168   ;;  %s472_s1 = inlined_call_operand.vmem [shape: bf16[16,64], index: 1, kind: input, shape index: {}]   ;;  %s473_s0 = inlined_call_operand.vmem [shape: bf16[64,16], index: 0, kind: input, shape index: {}]   ;;  %s474_s4 = inlined_call_operand.vmem [shape: bf16[64,64], index: 4, kind: input, shape index: {}]   ;;  %s475_s2 = inlined_call_operand.vmem [shape: f32[1,64], index: 2, kind: input, shape index: {}]   ;;  %s476_s3 = inlined_call_operand.vmem [shape: f32[1,64], index: 3, kind: input, shape index: {}]   ;;  %s477_s5 = inlined_call_operand.vmem [shape: bf16[64,64], index: 5, kind: output, shape index: {}]  }
   0x1   :  { %v355_v0 = vld [vmem:[%s472_s1] sm:$0xff]   ;;  %28 = vst.msk [vmem:[#allocation2 + $0x10] sm:$0xff] %vm25_vm0, %v360_v1  ;;  %26 = vst.msk [vmem:[#allocation2] sm:$0xff] %vm25_vm0, %v360_v1  ;;  %v357_v3 = vld [vmem:[%s473_s0 + $0x10] sm:$0xff]  }
   0x2   :  { %27 = vst.msk [vmem:[#allocation2 + $0x8] sm:$0xff] %vm25_vm0, %v360_v1  ;;  %29 = vst.msk [vmem:[#allocation2 + $0x18] sm:$0xff] %vm25_vm0, %v360_v1  ;;  %v356_v2 = vld [vmem:[%s473_s0] sm:$0xff]   ;;  %342 = vmatprep.subr.bf16.mxu0 %v355_v0  ;;  %352 = vmatprep.subr.bf16.mxu1 %v355_v0  ;;  %v358_v4 = vld [vmem:[%s473_s0 + $0x8] sm:$0xff]  }
   0x3   :  { %30 = vst.msk [vmem:[#allocation2 + $0x20] sm:$0xff] %vm25_vm0, %v360_v1  ;;  %31 = vst.msk [vmem:[#allocation2 + $0x28] sm:$0xff] %vm25_vm0, %v360_v1  ;;  %343 = vmatpush3.bf16.msra.mxu0 %v355_v0  ;;  %353 = vmatpush3.bf16.msra.mxu1 %v355_v0  ;;  %v359_v5 = vld [vmem:[%s473_s0 + $0x18] sm:$0xff]   ;;  %v334_v30 = vld [vmem:[%s474_s4 + $0x8] sm:$0xff]  }
   0x4   :  { %32 = vst.msk [vmem:[#allocation2 + $0x30] sm:$0xff] %vm25_vm0, %v360_v1  ;;  %33 = vst.msk [vmem:[#allocation2 + $0x38] sm:$0xff] %vm25_vm0, %v360_v1  ;;  %344 = vmatprep.mubr.msk.bf16.mxu0 %vm78_vm1, %v356_v2  ;;  %348 = vmatprep.mubr.msk.bf16.mxu1 %vm78_vm1, %v357_v3  ;;  %v336_v31 = vld [vmem:[%s474_s4 + $0x18] sm:$0xff]   ;;  %v319_v32 = vld [vmem:[%s474_s4] sm:$0xff]   ;;  %v324_v35 = vunpack.c.l.bf16 %v334_v30  ;;  %v325_v42 = vunpack.c.h.bf16 %v334_v30 }
   0x5   :  { %v335_v33 = vld [vmem:[%s474_s4 + $0x10] sm:$0xff]   ;;  %v300_v34 = vld [vmem:[%s475_s2] ss:$0 sm:$0xff]  ;;  %v332_v39 = vunpack.c.l.bf16 %v336_v31  ;;  %v320_v40 = vunpack.c.l.bf16 %v319_v32  ;;  %v333_v47 = vunpack.c.h.bf16 %v336_v31  ;;  %v321_v48 = vunpack.c.h.bf16 %v319_v32 }
   0x6   :  { %345 = vmatmul.mubr.msk.bf16.vlgmr.msra.gmra.mrb[0].mxu0 %vm78_vm1, %v358_v4  ;;  %349 = vmatmul.mubr.msk.bf16.vlgmr.msra.gmra.mrb[0].mxu1 %vm78_vm1, %v359_v5  ;;  %v301_v37 = vld [vmem:[%s476_s3] ss:$0 sm:$0xff]  ;;  %v328_v41 = vunpack.c.l.bf16 %v335_v33  ;;  %v329_v53 = vunpack.c.h.bf16 %v335_v33 }
   0x8   :  { %v36_v6 = vld [vmem:[#allocation2 + $0x10] sm:$0xff]  ;;  %v34_v8 = vld [vmem:[#allocation2] sm:$0xff] }
   0x9   :  { %v37_v12 = vld [vmem:[#allocation2 + $0x18] sm:$0xff]  ;;  %v35_v18 = vld [vmem:[#allocation2 + $0x8] sm:$0xff] }
   0xa   :  { %v38_v9 = vld [vmem:[#allocation2 + $0x20] sm:$0xff]  ;;  %v39_v19 = vld [vmem:[#allocation2 + $0x28] sm:$0xff] }
   0xb   :  { %v40_v7 = vld [vmem:[#allocation2 + $0x30] sm:$0xff]  ;;  %v41_v13 = vld [vmem:[#allocation2 + $0x38] sm:$0xff] }
  0xd9   :  { %v346_v10 = vpop.f32.mrb[0].mxu0  ;;  %v350_v11 = vpop.f32.mrb[0].mxu1 }
  0xda   :  { %v158_v14 = vadd.f32 %v346_v10, %v36_v6  ;;  %v162_v15 = vadd.f32 %v350_v11, %v40_v7  ;;  %v125_v16 = vpop.f32.mrb[1].mxu0  ;;  %v141_v17 = vpop.f32.mrb[1].mxu1 }
  0xdb   :  { %v156_v20 = vadd.f32 %v125_v16, %v34_v8  ;;  %v160_v21 = vadd.f32 %v141_v17, %v38_v9  ;;  %v347_v22 = vpop.f32.mrb[2].mxu0  ;;  %v351_v23 = vpop.f32.mrb[2].mxu1 }
  0xdc   :  { %167 = vst.msk [vmem:[#allocation2 + $0x10] sm:$0xff] %vm25_vm0, %v158_v14  ;;  %171 = vst.msk [vmem:[#allocation2 + $0x30] sm:$0xff] %vm25_vm0, %v162_v15  ;;  %v159_v24 = vadd.f32 %v347_v22, %v37_v12  ;;  %v163_v25 = vadd.f32 %v351_v23, %v41_v13  ;;  %v128_v26 = vpop.f32.mrb[3].mxu0  ;;  %v144_v27 = vpop.f32.mrb[3].mxu1 }
  0xdd   :  { %165 = vst.msk [vmem:[#allocation2] sm:$0xff] %vm25_vm0, %v156_v20  ;;  %169 = vst.msk [vmem:[#allocation2 + $0x20] sm:$0xff] %vm25_vm0, %v160_v21  ;;  %v157_v28 = vadd.f32 %v128_v26, %v35_v18  ;;  %v161_v29 = vadd.f32 %v144_v27, %v39_v19 }
  0xde   :  { %168 = vst.msk [vmem:[#allocation2 + $0x18] sm:$0xff] %vm25_vm0, %v159_v24  ;;  %172 = vst.msk [vmem:[#allocation2 + $0x38] sm:$0xff] %vm25_vm0, %v163_v25 }
  0xdf   :  { %166 = vst.msk [vmem:[#allocation2 + $0x8] sm:$0xff] %vm25_vm0, %v157_v28  ;;  %170 = vst.msk [vmem:[#allocation2 + $0x28] sm:$0xff] %vm25_vm0, %v161_v29 }
  0xe3   :  { %v178_v36 = vld [vmem:[#allocation2 + $0x10] sm:$0xff] }
  0xe4   :  { %v182_v38 = vld [vmem:[#allocation2 + $0x30] sm:$0xff]  ;;  %v193_v43 = vmul.f32 %v300_v34, %v178_v36  ;;  %v176_v45 = vld [vmem:[#allocation2] sm:$0xff] }
  0xe5   :  { %v197_v44 = vmul.f32 %v300_v34, %v182_v38  ;;  %v180_v46 = vld [vmem:[#allocation2 + $0x20] sm:$0xff]  ;;  %v191_v49 = vmul.f32 %v300_v34, %v176_v45  ;;  %v179_v51 = vld [vmem:[#allocation2 + $0x18] sm:$0xff] }
  0xe6   :  { %v195_v50 = vmul.f32 %v300_v34, %v180_v46  ;;  %v183_v52 = vld [vmem:[#allocation2 + $0x38] sm:$0xff]  ;;  %v208_v54 = vadd.f32 %v301_v37, %v193_v43  ;;  %v194_v56 = vmul.f32 %v300_v34, %v179_v51  ;;  %v177_v58 = vld [vmem:[#allocation2 + $0x8] sm:$0xff] }
  0xe7   :  { %v212_v55 = vadd.f32 %v301_v37, %v197_v44  ;;  %v198_v57 = vmul.f32 %v300_v34, %v183_v52  ;;  %v181_v59 = vld [vmem:[#allocation2 + $0x28] sm:$0xff]  ;;  %v206_v60 = vadd.f32 %v301_v37, %v191_v49  ;;  %v192_v62 = vmul.f32 %v300_v34, %v177_v58 }
  0xe8   :  { %v210_v61 = vadd.f32 %v301_v37, %v195_v50  ;;  %v196_v63 = vmul.f32 %v300_v34, %v181_v59  ;;  %v232_v0 = vadd.f32 %v324_v35, %v208_v54  ;;  %v209_v2 = vadd.f32 %v301_v37, %v194_v56 }
  0xe9   :  { %v236_v1 = vadd.f32 %v332_v39, %v212_v55  ;;  %v213_v3 = vadd.f32 %v301_v37, %v198_v57  ;;  %v230_v4 = vadd.f32 %v320_v40, %v206_v60  ;;  %v207_v6 = vadd.f32 %v301_v37, %v192_v62 }
  0xea   :  { %v234_v5 = vadd.f32 %v328_v41, %v210_v61  ;;  %v211_v7 = vadd.f32 %v301_v37, %v196_v63  ;;  %v240_v8 = vmax.f32 %v232_v0, 0.0  ;;  %v233_v10 = vadd.f32 %v325_v42, %v209_v2 }
  0xeb   :  { %v244_v9 = vmax.f32 %v236_v1, 0.0  ;;  %v237_v11 = vadd.f32 %v333_v47, %v213_v3  ;;  %v238_v12 = vmax.f32 %v230_v4, 0.0  ;;  %v231_v14 = vadd.f32 %v321_v48, %v207_v6 }
  0xec   :  { %v242_v13 = vmax.f32 %v234_v5, 0.0  ;;  %v235_v15 = vadd.f32 %v329_v53, %v211_v7  ;;  %v312_v16 = vpack.c.bf16 %v240_v8, %v240_v8  ;;  %v241_v18 = vmax.f32 %v233_v10, 0.0 }
  0xed   :  { %v316_v17 = vpack.c.bf16 %v244_v9, %v244_v9  ;;  %v245_v19 = vmax.f32 %v237_v11, 0.0  ;;  %v310_v20 = vpack.c.bf16 %v238_v12, %v238_v12  ;;  %v239_v22 = vmax.f32 %v231_v14, 0.0 }
  0xee   :  { %v314_v21 = vpack.c.bf16 %v242_v13, %v242_v13  ;;  %v243_v23 = vmax.f32 %v235_v15, 0.0  ;;  %281 = vst.msk [vmem:[%s477_s5 + $0x8] sm:$0xf] %vm278_vm2, %v312_v16  ;;  %v313_v24 = vpack.c.bf16 %v241_v18, %v241_v18 }
  0xef   :  { %285 = vst.msk [vmem:[%s477_s5 + $0x18] sm:$0xf] %vm278_vm2, %v316_v17  ;;  %v317_v25 = vpack.c.bf16 %v245_v19, %v245_v19  ;;  %279 = vst.msk [vmem:[%s477_s5] sm:$0xf] %vm278_vm2, %v310_v20  ;;  %v311_v26 = vpack.c.bf16 %v239_v22, %v239_v22 }
  0xf0   :  { %283 = vst.msk [vmem:[%s477_s5 + $0x10] sm:$0xf] %vm278_vm2, %v314_v21  ;;  %v315_v27 = vpack.c.bf16 %v243_v23, %v243_v23  ;;  %282 = vst.msk [vmem:[%s477_s5 + $0xc] sm:$0xf] %vm278_vm2, %v313_v24 }
  0xf1   :  { %286 = vst.msk [vmem:[%s477_s5 + $0x1c] sm:$0xf] %vm278_vm2, %v317_v25  ;;  %280 = vst.msk [vmem:[%s477_s5 + $0x4] sm:$0xf] %vm278_vm2, %v311_v26 }
  0xf2   :  { %284 = vst.msk [vmem:[%s477_s5 + $0x14] sm:$0xf] %vm278_vm2, %v315_v27 }

// kernel: resnet_rpp_forward.13
= control target key start
LH: loop header
LB: loop body
LE: loop exit
PB: predicated region body
PF: predicated region fallthrough
CT: control target
= control target key end

     0   :  { %s779_s21 = smov 0   ;;  %s834_s0 = inlined_call_operand.vmem [shape: bf16[2,32,64], index: 0, kind: input, shape index: {}]   ;;  %s835_s1 = inlined_call_operand.vmem [shape: bf16[64,16], index: 1, kind: input, shape index: {}]   ;;  %s836_s2 = inlined_call_operand.vmem [shape: bf16[6,16], index: 2, kind: input, shape index: {}]   ;;  %s837_s3 = inlined_call_operand.vmem [shape: f32[6,1], index: 3, kind: input, shape index: {}]   ;;  %s838_s4 = inlined_call_operand.vmem [shape: f32[2,6,32], index: 4, kind: output, shape index: {0}]   ;;  %s839_s5 = inlined_call_operand.vmem [shape: f32[2,6,64], index: 5, kind: output, shape index: {1}]   ;;  %s840_s6 = inlined_call_operand.vmem [shape: f32[2,6,64], index: 6, kind: output, shape index: {2}]  }
   0x1 LB: > { %s646_s22 = sadd.s32 4294967295, %s739_s21   ;;  %p650_p0 = scmp.ge.s32.totalorder %s739_s21, 1  ;;  %s739_s21 = sphi %s779_s21, %s17_s21  }
   0x2   : > { %p217_p1 = scmp.lt.s32.totalorder %s739_s21, 3 }
   0x4   : > { %p218_p2 = pnand %p650_p0, %p217_p1 }
   0x5   : > { %v721_v0 = vld [vmem:[%s835_s1] sm:$0xff] (!%p218_p2)   ;;  %p254_p3 = scmp.lt.s32.totalorder (!%p218_p2), %s646_s22, 1  ;;  %v722_v1 = vld [vmem:[%s835_s1 + $0x8] sm:$0xff] (!%p218_p2)   ;;  %v723_v2 = vld [vmem:[%s835_s1 + $0x10] sm:$0xff] (!%p218_p2)   ;;  %vm318_vm0 = vcmask (!%p218_p2), 523264   ;;  %v741_v6 = vmov (!%p218_p2), 0.0  }
   0x6   : > { %221 = sbr.rel (%p218_p2) target bundleno = 923 (0x39b), region = 36  ;;  %681 = vmatprep.subr.bf16.mxu0 (!%p218_p2), %v721_v0  ;;  %v724_v4 = vld [vmem:[%s835_s1 + $0x18] sm:$0xff] (!%p218_p2)   ;;  %693 = vmatprep.subr.bf16.mxu1 (!%p218_p2), %v741_v6  ;;  %vm742_vm1 = vmmov (!%p218_p2), 0   ;;  %v397_v7 = vld [vmem:[%s837_s3] sm:$0x3f] (!%p218_p2)  ;;  %v743_v8 = vmov (!%p218_p2), 0  }
   0x7   : > { %682 = vmatpush3.bf16.msra.mxu0 (!%p218_p2), %v721_v0  ;;  %697 = vmatprep.mubr.msk.bf16.mxu1 (!%p218_p2), %vm742_vm1, %v741_v6  ;;  %vm374_vm2 = vcmask (!%p218_p2), 130048   ;;  %v394_v35 = vld [vmem:[%s836_s2] sm:$0x7] (!%p218_p2)  ;;  %vm452_vm3 = vcmask (!%p218_p2), 259072   ;;  %vm476_vm4 = vcmask (!%p218_p2), 261120   ;;  %vm521_vm5 = vcmask (!%p218_p2), 521216  }
   0x8   : > { %683 = vmatprep.subr.bf16.mxu0 (!%p218_p2), %v722_v1  ;;  %720 = vset.pattern.permute.xlu0 (!%p218_p2), %v743_v8 }
   0x9   : > { %400 = vperm.xlu0 (!%p218_p2), %720, %v397_v7  }
   0xb   : > { %684 = vmatpush3.bf16.msra.mxu0 (!%p218_p2), %v722_v1 }
   0xc   : > { %685 = vmatprep.subr.bf16.mxu0 (!%p218_p2), %v723_v2 }
   0xd   : > { %s842_s22 = smov (!%p254_p3, %s646_s22), 1 }
   0xe   : > { %s668_s29 = sshll.u32 %s842_s22, 4  ;;  %s653_s15 = sshll.u32 %s842_s22, 3 }
   0xf   : > { %s258_s8 = scalar_lea.vmem %s834_s0, %s668_s29  ;;  %686 = vmatpush3.bf16.msra.mxu0 %v723_v2  ;;  %s262_s18 = scalar_lea.vmem %s838_s4, %s653_s15 }
  0x10   : > { %v725_v3 = vld [vmem:[%s258_s8] sm:$0xff]   ;;  %687 = vmatprep.subr.bf16.mxu0 %v724_v4  ;;  %v726_v5 = vld [vmem:[%s258_s8 + $0x8] sm:$0xff]   ;;  %s266_s23 = scalar_lea.vmem %s839_s5, %s653_s15  ;;  %s270_s25 = scalar_lea.vmem %s840_s6, %s653_s15 }
  0x11   : > { %689 = vmatprep.mubr.msk.bf16.mxu0 %vm318_vm0, %v725_v3 }
  0x13   : > { %688 = vmatpush3.bf16.msra.mxu0 %v724_v4 }
  0x14   : > { %701 = vmatprep.subr.bf16.mxu0 %v741_v6 }
  0x16   : > { %690 = vmatmul.mubr.msk.bf16.vlgmr.msra.gmra.mrb[0].mxu0 %vm318_vm0, %v726_v5 }
  0x17   : > { %702 = vmatpush3.bf16.msra.mxu0 %v725_v3  ;;  %705 = vmatprep.mubr.msk.bf16.mxu0 %vm742_vm1, %v741_v6 }
  0x18   : > { %703 = vmatprep.subr.bf16.mxu0 %v741_v6 }
  0x1b   : > { %704 = vmatpush3.bf16.msra.mxu0 %v726_v5 }
  0x88   : > { %v401_v36 = vpop.permute.xlu0 %400 }
  0xe9   : > { %v691_v9 = vpop.f32.mrb[0].mxu0 }
  0xea   : > { %v359_v10 = vpop.f32.mrb[1].mxu0  ;;  %v378_v16 = vsel %vm374_vm2, %v691_v9, 0.0 }
  0xeb   : > { %v692_v11 = vpop.f32.mrb[2].mxu0  ;;  %v375_v13 = vsel %vm374_vm2, %v359_v10, 0.0 }
  0xec   : > { %v362_v12 = vpop.f32.mrb[3].mxu0  ;;  %v380_v18 = vsel %vm374_vm2, %v692_v11, 0.0 }
  0xed   : > { %v376_v14 = vsel %vm374_vm2, %v362_v12, 0.0 }
  0xee   : > { %v377_v15 = vadd.f32 %v376_v14, %v375_v13 }
  0xf0   : > { %v379_v17 = vadd.f32 %v378_v16, %v377_v15 }
  0xf2   : > { %v381_v19 = vadd.f32 %v380_v18, %v379_v17 }
  0xf4   : > { %v382_v20 = vrot.slane %v381_v19, 4 }
  0xf6   : > { %v383_v21 = vadd.f32 %v382_v20, %v381_v19 }
  0xf8   : > { %v384_v22 = vrot.slane %v383_v21, 2 }
  0xfa   : > { %v385_v23 = vadd.f32 %v384_v22, %v383_v21 }
  0xfc   : > { %v386_v24 = vrot.slane %v385_v23, 1 }
  0xfe   : > { %v387_v25 = vadd.f32 %v386_v24, %v385_v23 }
 0x100   : > { %v389_v26 = vmul.f32 0.03125, %v387_v25 }
 0x102   : > { %v391_v27 = vsub.f32 %v362_v12, %v389_v26  ;;  %v390_v28 = vsub.f32 %v359_v10, %v389_v26  ;;  %v392_v29 = vsub.f32 %v691_v9, %v389_v26  ;;  %v393_v30 = vsub.f32 %v692_v11, %v389_v26 }
 0x104   : > { %v395_v31 = vpack.c.bf16 %v391_v27, %v390_v28  ;;  %v396_v32 = vpack.c.bf16 %v393_v30, %v392_v29 }
 0x106   : > { %v407_v33 = vsel %vm374_vm2, %v395_v31, 0  ;;  %v410_v34 = vsel %vm374_vm2, %v396_v32, 0 }
 0x107   : > { %694 = vmatpush3.bf16.xpose.msra.mxu1 %v407_v33 }
 0x108   : > { %695 = vmatprep.subr.bf16.mxu1 %v741_v6 }
 0x10f   : > { %696 = vmatpush3.bf16.xpose.msra.mxu1 %v410_v34 }
 0x116   : > { %698 = vmatmul.mubr.msk.bf16.vlgmr.msra.gmra.mrb[0].mxu1 %vm374_vm2, %v394_v35 }
 0x1e9   : > { %v446_v37 = vpop.f32.mrb[0].mxu1 }
 0x1ea   : > { %v447_v38 = vadd.f32 %v446_v37, %v401_v36  ;;  %v699_v39 = vpop.f32.mrb[1].mxu1 }
 0x1eb   : > { %v449_v40 = vpop.f32.mrb[2].mxu1 }
 0x1ec   : > { %v453_v41 = vsel %vm452_vm3, %v447_v38, -inf  ;;  %v700_v42 = vpop.f32.mrb[3].mxu1 }
 0x1ed   : > { %v454_v43 = vrot.slane %v453_v41, 4 }
 0x1ef   : > { %v455_v44 = vmax.f32 %v453_v41, %v454_v43 }
 0x1f1   : > { %v456_v45 = vrot.slane %v455_v44, 2 }
 0x1f3   : > { %v457_v46 = vmax.f32 %v455_v44, %v456_v45 }
 0x1f5   : > { %v458_v47 = vrot.slane %v457_v46, 1 }
 0x1f7   : > { %v459_v48 = vmax.f32 %v457_v46, %v458_v47 }
 0x1f9   : > { %v460_v49 = vsub.f32 %v447_v38, %v459_v48 }
 0x1fb   : > { %v461_v50 = vmul.f32 1.442695, %v460_v49 }
 0x1fd   : > { %727 = vpow2.f32 %v461_v50 }
 0x207   : > { %v728_v51 = vpop.eup %727 }
 0x208   : > { %v463_v52 = vsel %vm452_vm3, %v728_v51, 0.0 }
 0x209   : > { %v464_v53 = vrot.slane %v463_v52, 4 }
 0x20b   : > { %v465_v54 = vadd.f32 %v464_v53, %v463_v52 }
 0x20d   : > { %v466_v55 = vrot.slane %v465_v54, 2 }
 0x20f   : > { %v467_v56 = vadd.f32 %v466_v55, %v465_v54 }
 0x211   : > { %v468_v57 = vrot.slane %v467_v56, 1 }
 0x213   : > { %v469_v58 = vadd.f32 %v468_v57, %v467_v56 }
 0x215   : > { %729 = vrcp.f32 %v469_v58 }
 0x21f   : > { %v730_v59 = vpop.eup %729 }
 0x220   : > { %v471_v60 = vmul.f32 %v730_v59, %v728_v51 }
 0x222   : > { %472 = vst.msk [vmem:[%s262_s18] sm:$0x3f] %vm452_vm3, %v471_v60  ;;  %v473_v61 = vpack.c.bf16 %v471_v60, %v471_v60 }
 0x224   : > { %706 = vmatmul.mubr.msk.bf16.vlgmr.msra.gmra.mrb[4].mxu0 %vm476_vm4, %v473_v61 }
 0x2f7   : > { %v514_v62 = vpop.f32.mrb[4].mxu0 }
 0x2f8   : > { %v520_v63 = vmul.f32 0.1875, %v514_v62  ;;  %v707_v0 = vpop.f32.mrb[5].mxu0 }
 0x2f9   : > { %v517_v1 = vpop.f32.mrb[6].mxu0 }
 0x2fa   : > { %v708_v2 = vpop.f32.mrb[7].mxu0  ;;  %v523_v3 = vmul.f32 %v520_v63, %v520_v63  ;;  %522 = vst.msk [vmem:[%s266_s23] sm:$0x3f] %vm521_vm5, %v520_v63 }
 0x2fc   : > { %v524_v4 = vsel %vm521_vm5, %v523_v3, 0.0 }
 0x2fd   : > { %525 = vadd.xlane.f32.xlu0 %v524_v4 }
 0x38a   : > { %v526_v5 = vpop.xlane.xlu0 %525 }
 0x38b   : > { %v527_v6 = vadd.f32 1e-12, %v526_v5 }
 0x38d   : > { %731 = vrsqrt.f32 %v527_v6 }
 0x397   : > { %v732_v7 = vpop.eup %731 }
 0x398   : > { %v529_v8 = vmul.f32 %v732_v7, %v520_v63 }
 0x39a   : > { %530 = vst.msk [vmem:[%s270_s25] sm:$0x3f] %vm521_vm5, %v529_v8 }
 0x39b PF: > { %s17_s21 = sadd.s32 1, %s739_s21  }
 0x39c   : > { %p14_p4 = scmp.ge.s32.totalorder %s17_s21, 4  }
 0x39e   :  { %16 = sbr.rel (!%p14_p4) target bundleno = 1 (0x1), region = 90 }

// kernel: resnet_rpp_forward.15
= control target key start
LH: loop header
LB: loop body
LE: loop exit
PB: predicated region body
PF: predicated region fallthrough
CT: control target
= control target key end

     0   :  { %s407_s12 = smov 0   ;;  %s430_s0 = inlined_call_operand.vmem [shape: bf16[6,2,32], index: 0, kind: input, shape index: {}]   ;;  %s431_s1 = inlined_call_operand.vmem [shape: bf16[6,32,10], index: 1, kind: input, shape index: {}]   ;;  %s432_s2 = inlined_call_operand.vmem [shape: f32[6,1,10], index: 2, kind: input, shape index: {}]   ;;  %s433_s3 = inlined_call_operand.vmem [shape: f32[6,2,10], index: 3, kind: output, shape index: {}]  }
   0x1 LB: > { %s339_s13 = sadd.s32 4294967295, %s383_s12   ;;  %p343_p0 = scmp.ge.s32.totalorder %s383_s12, 1  ;;  %s383_s12 = sphi %s407_s12, %s13_s12  }
   0x2   : > { %p153_p1 = scmp.lt.s32.totalorder %s383_s12, 7 }
   0x4   : > { %p154_p2 = pnand %p343_p0, %p153_p1 }
   0x5   : > { %p182_p3 = scmp.lt.s32.totalorder (!%p154_p2), %s339_s13, 5  ;;  %v385_v0 = vmov (!%p154_p2), 0.0   ;;  %vm386_vm0 = vmmov (!%p154_p2), 0   ;;  %vm222_vm1 = vcmask (!%p154_p2), 261120   ;;  %vm266_vm2 = vcmask (!%p154_p2), 74752  }
   0x6   : > { %157 = sbr.rel (%p154_p2) target bundleno = 239 (0xef), region = 32  ;;  %357 = vmatprep.subr.bf16.mxu0 (!%p154_p2), %v385_v0  ;;  %361 = vmatprep.mubr.msk.bf16.mxu0 (!%p154_p2), %vm386_vm0, %v385_v0 }
   0xd   : > { %s435_s13 = smov (!%p182_p3, %s339_s13), 5 }
   0xe   : > { %s353_s14 = sshll.u32 %s435_s13, 4  ;;  %s184_s20 = scalar_lea.vmem %s430_s0, %s435_s13 }
   0xf   : > { %s189_s17 = scalar_lea.vmem %s431_s1, %s353_s14  ;;  %v198_v3 = vld [vmem:[%s184_s20] sm:$0x1]  ;;  %s192_s23 = scalar_lea.vmem %s432_s2, %s435_s13 }
  0x10   : > { %v375_v1 = vld [vmem:[%s189_s17] sm:$0xff]   ;;  %v376_v2 = vld [vmem:[%s189_s17 + $0x8] sm:$0xff]   ;;  %s346_s24 = sshll.u32 %s435_s13, 1 }
  0x11   : > { %358 = vmatpush3.bf16.msra.mxu0 %v375_v1  ;;  %v347_v4 = vld [vmem:[%s192_s23] ss:$0 sm:$0xff]  ;;  %s196_s27 = scalar_lea.vmem %s433_s3, %s346_s24 }
  0x12   : > { %359 = vmatprep.subr.bf16.mxu0 %v385_v0 }
  0x15   : > { %360 = vmatpush3.bf16.msra.mxu0 %v376_v2 }
  0x18   : > { %362 = vmatmul.mubr.msk.bf16.vlgmr.msra.gmra.mrb[0].mxu0 %vm222_vm1, %v198_v3 }
  0xeb   : > { %v260_v5 = vpop.f32.mrb[0].mxu0 }
  0xec   : > { %v261_v6 = vadd.f32 %v347_v4, %v260_v5  ;;  %v363_v7 = vpop.f32.mrb[1].mxu0 }
  0xed   : > { %v263_v8 = vpop.f32.mrb[2].mxu0 }
  0xee   : > { %267 = vst.msk [vmem:[%s196_s27] sm:$0x3] %vm266_vm2, %v261_v6  ;;  %v364_v9 = vpop.f32.mrb[3].mxu0 }
  0xef PF: > { %s13_s12 = sadd.s32 1, %s383_s12  }
  0xf0   : > { %p10_p4 = scmp.ge.s32.totalorder %s13_s12, 8  }
  0xf2   :  { %12 = sbr.rel (!%p10_p4) target bundleno = 1 (0x1), region = 68 }

// kernel: resnet_rpp_forward.14
= control target key start
LH: loop header
LB: loop body
LE: loop exit
PB: predicated region body
PF: predicated region fallthrough
CT: control target
= control target key end

     0   :  { %vm22_vm0 = vcmask 261120   ;;  %v194_v0 = vmov 0.0   ;;  %vm195_vm1 = vmmov 0   ;;  %vm67_vm2 = vcmask 523264   ;;  %s253_s1 = inlined_call_operand.vmem [shape: bf16[64,32], index: 1, kind: input, shape index: {}]   ;;  %s254_s0 = inlined_call_operand.vmem [shape: bf16[12,64], index: 0, kind: input, shape index: {}]   ;;  %s255_s2 = inlined_call_operand.vmem [shape: f32[1,32], index: 2, kind: input, shape index: {}]   ;;  %s256_s3 = inlined_call_operand.vmem [shape: f32[1,32], index: 3, kind: input, shape index: {}]   ;;  %s257_s4 = inlined_call_operand.vmem [shape: bf16[12,32], index: 4, kind: output, shape index: {}]  }
   0x1   :  { %175 = vmatprep.subr.bf16.mxu0 %v194_v0  ;;  %v189_v1 = vld [vmem:[%s253_s1] sm:$0xff]   ;;  %183 = vmatprep.mubr.msk.bf16.mxu0 %vm195_vm1, %v194_v0  ;;  %23 = vst.msk [vmem:[#allocation2] sm:$0xff] %vm22_vm0, %v194_v0  ;;  %v190_v2 = vld [vmem:[%s253_s1 + $0x8] sm:$0xff]   ;;  %v191_v3 = vld [vmem:[%s253_s1 + $0x10] sm:$0xff]   ;;  %vm24_vm3 = vcmask 257024   ;;  %vm152_vm4 = vcmask 254976  }
   0x2   :  { %176 = vmatpush3.bf16.msra.mxu0 %v189_v1  ;;  %v192_v4 = vld [vmem:[%s253_s1 + $0x18] sm:$0xff]   ;;  %v193_v5 = vld [vmem:[%s254_s0] sm:$0x3f]   ;;  %25 = vst.msk [vmem:[#allocation2 + $0x8] sm:$0xf] %vm24_vm3, %v194_v0 }
   0x3   :  { %177 = vmatprep.subr.bf16.mxu0 %v194_v0  ;;  %v164_v14 = vld [vmem:[%s255_s2] ss:$0 sm:$0xff] }
   0x4   :  { %v165_v16 = vld [vmem:[%s256_s3] ss:$0 sm:$0xff] }
   0x6   :  { %178 = vmatpush3.bf16.msra.mxu0 %v190_v2 }
   0x7   :  { %179 = vmatprep.subr.bf16.mxu0 %v194_v0 }
   0x8   :  { %v26_v6 = vld [vmem:[#allocation2] sm:$0xff] }
   0x9   :  { %v27_v8 = vld [vmem:[#allocation2 + $0x8] sm:$0xf] }
   0xa   :  { %180 = vmatpush3.bf16.msra.mxu0 %v191_v3 }
   0xb   :  { %181 = vmatprep.subr.bf16.mxu0 %v194_v0 }
   0xe   :  { %182 = vmatpush3.bf16.msra.mxu0 %v192_v4 }
  0x11   :  { %184 = vmatmul.mubr.msk.bf16.vlgmr.msra.gmra.mrb[0].mxu0 %vm67_vm2, %v193_v5 }
  0xe4   :  { %v105_v7 = vpop.f32.mrb[0].mxu0 }
  0xe5   :  { %v112_v9 = vadd.f32 %v105_v7, %v26_v6  ;;  %v185_v10 = vpop.f32.mrb[1].mxu0 }
  0xe6   :  { %v108_v11 = vpop.f32.mrb[2].mxu0 }
  0xe7   :  { %115 = vst.msk [vmem:[#allocation2] sm:$0xff] %vm22_vm0, %v112_v9  ;;  %v113_v12 = vadd.f32 %v108_v11, %v27_v8  ;;  %v186_v13 = vpop.f32.mrb[3].mxu0 }
  0xe9   :  { %117 = vst.msk [vmem:[#allocation2 + $0x8] sm:$0xf] %vm24_vm3, %v113_v12 }
  0xee   :  { %v121_v15 = vld [vmem:[#allocation2] sm:$0xff] }
  0xef   :  { %v130_v17 = vmul.f32 %v164_v14, %v121_v15 }
  0xf0   :  { %v122_v18 = vld [vmem:[#allocation2 + $0x8] sm:$0xf] }
  0xf1   :  { %v131_v19 = vmul.f32 %v164_v14, %v122_v18  ;;  %v139_v20 = vadd.f32 %v165_v16, %v130_v17 }
  0xf3   :  { %v140_v21 = vadd.f32 %v165_v16, %v131_v19  ;;  %v141_v22 = vmax.f32 %v139_v20, 0.0 }
  0xf5   :  { %v142_v23 = vmax.f32 %v140_v21, 0.0  ;;  %v168_v24 = vpack.c.bf16 %v141_v22, %v141_v22 }
  0xf7   :  { %v169_v25 = vpack.c.bf16 %v142_v23, %v142_v23  ;;  %151 = vst.msk [vmem:[%s257_s4] sm:$0xf] %vm24_vm3, %v168_v24 }
  0xf9   :  { %153 = vst.msk [vmem:[%s257_s4 + $0x4] sm:$0x3] %vm152_vm4, %v169_v25 }

</bundles_post_ra>
